<compile_context>
chip_gen: v7x
topology: tpu7x:2x2x1
jax: 0.10.0
libtpu: 0.0.40
codegen_flags: <defaults>
</compile_context>

<pallas_src>
import functools

import jax
import jax.numpy as jnp
from jax import lax
from jax.experimental import pallas as pl
from jax.experimental.pallas import tpu as pltpu


HARD_P_COL = 15
HARD_N_COL = 30
_BIG = 1e30          # larger than any real (clamped) squared distance


def _round_up(x, m):
    return (x + m - 1) // m * m


def _l2_normalize(x, eps=1e-12):
    # F.normalize: v / max(||v||_2, eps)
    norm = jnp.sqrt(jnp.sum(x * x, axis=1, keepdims=True))
    return x / jnp.maximum(norm, eps)


def _soft_triplet_kernel(n_ref, *refs, margin, tm, reg_carry):
    use_emb2 = margin is None
    it = iter(refs)
    x1_ref = next(it)
    sqc1_ref = next(it)
    sqr1_ref = next(it)
    if use_emb2:
        x2_ref = next(it)
        sqc2_ref = next(it)
        sqr2_ref = next(it)
    out_ref = next(it)
    dwork_ref = None if reg_carry else next(it)

    n_actual = n_ref[0]
    n_pad = x1_ref.shape[0]
    row0 = pl.multiple_of(pl.program_id(0) * tm, tm)

    # Gram matrix on the MXU via an NT contraction (no transpose of the full
    # block); squared norms were precomputed in the wrapper.  The add / clamp is
    # always f32, even when the matmul operands are bf16.
    x_rows = x1_ref[pl.ds(row0, tm), :]
    gram = lax.dot_general(x_rows, x1_ref[...], (((1,), (1,)), ((), ())),
                           preferred_element_type=jnp.float32)          # (tm, n_pad)
    d_sq = jnp.maximum(sqr1_ref[...] + sqc1_ref[...] - 2.0 * gram, 1e-12)

    col_i = lax.broadcasted_iota(jnp.int32, (tm, n_pad), 1)
    colf = col_i.astype(jnp.float32)
    d_sq = jnp.where(col_i >= n_actual, _BIG, d_sq)     # padded columns rank last

    # 31 stable masked-min passes (== the first 31 steps of a stable ascending
    # sort): pass k finds the (k+1)-th smallest entry of each row, ties broken by
    # lowest column index.  Fully unrolled so the k==15 / k==30 records are static
    # and the dw carry stays register-resident (reg_carry) instead of
    # round-tripping VMEM every pass.
    # TODO(synk): the per-pass index reduction could be dropped (value-only
    # knockout) to halve the XLU work, but that changes results under exact fp32
    # ties, so the stable path is kept.
    if reg_carry:
        dw = d_sq
    else:
        dwork_ref[...] = d_sq

    hp_sq = hn_sq = hp_idx = hn_idx = None
    for k in range(HARD_N_COL + 1):
        if not reg_carry:
            dw = dwork_ref[...]
        row_min = jnp.min(dw, axis=1, keepdims=True)                     # (tm, 1)
        idx = jnp.min(jnp.where(dw == row_min, colf, float(n_pad)),
                      axis=1, keepdims=True)                             # (tm, 1)
        if k == HARD_P_COL:
            hp_sq, hp_idx = row_min, idx
        elif k == HARD_N_COL:
            hn_sq, hn_idx = row_min, idx
        if k < HARD_N_COL:
            knocked = jnp.where(colf == idx, _BIG, dw)
            if reg_carry:
                dw = knocked
            else:
                dwork_ref[...] = knocked

    dist_ap = jnp.sqrt(hp_sq)                                            # (tm, 1)
    dist_an = jnp.sqrt(hn_sq)

    # log_softmax over the (ap, an) pair
    m = jnp.maximum(dist_ap, dist_an)
    lse = m + jnp.log(jnp.exp(dist_ap - m) + jnp.exp(dist_an - m))
    log_p = dist_ap - lse
    log_n = dist_an - lse

    row_g = row0 + lax.broadcasted_iota(jnp.int32, (tm, 1), 0)
    valid = (row_g < n_actual).astype(jnp.float32)                       # mask pad rows

    if margin is not None:
        per_row = -margin * log_p - (1.0 - margin) * log_n
    else:
        # emb2 distances and the two one-hot gathers run once, after the loop.
        y_rows = x2_ref[pl.ds(row0, tm), :]
        gram2 = lax.dot_general(y_rows, x2_ref[...], (((1,), (1,)), ((), ())),
                                preferred_element_type=jnp.float32)
        d2_sq = jnp.maximum(sqr2_ref[...] + sqc2_ref[...] - 2.0 * gram2, 1e-12)
        ap_ref_sq = jnp.sum(jnp.where(colf == hp_idx, d2_sq, 0.0),
                            axis=1, keepdims=True)
        an_ref_sq = jnp.sum(jnp.where(colf == hn_idx, d2_sq, 0.0),
                            axis=1, keepdims=True)
        dist_ap_ref = jnp.sqrt(ap_ref_sq)
        dist_an_ref = jnp.sqrt(an_ref_sq)
        m2 = jnp.maximum(dist_ap_ref, dist_an_ref)
        ep = jnp.exp(dist_ap_ref - m2)
        en = jnp.exp(dist_an_ref - m2)
        per_row = -(ep * log_p + en * log_n) / (ep + en)

    tile_loss = jnp.sum(per_row * valid)             # mean (divide by N) in wrapper
    out_ref[...] = jnp.zeros((1, 1, 128), jnp.float32) + tile_loss


def soft_triplet_loss(emb1, emb2=None, label=None, *, margin=None,
                      normalize_feature=True, gram_dtype=jnp.float32):
    """Pallas implementation of SoftTripletLoss(margin, normalize_feature)(emb1, emb2, label).

    gram_dtype=jnp.bfloat16 runs the Gram matmuls with bf16 operands (v6e/v7x
    MXU-native, halves the resident VMEM footprint); everything after the matmul
    stays f32.  The f32 default matches the torch reference numerics.
    """
    del label  # mat_sim is dead code in the reference forward
    emb1 = jnp.asarray(emb1, jnp.float32)
    N, D = emb1.shape
    assert N > HARD_N_COL, "reference hard-codes sorted columns 15 and 30"

    n_pad = _round_up(max(N, 128), 128)          # multiple of 128 (lane-dense)
    d_pad = _round_up(D, 128)

    # Row tile: 64 for small batches (>= 2 grid steps for v7x megacore, working
    # tile register-resident); 128 + VMEM scratch fallback for large column counts.
    if n_pad <= 256:
        tm, reg_carry = 64, True
    else:
        tm, reg_carry = 128, False
    num_tiles = n_pad // tm

    def prep(x):
        x = jnp.asarray(x, jnp.float32)
        if normalize_feature:
            x = _l2_normalize(x)                 # hoisted out of the kernel
        x = jnp.pad(x, ((0, n_pad - x.shape[0]), (0, d_pad - x.shape[1])))
        sq = jnp.sum(x * x, axis=1)              # squared norms, f32, computed once
        return x.astype(gram_dtype), sq[None, :], sq[:, None]

    x1, sqc1, sqr1 = prep(emb1)

    full_x_spec = pl.BlockSpec((n_pad, d_pad), lambda i, n: (0, 0))
    sqc_spec = pl.BlockSpec((1, n_pad), lambda i, n: (0, 0))
    sqr_spec = pl.BlockSpec((tm, 1), lambda i, n: (i, 0))

    inputs = [x1, sqc1, sqr1]
    in_specs = [full_x_spec, sqc_spec, sqr_spec]
    if margin is None:
        x2, sqc2, sqr2 = prep(emb2)
        inputs += [x2, sqc2, sqr2]
        in_specs += [full_x_spec, sqc_spec, sqr_spec]
    # (margin is not None: emb2 is never passed -> no HBM->VMEM DMA for it)

    scratch = [] if reg_carry else [pltpu.VMEM((tm, n_pad), jnp.float32)]

    kernel = functools.partial(_soft_triplet_kernel, margin=margin, tm=tm,
                               reg_carry=reg_carry)

    n_arr = jnp.asarray([N], jnp.int32)   # scalar prefetch: no recompile per N

    partial_sums = pl.pallas_call(
        kernel,
        out_shape=jax.ShapeDtypeStruct((num_tiles, 1, 128), jnp.float32),
        grid_spec=pltpu.PrefetchScalarGridSpec(
            num_scalar_prefetch=1,
            grid=(num_tiles,),
            in_specs=in_specs,
            out_specs=pl.BlockSpec((1, 1, 128), lambda i, n: (i, 0, 0)),
            scratch_shapes=scratch),
        compiler_params=pltpu.CompilerParams(
            dimension_semantics=("parallel",),
            vmem_limit_bytes=64 * 1024 * 1024),
    )(n_arr, *inputs)

    return jnp.sum(partial_sums[:, 0, 0]) / N


# ---------------- pure-JAX reference (mirrors the torch module) ----------------
def soft_triplet_loss_ref(emb1, emb2, label=None, margin=None, normalize_feature=True):
    del label
    if normalize_feature:
        emb1 = emb1 / jnp.maximum(jnp.linalg.norm(emb1, axis=1, keepdims=True), 1e-12)
        emb2 = emb2 / jnp.maximum(jnp.linalg.norm(emb2, axis=1, keepdims=True), 1e-12)

    def dist(x):
        sq = jnp.sum(x * x, axis=1, keepdims=True)
        d = sq + sq.T - 2.0 * (x @ x.T)
        return jnp.sqrt(jnp.maximum(d, 1e-12))

    d1 = dist(emb1)
    order = jnp.argsort(d1, axis=1)
    sorted_d = jnp.take_along_axis(d1, order, axis=1)
    hard_p = sorted_d[:, HARD_P_COL]
    hard_n = sorted_d[:, HARD_N_COL]
    ap_idx = order[:, HARD_P_COL]
    an_idx = order[:, HARD_N_COL]
    triple = jnp.stack([hard_p, hard_n], axis=1)
    log_triple = jax.nn.log_softmax(triple, axis=1)
    if margin is not None:
        return jnp.mean(-margin * log_triple[:, 0] - (1.0 - margin) * log_triple[:, 1])
    d2 = dist(emb2)
    n = d1.shape[0]
    ap_ref = d2[jnp.arange(n), ap_idx]
    an_ref = d2[jnp.arange(n), an_idx]
    w = jax.nn.softmax(jnp.stack([ap_ref, an_ref], axis=1), axis=1)
    return jnp.sum(jnp.mean(-w * log_triple, axis=0))


if __name__ == "__main__":
    N, D = 32, 32  # N must exceed 30 (reference indexes sorted columns 15 and 30)
    key = jax.random.PRNGKey(0)
    k1, k2, k3 = jax.random.split(key, 3)
    emb1 = jax.random.normal(k1, (N, D), dtype=jnp.float32)
    emb2 = jax.random.normal(k2, (N, D), dtype=jnp.float32)
    label = jax.random.randint(k3, (N,), 0, 4, dtype=jnp.int32)  # unused by the math

    # margin=None branch (uses emb2)
    loss = jax.block_until_ready(
        soft_triplet_loss(emb1, emb2, label, margin=None, normalize_feature=True))
    ref = soft_triplet_loss_ref(emb1, emb2, label, margin=None, normalize_feature=True)
    assert jnp.allclose(loss, ref, atol=1e-5, rtol=1e-5), (loss, ref)

    # margin branch (emb2 not even passed to / DMA'd by the kernel)
    loss_m = jax.block_until_ready(
        soft_triplet_loss(emb1, emb2, label, margin=0.3, normalize_feature=True))
    ref_m = soft_triplet_loss_ref(emb1, emb2, label, margin=0.3, normalize_feature=True)
    assert jnp.allclose(loss_m, ref_m, atol=1e-5, rtol=1e-5), (loss_m, ref_m)

    # bf16-Gram fast path (v6e/v7x MXU).  Ranking on bf16 Grams can differ under
    # near-ties, so only a loose sanity check here.
    loss_bf16 = jax.block_until_ready(
        soft_triplet_loss(emb1, emb2, label, margin=0.3, normalize_feature=True,
                          gram_dtype=jnp.bfloat16))
    assert jnp.allclose(loss_bf16, ref_m, atol=5e-2), (loss_bf16, ref_m)

    print("KERNEL_OK")
</pallas_src>

<mosaic_0001>
module attributes {stable_mosaic.version = 11 : i64} {
  func.func @_soft_triplet_kernel(%arg0: i32, %arg1: memref<1xi32, #tpu.memory_space<smem>>, %arg2: memref<128x128xf32, #tpu.memory_space<vmem>>, %arg3: memref<1x128xf32, #tpu.memory_space<vmem>>, %arg4: memref<64x1xf32, #tpu.memory_space<vmem>>, %arg5: memref<128x128xf32, #tpu.memory_space<vmem>>, %arg6: memref<1x128xf32, #tpu.memory_space<vmem>>, %arg7: memref<64x1xf32, #tpu.memory_space<vmem>>, %arg8: memref<1x1x128xf32, #tpu.memory_space<vmem>>) attributes {dimension_semantics = [#tpu.dimension_semantics<parallel>], iteration_bounds = array<i64: 2>, scalar_prefetch = 1 : i64, scratch_operands = 0 : i64, tpu.core_type = #tpu.core_type<tc>, window_params = [{pipeline_mode = #tpu.pipeline_mode<synchronous>, transform_indices = @transform_0, window_bounds = array<i64: 128, 128>}, {pipeline_mode = #tpu.pipeline_mode<synchronous>, transform_indices = @transform_1, window_bounds = array<i64: 1, 128>}, {transform_indices = @transform_2, window_bounds = array<i64: 64, 1>}, {pipeline_mode = #tpu.pipeline_mode<synchronous>, transform_indices = @transform_3, window_bounds = array<i64: 128, 128>}, {pipeline_mode = #tpu.pipeline_mode<synchronous>, transform_indices = @transform_4, window_bounds = array<i64: 1, 128>}, {transform_indices = @transform_5, window_bounds = array<i64: 64, 1>}, {transform_indices = @transform_6, window_bounds = array<i64: 1, 1, 128>}]} {
    %c0 = arith.constant 0 : index
    %0 = memref.load %arg1[%c0] : memref<1xi32, #tpu.memory_space<smem>>
    %c64_i32 = arith.constant 64 : i32
    %1 = arith.muli %arg0, %c64_i32 : i32
    %2 = tpu.assume_multiple %1, 64 : i32
    %3 = arith.index_cast %2 : i32 to index
    %c0_0 = arith.constant 0 : index
    %4 = vector.load %arg2[%3, %c0_0] : memref<128x128xf32, #tpu.memory_space<vmem>>, vector<64x128xf32>
    %c0_1 = arith.constant 0 : index
    %c0_2 = arith.constant 0 : index
    %5 = vector.load %arg2[%c0_1, %c0_2] : memref<128x128xf32, #tpu.memory_space<vmem>>, vector<128x128xf32>
    %cst = arith.constant dense<0.000000e+00> : vector<64x128xf32>
    %6 = tpu.matmul %4, %5, %cst {dimension_numbers = #tpu.dot_dimension_numbers<[1], [1], [0], [0], [0, 0, 1, 0], [], []>} : vector<64x128xf32>, vector<128x128xf32>, vector<64x128xf32> -> vector<64x128xf32>
    %c0_3 = arith.constant 0 : index
    %c0_4 = arith.constant 0 : index
    %7 = vector.load %arg4[%c0_3, %c0_4] : memref<64x1xf32, #tpu.memory_space<vmem>>, vector<64x1xf32>
    %c0_5 = arith.constant 0 : index
    %c0_6 = arith.constant 0 : index
    %8 = vector.load %arg3[%c0_5, %c0_6] : memref<1x128xf32, #tpu.memory_space<vmem>>, vector<1x128xf32>
    %9 = vector.broadcast %7 : vector<64x1xf32> to vector<64x128xf32>
    %10 = vector.broadcast %8 : vector<1x128xf32> to vector<64x128xf32>
    %11 = arith.addf %9, %10 : vector<64x128xf32>
    %cst_7 = arith.constant 2.000000e+00 : f32
    %12 = vector.broadcast %cst_7 : f32 to vector<64x128xf32>
    %13 = arith.mulf %12, %6 : vector<64x128xf32>
    %14 = arith.subf %11, %13 : vector<64x128xf32>
    %cst_8 = arith.constant 9.99999996E-13 : f32
    %15 = vector.broadcast %cst_8 : f32 to vector<64x128xf32>
    %16 = arith.maximumf %14, %15 : vector<64x128xf32>
    %17 = tpu.iota {dimensions = array<i32: 1>} : vector<64x128xi32>
    %18 = arith.sitofp %17 : vector<64x128xi32> to vector<64x128xf32>
    %19 = vector.broadcast %0 : i32 to vector<64x128xi32>
    %20 = arith.cmpi sge, %17, %19 : vector<64x128xi32>
    %cst_9 = arith.constant 1.000000e+30 : f32
    %21 = vector.broadcast %cst_9 : f32 to vector<64x128xf32>
    %22 = arith.select %20, %21, %16 : vector<64x128xi1>, vector<64x128xf32>
    %cst_10 = arith.constant dense<0x7F800000> : vector<64xf32>
    %23 = vector.multi_reduction <minimumf>, %22, %cst_10 [1] : vector<64x128xf32> to vector<64xf32>
    %24 = vector.shape_cast %23 : vector<64xf32> to vector<64x1xf32>
    %25 = vector.broadcast %24 : vector<64x1xf32> to vector<64x128xf32>
    %26 = arith.cmpf oeq, %22, %25 : vector<64x128xf32>
    %cst_11 = arith.constant 1.280000e+02 : f32
    %27 = vector.broadcast %cst_11 : f32 to vector<64x128xf32>
    %28 = arith.select %26, %18, %27 : vector<64x128xi1>, vector<64x128xf32>
    %cst_12 = arith.constant dense<0x7F800000> : vector<64xf32>
    %29 = vector.multi_reduction <minimumf>, %28, %cst_12 [1] : vector<64x128xf32> to vector<64xf32>
    %30 = vector.shape_cast %29 : vector<64xf32> to vector<64x1xf32>
    %31 = vector.broadcast %30 : vector<64x1xf32> to vector<64x128xf32>
    %32 = arith.cmpf oeq, %18, %31 : vector<64x128xf32>
    %cst_13 = arith.constant 1.000000e+30 : f32
    %33 = vector.broadcast %cst_13 : f32 to vector<64x128xf32>
    %34 = arith.select %32, %33, %22 : vector<64x128xi1>, vector<64x128xf32>
    %cst_14 = arith.constant dense<0x7F800000> : vector<64xf32>
    %35 = vector.multi_reduction <minimumf>, %34, %cst_14 [1] : vector<64x128xf32> to vector<64xf32>
    %36 = vector.shape_cast %35 : vector<64xf32> to vector<64x1xf32>
    %37 = vector.broadcast %36 : vector<64x1xf32> to vector<64x128xf32>
    %38 = arith.cmpf oeq, %34, %37 : vector<64x128xf32>
    %cst_15 = arith.constant 1.280000e+02 : f32
    %39 = vector.broadcast %cst_15 : f32 to vector<64x128xf32>
    %40 = arith.select %38, %18, %39 : vector<64x128xi1>, vector<64x128xf32>
    %cst_16 = arith.constant dense<0x7F800000> : vector<64xf32>
    %41 = vector.multi_reduction <minimumf>, %40, %cst_16 [1] : vector<64x128xf32> to vector<64xf32>
    %42 = vector.shape_cast %41 : vector<64xf32> to vector<64x1xf32>
    %43 = vector.broadcast %42 : vector<64x1xf32> to vector<64x128xf32>
    %44 = arith.cmpf oeq, %18, %43 : vector<64x128xf32>
    %cst_17 = arith.constant 1.000000e+30 : f32
    %45 = vector.broadcast %cst_17 : f32 to vector<64x128xf32>
    %46 = arith.select %44, %45, %34 : vector<64x128xi1>, vector<64x128xf32>
    %cst_18 = arith.constant dense<0x7F800000> : vector<64xf32>
    %47 = vector.multi_reduction <minimumf>, %46, %cst_18 [1] : vector<64x128xf32> to vector<64xf32>
    %48 = vector.shape_cast %47 : vector<64xf32> to vector<64x1xf32>
    %49 = vector.broadcast %48 : vector<64x1xf32> to vector<64x128xf32>
    %50 = arith.cmpf oeq, %46, %49 : vector<64x128xf32>
    %cst_19 = arith.constant 1.280000e+02 : f32
    %51 = vector.broadcast %cst_19 : f32 to vector<64x128xf32>
    %52 = arith.select %50, %18, %51 : vector<64x128xi1>, vector<64x128xf32>
    %cst_20 = arith.constant dense<0x7F800000> : vector<64xf32>
    %53 = vector.multi_reduction <minimumf>, %52, %cst_20 [1] : vector<64x128xf32> to vector<64xf32>
    %54 = vector.shape_cast %53 : vector<64xf32> to vector<64x1xf32>
    %55 = vector.broadcast %54 : vector<64x1xf32> to vector<64x128xf32>
    %56 = arith.cmpf oeq, %18, %55 : vector<64x128xf32>
    %cst_21 = arith.constant 1.000000e+30 : f32
    %57 = vector.broadcast %cst_21 : f32 to vector<64x128xf32>
    %58 = arith.select %56, %57, %46 : vector<64x128xi1>, vector<64x128xf32>
    %cst_22 = arith.constant dense<0x7F800000> : vector<64xf32>
    %59 = vector.multi_reduction <minimumf>, %58, %cst_22 [1] : vector<64x128xf32> to vector<64xf32>
    %60 = vector.shape_cast %59 : vector<64xf32> to vector<64x1xf32>
    %61 = vector.broadcast %60 : vector<64x1xf32> to vector<64x128xf32>
    %62 = arith.cmpf oeq, %58, %61 : vector<64x128xf32>
    %cst_23 = arith.constant 1.280000e+02 : f32
    %63 = vector.broadcast %cst_23 : f32 to vector<64x128xf32>
    %64 = arith.select %62, %18, %63 : vector<64x128xi1>, vector<64x128xf32>
    %cst_24 = arith.constant dense<0x7F800000> : vector<64xf32>
    %65 = vector.multi_reduction <minimumf>, %64, %cst_24 [1] : vector<64x128xf32> to vector<64xf32>
    %66 = vector.shape_cast %65 : vector<64xf32> to vector<64x1xf32>
    %67 = vector.broadcast %66 : vector<64x1xf32> to vector<64x128xf32>
    %68 = arith.cmpf oeq, %18, %67 : vector<64x128xf32>
    %cst_25 = arith.constant 1.000000e+30 : f32
    %69 = vector.broadcast %cst_25 : f32 to vector<64x128xf32>
    %70 = arith.select %68, %69, %58 : vector<64x128xi1>, vector<64x128xf32>
    %cst_26 = arith.constant dense<0x7F800000> : vector<64xf32>
    %71 = vector.multi_reduction <minimumf>, %70, %cst_26 [1] : vector<64x128xf32> to vector<64xf32>
    %72 = vector.shape_cast %71 : vector<64xf32> to vector<64x1xf32>
    %73 = vector.broadcast %72 : vector<64x1xf32> to vector<64x128xf32>
    %74 = arith.cmpf oeq, %70, %73 : vector<64x128xf32>
    %cst_27 = arith.constant 1.280000e+02 : f32
    %75 = vector.broadcast %cst_27 : f32 to vector<64x128xf32>
    %76 = arith.select %74, %18, %75 : vector<64x128xi1>, vector<64x128xf32>
    %cst_28 = arith.constant dense<0x7F800000> : vector<64xf32>
    %77 = vector.multi_reduction <minimumf>, %76, %cst_28 [1] : vector<64x128xf32> to vector<64xf32>
    %78 = vector.shape_cast %77 : vector<64xf32> to vector<64x1xf32>
    %79 = vector.broadcast %78 : vector<64x1xf32> to vector<64x128xf32>
    %80 = arith.cmpf oeq, %18, %79 : vector<64x128xf32>
    %cst_29 = arith.constant 1.000000e+30 : f32
    %81 = vector.broadcast %cst_29 : f32 to vector<64x128xf32>
    %82 = arith.select %80, %81, %70 : vector<64x128xi1>, vector<64x128xf32>
    %cst_30 = arith.constant dense<0x7F800000> : vector<64xf32>
    %83 = vector.multi_reduction <minimumf>, %82, %cst_30 [1] : vector<64x128xf32> to vector<64xf32>
    %84 = vector.shape_cast %83 : vector<64xf32> to vector<64x1xf32>
    %85 = vector.broadcast %84 : vector<64x1xf32> to vector<64x128xf32>
    %86 = arith.cmpf oeq, %82, %85 : vector<64x128xf32>
    %cst_31 = arith.constant 1.280000e+02 : f32
    %87 = vector.broadcast %cst_31 : f32 to vector<64x128xf32>
    %88 = arith.select %86, %18, %87 : vector<64x128xi1>, vector<64x128xf32>
    %cst_32 = arith.constant dense<0x7F800000> : vector<64xf32>
    %89 = vector.multi_reduction <minimumf>, %88, %cst_32 [1] : vector<64x128xf32> to vector<64xf32>
    %90 = vector.shape_cast %89 : vector<64xf32> to vector<64x1xf32>
    %91 = vector.broadcast %90 : vector<64x1xf32> to vector<64x128xf32>
    %92 = arith.cmpf oeq, %18, %91 : vector<64x128xf32>
    %cst_33 = arith.constant 1.000000e+30 : f32
    %93 = vector.broadcast %cst_33 : f32 to vector<64x128xf32>
    %94 = arith.select %92, %93, %82 : vector<64x128xi1>, vector<64x128xf32>
    %cst_34 = arith.constant dense<0x7F800000> : vector<64xf32>
    %95 = vector.multi_reduction <minimumf>, %94, %cst_34 [1] : vector<64x128xf32> to vector<64xf32>
    %96 = vector.shape_cast %95 : vector<64xf32> to vector<64x1xf32>
    %97 = vector.broadcast %96 : vector<64x1xf32> to vector<64x128xf32>
    %98 = arith.cmpf oeq, %94, %97 : vector<64x128xf32>
    %cst_35 = arith.constant 1.280000e+02 : f32
    %99 = vector.broadcast %cst_35 : f32 to vector<64x128xf32>
    %100 = arith.select %98, %18, %99 : vector<64x128xi1>, vector<64x128xf32>
    %cst_36 = arith.constant dense<0x7F800000> : vector<64xf32>
    %101 = vector.multi_reduction <minimumf>, %100, %cst_36 [1] : vector<64x128xf32> to vector<64xf32>
    %102 = vector.shape_cast %101 : vector<64xf32> to vector<64x1xf32>
    %103 = vector.broadcast %102 : vector<64x1xf32> to vector<64x128xf32>
    %104 = arith.cmpf oeq, %18, %103 : vector<64x128xf32>
    %cst_37 = arith.constant 1.000000e+30 : f32
    %105 = vector.broadcast %cst_37 : f32 to vector<64x128xf32>
    %106 = arith.select %104, %105, %94 : vector<64x128xi1>, vector<64x128xf32>
    %cst_38 = arith.constant dense<0x7F800000> : vector<64xf32>
    %107 = vector.multi_reduction <minimumf>, %106, %cst_38 [1] : vector<64x128xf32> to vector<64xf32>
    %108 = vector.shape_cast %107 : vector<64xf32> to vector<64x1xf32>
    %109 = vector.broadcast %108 : vector<64x1xf32> to vector<64x128xf32>
    %110 = arith.cmpf oeq, %106, %109 : vector<64x128xf32>
    %cst_39 = arith.constant 1.280000e+02 : f32
    %111 = vector.broadcast %cst_39 : f32 to vector<64x128xf32>
    %112 = arith.select %110, %18, %111 : vector<64x128xi1>, vector<64x128xf32>
    %cst_40 = arith.constant dense<0x7F800000> : vector<64xf32>
    %113 = vector.multi_reduction <minimumf>, %112, %cst_40 [1] : vector<64x128xf32> to vector<64xf32>
    %114 = vector.shape_cast %113 : vector<64xf32> to vector<64x1xf32>
    %115 = vector.broadcast %114 : vector<64x1xf32> to vector<64x128xf32>
    %116 = arith.cmpf oeq, %18, %115 : vector<64x128xf32>
    %cst_41 = arith.constant 1.000000e+30 : f32
    %117 = vector.broadcast %cst_41 : f32 to vector<64x128xf32>
    %118 = arith.select %116, %117, %106 : vector<64x128xi1>, vector<64x128xf32>
    %cst_42 = arith.constant dense<0x7F800000> : vector<64xf32>
    %119 = vector.multi_reduction <minimumf>, %118, %cst_42 [1] : vector<64x128xf32> to vector<64xf32>
    %120 = vector.shape_cast %119 : vector<64xf32> to vector<64x1xf32>
    %121 = vector.broadcast %120 : vector<64x1xf32> to vector<64x128xf32>
    %122 = arith.cmpf oeq, %118, %121 : vector<64x128xf32>
    %cst_43 = arith.constant 1.280000e+02 : f32
    %123 = vector.broadcast %cst_43 : f32 to vector<64x128xf32>
    %124 = arith.select %122, %18, %123 : vector<64x128xi1>, vector<64x128xf32>
    %cst_44 = arith.constant dense<0x7F800000> : vector<64xf32>
    %125 = vector.multi_reduction <minimumf>, %124, %cst_44 [1] : vector<64x128xf32> to vector<64xf32>
    %126 = vector.shape_cast %125 : vector<64xf32> to vector<64x1xf32>
    %127 = vector.broadcast %126 : vector<64x1xf32> to vector<64x128xf32>
    %128 = arith.cmpf oeq, %18, %127 : vector<64x128xf32>
    %cst_45 = arith.constant 1.000000e+30 : f32
    %129 = vector.broadcast %cst_45 : f32 to vector<64x128xf32>
    %130 = arith.select %128, %129, %118 : vector<64x128xi1>, vector<64x128xf32>
    %cst_46 = arith.constant dense<0x7F800000> : vector<64xf32>
    %131 = vector.multi_reduction <minimumf>, %130, %cst_46 [1] : vector<64x128xf32> to vector<64xf32>
    %132 = vector.shape_cast %131 : vector<64xf32> to vector<64x1xf32>
    %133 = vector.broadcast %132 : vector<64x1xf32> to vector<64x128xf32>
    %134 = arith.cmpf oeq, %130, %133 : vector<64x128xf32>
    %cst_47 = arith.constant 1.280000e+02 : f32
    %135 = vector.broadcast %cst_47 : f32 to vector<64x128xf32>
    %136 = arith.select %134, %18, %135 : vector<64x128xi1>, vector<64x128xf32>
    %cst_48 = arith.constant dense<0x7F800000> : vector<64xf32>
    %137 = vector.multi_reduction <minimumf>, %136, %cst_48 [1] : vector<64x128xf32> to vector<64xf32>
    %138 = vector.shape_cast %137 : vector<64xf32> to vector<64x1xf32>
    %139 = vector.broadcast %138 : vector<64x1xf32> to vector<64x128xf32>
    %140 = arith.cmpf oeq, %18, %139 : vector<64x128xf32>
    %cst_49 = arith.constant 1.000000e+30 : f32
    %141 = vector.broadcast %cst_49 : f32 to vector<64x128xf32>
    %142 = arith.select %140, %141, %130 : vector<64x128xi1>, vector<64x128xf32>
    %cst_50 = arith.constant dense<0x7F800000> : vector<64xf32>
    %143 = vector.multi_reduction <minimumf>, %142, %cst_50 [1] : vector<64x128xf32> to vector<64xf32>
    %144 = vector.shape_cast %143 : vector<64xf32> to vector<64x1xf32>
    %145 = vector.broadcast %144 : vector<64x1xf32> to vector<64x128xf32>
    %146 = arith.cmpf oeq, %142, %145 : vector<64x128xf32>
    %cst_51 = arith.constant 1.280000e+02 : f32
    %147 = vector.broadcast %cst_51 : f32 to vector<64x128xf32>
    %148 = arith.select %146, %18, %147 : vector<64x128xi1>, vector<64x128xf32>
    %cst_52 = arith.constant dense<0x7F800000> : vector<64xf32>
    %149 = vector.multi_reduction <minimumf>, %148, %cst_52 [1] : vector<64x128xf32> to vector<64xf32>
    %150 = vector.shape_cast %149 : vector<64xf32> to vector<64x1xf32>
    %151 = vector.broadcast %150 : vector<64x1xf32> to vector<64x128xf32>
    %152 = arith.cmpf oeq, %18, %151 : vector<64x128xf32>
    %cst_53 = arith.constant 1.000000e+30 : f32
    %153 = vector.broadcast %cst_53 : f32 to vector<64x128xf32>
    %154 = arith.select %152, %153, %142 : vector<64x128xi1>, vector<64x128xf32>
    %cst_54 = arith.constant dense<0x7F800000> : vector<64xf32>
    %155 = vector.multi_reduction <minimumf>, %154, %cst_54 [1] : vector<64x128xf32> to vector<64xf32>
    %156 = vector.shape_cast %155 : vector<64xf32> to vector<64x1xf32>
    %157 = vector.broadcast %156 : vector<64x1xf32> to vector<64x128xf32>
    %158 = arith.cmpf oeq, %154, %157 : vector<64x128xf32>
    %cst_55 = arith.constant 1.280000e+02 : f32
    %159 = vector.broadcast %cst_55 : f32 to vector<64x128xf32>
    %160 = arith.select %158, %18, %159 : vector<64x128xi1>, vector<64x128xf32>
    %cst_56 = arith.constant dense<0x7F800000> : vector<64xf32>
    %161 = vector.multi_reduction <minimumf>, %160, %cst_56 [1] : vector<64x128xf32> to vector<64xf32>
    %162 = vector.shape_cast %161 : vector<64xf32> to vector<64x1xf32>
    %163 = vector.broadcast %162 : vector<64x1xf32> to vector<64x128xf32>
    %164 = arith.cmpf oeq, %18, %163 : vector<64x128xf32>
    %cst_57 = arith.constant 1.000000e+30 : f32
    %165 = vector.broadcast %cst_57 : f32 to vector<64x128xf32>
    %166 = arith.select %164, %165, %154 : vector<64x128xi1>, vector<64x128xf32>
    %cst_58 = arith.constant dense<0x7F800000> : vector<64xf32>
    %167 = vector.multi_reduction <minimumf>, %166, %cst_58 [1] : vector<64x128xf32> to vector<64xf32>
    %168 = vector.shape_cast %167 : vector<64xf32> to vector<64x1xf32>
    %169 = vector.broadcast %168 : vector<64x1xf32> to vector<64x128xf32>
    %170 = arith.cmpf oeq, %166, %169 : vector<64x128xf32>
    %cst_59 = arith.constant 1.280000e+02 : f32
    %171 = vector.broadcast %cst_59 : f32 to vector<64x128xf32>
    %172 = arith.select %170, %18, %171 : vector<64x128xi1>, vector<64x128xf32>
    %cst_60 = arith.constant dense<0x7F800000> : vector<64xf32>
    %173 = vector.multi_reduction <minimumf>, %172, %cst_60 [1] : vector<64x128xf32> to vector<64xf32>
    %174 = vector.shape_cast %173 : vector<64xf32> to vector<64x1xf32>
    %175 = vector.broadcast %174 : vector<64x1xf32> to vector<64x128xf32>
    %176 = arith.cmpf oeq, %18, %175 : vector<64x128xf32>
    %cst_61 = arith.constant 1.000000e+30 : f32
    %177 = vector.broadcast %cst_61 : f32 to vector<64x128xf32>
    %178 = arith.select %176, %177, %166 : vector<64x128xi1>, vector<64x128xf32>
    %cst_62 = arith.constant dense<0x7F800000> : vector<64xf32>
    %179 = vector.multi_reduction <minimumf>, %178, %cst_62 [1] : vector<64x128xf32> to vector<64xf32>
    %180 = vector.shape_cast %179 : vector<64xf32> to vector<64x1xf32>
    %181 = vector.broadcast %180 : vector<64x1xf32> to vector<64x128xf32>
    %182 = arith.cmpf oeq, %178, %181 : vector<64x128xf32>
    %cst_63 = arith.constant 1.280000e+02 : f32
    %183 = vector.broadcast %cst_63 : f32 to vector<64x128xf32>
    %184 = arith.select %182, %18, %183 : vector<64x128xi1>, vector<64x128xf32>
    %cst_64 = arith.constant dense<0x7F800000> : vector<64xf32>
    %185 = vector.multi_reduction <minimumf>, %184, %cst_64 [1] : vector<64x128xf32> to vector<64xf32>
    %186 = vector.shape_cast %185 : vector<64xf32> to vector<64x1xf32>
    %187 = vector.broadcast %186 : vector<64x1xf32> to vector<64x128xf32>
    %188 = arith.cmpf oeq, %18, %187 : vector<64x128xf32>
    %cst_65 = arith.constant 1.000000e+30 : f32
    %189 = vector.broadcast %cst_65 : f32 to vector<64x128xf32>
    %190 = arith.select %188, %189, %178 : vector<64x128xi1>, vector<64x128xf32>
    %cst_66 = arith.constant dense<0x7F800000> : vector<64xf32>
    %191 = vector.multi_reduction <minimumf>, %190, %cst_66 [1] : vector<64x128xf32> to vector<64xf32>
    %192 = vector.shape_cast %191 : vector<64xf32> to vector<64x1xf32>
    %193 = vector.broadcast %192 : vector<64x1xf32> to vector<64x128xf32>
    %194 = arith.cmpf oeq, %190, %193 : vector<64x128xf32>
    %cst_67 = arith.constant 1.280000e+02 : f32
    %195 = vector.broadcast %cst_67 : f32 to vector<64x128xf32>
    %196 = arith.select %194, %18, %195 : vector<64x128xi1>, vector<64x128xf32>
    %cst_68 = arith.constant dense<0x7F800000> : vector<64xf32>
    %197 = vector.multi_reduction <minimumf>, %196, %cst_68 [1] : vector<64x128xf32> to vector<64xf32>
    %198 = vector.shape_cast %197 : vector<64xf32> to vector<64x1xf32>
    %199 = vector.broadcast %198 : vector<64x1xf32> to vector<64x128xf32>
    %200 = arith.cmpf oeq, %18, %199 : vector<64x128xf32>
    %cst_69 = arith.constant 1.000000e+30 : f32
    %201 = vector.broadcast %cst_69 : f32 to vector<64x128xf32>
    %202 = arith.select %200, %201, %190 : vector<64x128xi1>, vector<64x128xf32>
    %cst_70 = arith.constant dense<0x7F800000> : vector<64xf32>
    %203 = vector.multi_reduction <minimumf>, %202, %cst_70 [1] : vector<64x128xf32> to vector<64xf32>
    %204 = vector.shape_cast %203 : vector<64xf32> to vector<64x1xf32>
    %205 = vector.broadcast %204 : vector<64x1xf32> to vector<64x128xf32>
    %206 = arith.cmpf oeq, %202, %205 : vector<64x128xf32>
    %cst_71 = arith.constant 1.280000e+02 : f32
    %207 = vector.broadcast %cst_71 : f32 to vector<64x128xf32>
    %208 = arith.select %206, %18, %207 : vector<64x128xi1>, vector<64x128xf32>
    %cst_72 = arith.constant dense<0x7F800000> : vector<64xf32>
    %209 = vector.multi_reduction <minimumf>, %208, %cst_72 [1] : vector<64x128xf32> to vector<64xf32>
    %210 = vector.shape_cast %209 : vector<64xf32> to vector<64x1xf32>
    %211 = vector.broadcast %210 : vector<64x1xf32> to vector<64x128xf32>
    %212 = arith.cmpf oeq, %18, %211 : vector<64x128xf32>
    %cst_73 = arith.constant 1.000000e+30 : f32
    %213 = vector.broadcast %cst_73 : f32 to vector<64x128xf32>
    %214 = arith.select %212, %213, %202 : vector<64x128xi1>, vector<64x128xf32>
    %cst_74 = arith.constant dense<0x7F800000> : vector<64xf32>
    %215 = vector.multi_reduction <minimumf>, %214, %cst_74 [1] : vector<64x128xf32> to vector<64xf32>
    %216 = vector.shape_cast %215 : vector<64xf32> to vector<64x1xf32>
    %217 = vector.broadcast %216 : vector<64x1xf32> to vector<64x128xf32>
    %218 = arith.cmpf oeq, %214, %217 : vector<64x128xf32>
    %cst_75 = arith.constant 1.280000e+02 : f32
    %219 = vector.broadcast %cst_75 : f32 to vector<64x128xf32>
    %220 = arith.select %218, %18, %219 : vector<64x128xi1>, vector<64x128xf32>
    %cst_76 = arith.constant dense<0x7F800000> : vector<64xf32>
    %221 = vector.multi_reduction <minimumf>, %220, %cst_76 [1] : vector<64x128xf32> to vector<64xf32>
    %222 = vector.shape_cast %221 : vector<64xf32> to vector<64x1xf32>
    %223 = vector.broadcast %222 : vector<64x1xf32> to vector<64x128xf32>
    %224 = arith.cmpf oeq, %18, %223 : vector<64x128xf32>
    %cst_77 = arith.constant 1.000000e+30 : f32
    %225 = vector.broadcast %cst_77 : f32 to vector<64x128xf32>
    %226 = arith.select %224, %225, %214 : vector<64x128xi1>, vector<64x128xf32>
    %cst_78 = arith.constant dense<0x7F800000> : vector<64xf32>
    %227 = vector.multi_reduction <minimumf>, %226, %cst_78 [1] : vector<64x128xf32> to vector<64xf32>
    %228 = vector.shape_cast %227 : vector<64xf32> to vector<64x1xf32>
    %229 = vector.broadcast %228 : vector<64x1xf32> to vector<64x128xf32>
    %230 = arith.cmpf oeq, %226, %229 : vector<64x128xf32>
    %cst_79 = arith.constant 1.280000e+02 : f32
    %231 = vector.broadcast %cst_79 : f32 to vector<64x128xf32>
    %232 = arith.select %230, %18, %231 : vector<64x128xi1>, vector<64x128xf32>
    %cst_80 = arith.constant dense<0x7F800000> : vector<64xf32>
    %233 = vector.multi_reduction <minimumf>, %232, %cst_80 [1] : vector<64x128xf32> to vector<64xf32>
    %234 = vector.shape_cast %233 : vector<64xf32> to vector<64x1xf32>
    %235 = vector.broadcast %234 : vector<64x1xf32> to vector<64x128xf32>
    %236 = arith.cmpf oeq, %18, %235 : vector<64x128xf32>
    %cst_81 = arith.constant 1.000000e+30 : f32
    %237 = vector.broadcast %cst_81 : f32 to vector<64x128xf32>
    %238 = arith.select %236, %237, %226 : vector<64x128xi1>, vector<64x128xf32>
    %cst_82 = arith.constant dense<0x7F800000> : vector<64xf32>
    %239 = vector.multi_reduction <minimumf>, %238, %cst_82 [1] : vector<64x128xf32> to vector<64xf32>
    %240 = vector.shape_cast %239 : vector<64xf32> to vector<64x1xf32>
    %241 = vector.broadcast %240 : vector<64x1xf32> to vector<64x128xf32>
    %242 = arith.cmpf oeq, %238, %241 : vector<64x128xf32>
    %cst_83 = arith.constant 1.280000e+02 : f32
    %243 = vector.broadcast %cst_83 : f32 to vector<64x128xf32>
    %244 = arith.select %242, %18, %243 : vector<64x128xi1>, vector<64x128xf32>
    %cst_84 = arith.constant dense<0x7F800000> : vector<64xf32>
    %245 = vector.multi_reduction <minimumf>, %244, %cst_84 [1] : vector<64x128xf32> to vector<64xf32>
    %246 = vector.shape_cast %245 : vector<64xf32> to vector<64x1xf32>
    %247 = vector.broadcast %246 : vector<64x1xf32> to vector<64x128xf32>
    %248 = arith.cmpf oeq, %18, %247 : vector<64x128xf32>
    %cst_85 = arith.constant 1.000000e+30 : f32
    %249 = vector.broadcast %cst_85 : f32 to vector<64x128xf32>
    %250 = arith.select %248, %249, %238 : vector<64x128xi1>, vector<64x128xf32>
    %cst_86 = arith.constant dense<0x7F800000> : vector<64xf32>
    %251 = vector.multi_reduction <minimumf>, %250, %cst_86 [1] : vector<64x128xf32> to vector<64xf32>
    %252 = vector.shape_cast %251 : vector<64xf32> to vector<64x1xf32>
    %253 = vector.broadcast %252 : vector<64x1xf32> to vector<64x128xf32>
    %254 = arith.cmpf oeq, %250, %253 : vector<64x128xf32>
    %cst_87 = arith.constant 1.280000e+02 : f32
    %255 = vector.broadcast %cst_87 : f32 to vector<64x128xf32>
    %256 = arith.select %254, %18, %255 : vector<64x128xi1>, vector<64x128xf32>
    %cst_88 = arith.constant dense<0x7F800000> : vector<64xf32>
    %257 = vector.multi_reduction <minimumf>, %256, %cst_88 [1] : vector<64x128xf32> to vector<64xf32>
    %258 = vector.shape_cast %257 : vector<64xf32> to vector<64x1xf32>
    %259 = vector.broadcast %258 : vector<64x1xf32> to vector<64x128xf32>
    %260 = arith.cmpf oeq, %18, %259 : vector<64x128xf32>
    %cst_89 = arith.constant 1.000000e+30 : f32
    %261 = vector.broadcast %cst_89 : f32 to vector<64x128xf32>
    %262 = arith.select %260, %261, %250 : vector<64x128xi1>, vector<64x128xf32>
    %cst_90 = arith.constant dense<0x7F800000> : vector<64xf32>
    %263 = vector.multi_reduction <minimumf>, %262, %cst_90 [1] : vector<64x128xf32> to vector<64xf32>
    %264 = vector.shape_cast %263 : vector<64xf32> to vector<64x1xf32>
    %265 = vector.broadcast %264 : vector<64x1xf32> to vector<64x128xf32>
    %266 = arith.cmpf oeq, %262, %265 : vector<64x128xf32>
    %cst_91 = arith.constant 1.280000e+02 : f32
    %267 = vector.broadcast %cst_91 : f32 to vector<64x128xf32>
    %268 = arith.select %266, %18, %267 : vector<64x128xi1>, vector<64x128xf32>
    %cst_92 = arith.constant dense<0x7F800000> : vector<64xf32>
    %269 = vector.multi_reduction <minimumf>, %268, %cst_92 [1] : vector<64x128xf32> to vector<64xf32>
    %270 = vector.shape_cast %269 : vector<64xf32> to vector<64x1xf32>
    %271 = vector.broadcast %270 : vector<64x1xf32> to vector<64x128xf32>
    %272 = arith.cmpf oeq, %18, %271 : vector<64x128xf32>
    %cst_93 = arith.constant 1.000000e+30 : f32
    %273 = vector.broadcast %cst_93 : f32 to vector<64x128xf32>
    %274 = arith.select %272, %273, %262 : vector<64x128xi1>, vector<64x128xf32>
    %cst_94 = arith.constant dense<0x7F800000> : vector<64xf32>
    %275 = vector.multi_reduction <minimumf>, %274, %cst_94 [1] : vector<64x128xf32> to vector<64xf32>
    %276 = vector.shape_cast %275 : vector<64xf32> to vector<64x1xf32>
    %277 = vector.broadcast %276 : vector<64x1xf32> to vector<64x128xf32>
    %278 = arith.cmpf oeq, %274, %277 : vector<64x128xf32>
    %cst_95 = arith.constant 1.280000e+02 : f32
    %279 = vector.broadcast %cst_95 : f32 to vector<64x128xf32>
    %280 = arith.select %278, %18, %279 : vector<64x128xi1>, vector<64x128xf32>
    %cst_96 = arith.constant dense<0x7F800000> : vector<64xf32>
    %281 = vector.multi_reduction <minimumf>, %280, %cst_96 [1] : vector<64x128xf32> to vector<64xf32>
    %282 = vector.shape_cast %281 : vector<64xf32> to vector<64x1xf32>
    %283 = vector.broadcast %282 : vector<64x1xf32> to vector<64x128xf32>
    %284 = arith.cmpf oeq, %18, %283 : vector<64x128xf32>
    %cst_97 = arith.constant 1.000000e+30 : f32
    %285 = vector.broadcast %cst_97 : f32 to vector<64x128xf32>
    %286 = arith.select %284, %285, %274 : vector<64x128xi1>, vector<64x128xf32>
    %cst_98 = arith.constant dense<0x7F800000> : vector<64xf32>
    %287 = vector.multi_reduction <minimumf>, %286, %cst_98 [1] : vector<64x128xf32> to vector<64xf32>
    %288 = vector.shape_cast %287 : vector<64xf32> to vector<64x1xf32>
    %289 = vector.broadcast %288 : vector<64x1xf32> to vector<64x128xf32>
    %290 = arith.cmpf oeq, %286, %289 : vector<64x128xf32>
    %cst_99 = arith.constant 1.280000e+02 : f32
    %291 = vector.broadcast %cst_99 : f32 to vector<64x128xf32>
    %292 = arith.select %290, %18, %291 : vector<64x128xi1>, vector<64x128xf32>
    %cst_100 = arith.constant dense<0x7F800000> : vector<64xf32>
    %293 = vector.multi_reduction <minimumf>, %292, %cst_100 [1] : vector<64x128xf32> to vector<64xf32>
    %294 = vector.shape_cast %293 : vector<64xf32> to vector<64x1xf32>
    %295 = vector.broadcast %294 : vector<64x1xf32> to vector<64x128xf32>
    %296 = arith.cmpf oeq, %18, %295 : vector<64x128xf32>
    %cst_101 = arith.constant 1.000000e+30 : f32
    %297 = vector.broadcast %cst_101 : f32 to vector<64x128xf32>
    %298 = arith.select %296, %297, %286 : vector<64x128xi1>, vector<64x128xf32>
    %cst_102 = arith.constant dense<0x7F800000> : vector<64xf32>
    %299 = vector.multi_reduction <minimumf>, %298, %cst_102 [1] : vector<64x128xf32> to vector<64xf32>
    %300 = vector.shape_cast %299 : vector<64xf32> to vector<64x1xf32>
    %301 = vector.broadcast %300 : vector<64x1xf32> to vector<64x128xf32>
    %302 = arith.cmpf oeq, %298, %301 : vector<64x128xf32>
    %cst_103 = arith.constant 1.280000e+02 : f32
    %303 = vector.broadcast %cst_103 : f32 to vector<64x128xf32>
    %304 = arith.select %302, %18, %303 : vector<64x128xi1>, vector<64x128xf32>
    %cst_104 = arith.constant dense<0x7F800000> : vector<64xf32>
    %305 = vector.multi_reduction <minimumf>, %304, %cst_104 [1] : vector<64x128xf32> to vector<64xf32>
    %306 = vector.shape_cast %305 : vector<64xf32> to vector<64x1xf32>
    %307 = vector.broadcast %306 : vector<64x1xf32> to vector<64x128xf32>
    %308 = arith.cmpf oeq, %18, %307 : vector<64x128xf32>
    %cst_105 = arith.constant 1.000000e+30 : f32
    %309 = vector.broadcast %cst_105 : f32 to vector<64x128xf32>
    %310 = arith.select %308, %309, %298 : vector<64x128xi1>, vector<64x128xf32>
    %cst_106 = arith.constant dense<0x7F800000> : vector<64xf32>
    %311 = vector.multi_reduction <minimumf>, %310, %cst_106 [1] : vector<64x128xf32> to vector<64xf32>
    %312 = vector.shape_cast %311 : vector<64xf32> to vector<64x1xf32>
    %313 = vector.broadcast %312 : vector<64x1xf32> to vector<64x128xf32>
    %314 = arith.cmpf oeq, %310, %313 : vector<64x128xf32>
    %cst_107 = arith.constant 1.280000e+02 : f32
    %315 = vector.broadcast %cst_107 : f32 to vector<64x128xf32>
    %316 = arith.select %314, %18, %315 : vector<64x128xi1>, vector<64x128xf32>
    %cst_108 = arith.constant dense<0x7F800000> : vector<64xf32>
    %317 = vector.multi_reduction <minimumf>, %316, %cst_108 [1] : vector<64x128xf32> to vector<64xf32>
    %318 = vector.shape_cast %317 : vector<64xf32> to vector<64x1xf32>
    %319 = vector.broadcast %318 : vector<64x1xf32> to vector<64x128xf32>
    %320 = arith.cmpf oeq, %18, %319 : vector<64x128xf32>
    %cst_109 = arith.constant 1.000000e+30 : f32
    %321 = vector.broadcast %cst_109 : f32 to vector<64x128xf32>
    %322 = arith.select %320, %321, %310 : vector<64x128xi1>, vector<64x128xf32>
    %cst_110 = arith.constant dense<0x7F800000> : vector<64xf32>
    %323 = vector.multi_reduction <minimumf>, %322, %cst_110 [1] : vector<64x128xf32> to vector<64xf32>
    %324 = vector.shape_cast %323 : vector<64xf32> to vector<64x1xf32>
    %325 = vector.broadcast %324 : vector<64x1xf32> to vector<64x128xf32>
    %326 = arith.cmpf oeq, %322, %325 : vector<64x128xf32>
    %cst_111 = arith.constant 1.280000e+02 : f32
    %327 = vector.broadcast %cst_111 : f32 to vector<64x128xf32>
    %328 = arith.select %326, %18, %327 : vector<64x128xi1>, vector<64x128xf32>
    %cst_112 = arith.constant dense<0x7F800000> : vector<64xf32>
    %329 = vector.multi_reduction <minimumf>, %328, %cst_112 [1] : vector<64x128xf32> to vector<64xf32>
    %330 = vector.shape_cast %329 : vector<64xf32> to vector<64x1xf32>
    %331 = vector.broadcast %330 : vector<64x1xf32> to vector<64x128xf32>
    %332 = arith.cmpf oeq, %18, %331 : vector<64x128xf32>
    %cst_113 = arith.constant 1.000000e+30 : f32
    %333 = vector.broadcast %cst_113 : f32 to vector<64x128xf32>
    %334 = arith.select %332, %333, %322 : vector<64x128xi1>, vector<64x128xf32>
    %cst_114 = arith.constant dense<0x7F800000> : vector<64xf32>
    %335 = vector.multi_reduction <minimumf>, %334, %cst_114 [1] : vector<64x128xf32> to vector<64xf32>
    %336 = vector.shape_cast %335 : vector<64xf32> to vector<64x1xf32>
    %337 = vector.broadcast %336 : vector<64x1xf32> to vector<64x128xf32>
    %338 = arith.cmpf oeq, %334, %337 : vector<64x128xf32>
    %cst_115 = arith.constant 1.280000e+02 : f32
    %339 = vector.broadcast %cst_115 : f32 to vector<64x128xf32>
    %340 = arith.select %338, %18, %339 : vector<64x128xi1>, vector<64x128xf32>
    %cst_116 = arith.constant dense<0x7F800000> : vector<64xf32>
    %341 = vector.multi_reduction <minimumf>, %340, %cst_116 [1] : vector<64x128xf32> to vector<64xf32>
    %342 = vector.shape_cast %341 : vector<64xf32> to vector<64x1xf32>
    %343 = vector.broadcast %342 : vector<64x1xf32> to vector<64x128xf32>
    %344 = arith.cmpf oeq, %18, %343 : vector<64x128xf32>
    %cst_117 = arith.constant 1.000000e+30 : f32
    %345 = vector.broadcast %cst_117 : f32 to vector<64x128xf32>
    %346 = arith.select %344, %345, %334 : vector<64x128xi1>, vector<64x128xf32>
    %cst_118 = arith.constant dense<0x7F800000> : vector<64xf32>
    %347 = vector.multi_reduction <minimumf>, %346, %cst_118 [1] : vector<64x128xf32> to vector<64xf32>
    %348 = vector.shape_cast %347 : vector<64xf32> to vector<64x1xf32>
    %349 = vector.broadcast %348 : vector<64x1xf32> to vector<64x128xf32>
    %350 = arith.cmpf oeq, %346, %349 : vector<64x128xf32>
    %cst_119 = arith.constant 1.280000e+02 : f32
    %351 = vector.broadcast %cst_119 : f32 to vector<64x128xf32>
    %352 = arith.select %350, %18, %351 : vector<64x128xi1>, vector<64x128xf32>
    %cst_120 = arith.constant dense<0x7F800000> : vector<64xf32>
    %353 = vector.multi_reduction <minimumf>, %352, %cst_120 [1] : vector<64x128xf32> to vector<64xf32>
    %354 = vector.shape_cast %353 : vector<64xf32> to vector<64x1xf32>
    %355 = vector.broadcast %354 : vector<64x1xf32> to vector<64x128xf32>
    %356 = arith.cmpf oeq, %18, %355 : vector<64x128xf32>
    %cst_121 = arith.constant 1.000000e+30 : f32
    %357 = vector.broadcast %cst_121 : f32 to vector<64x128xf32>
    %358 = arith.select %356, %357, %346 : vector<64x128xi1>, vector<64x128xf32>
    %cst_122 = arith.constant dense<0x7F800000> : vector<64xf32>
    %359 = vector.multi_reduction <minimumf>, %358, %cst_122 [1] : vector<64x128xf32> to vector<64xf32>
    %360 = vector.shape_cast %359 : vector<64xf32> to vector<64x1xf32>
    %361 = vector.broadcast %360 : vector<64x1xf32> to vector<64x128xf32>
    %362 = arith.cmpf oeq, %358, %361 : vector<64x128xf32>
    %cst_123 = arith.constant 1.280000e+02 : f32
    %363 = vector.broadcast %cst_123 : f32 to vector<64x128xf32>
    %364 = arith.select %362, %18, %363 : vector<64x128xi1>, vector<64x128xf32>
    %cst_124 = arith.constant dense<0x7F800000> : vector<64xf32>
    %365 = vector.multi_reduction <minimumf>, %364, %cst_124 [1] : vector<64x128xf32> to vector<64xf32>
    %366 = vector.shape_cast %365 : vector<64xf32> to vector<64x1xf32>
    %367 = vector.broadcast %366 : vector<64x1xf32> to vector<64x128xf32>
    %368 = arith.cmpf oeq, %18, %367 : vector<64x128xf32>
    %cst_125 = arith.constant 1.000000e+30 : f32
    %369 = vector.broadcast %cst_125 : f32 to vector<64x128xf32>
    %370 = arith.select %368, %369, %358 : vector<64x128xi1>, vector<64x128xf32>
    %cst_126 = arith.constant dense<0x7F800000> : vector<64xf32>
    %371 = vector.multi_reduction <minimumf>, %370, %cst_126 [1] : vector<64x128xf32> to vector<64xf32>
    %372 = vector.shape_cast %371 : vector<64xf32> to vector<64x1xf32>
    %373 = vector.broadcast %372 : vector<64x1xf32> to vector<64x128xf32>
    %374 = arith.cmpf oeq, %370, %373 : vector<64x128xf32>
    %cst_127 = arith.constant 1.280000e+02 : f32
    %375 = vector.broadcast %cst_127 : f32 to vector<64x128xf32>
    %376 = arith.select %374, %18, %375 : vector<64x128xi1>, vector<64x128xf32>
    %cst_128 = arith.constant dense<0x7F800000> : vector<64xf32>
    %377 = vector.multi_reduction <minimumf>, %376, %cst_128 [1] : vector<64x128xf32> to vector<64xf32>
    %378 = vector.shape_cast %377 : vector<64xf32> to vector<64x1xf32>
    %379 = vector.broadcast %378 : vector<64x1xf32> to vector<64x128xf32>
    %380 = arith.cmpf oeq, %18, %379 : vector<64x128xf32>
    %cst_129 = arith.constant 1.000000e+30 : f32
    %381 = vector.broadcast %cst_129 : f32 to vector<64x128xf32>
    %382 = arith.select %380, %381, %370 : vector<64x128xi1>, vector<64x128xf32>
    %cst_130 = arith.constant dense<0x7F800000> : vector<64xf32>
    %383 = vector.multi_reduction <minimumf>, %382, %cst_130 [1] : vector<64x128xf32> to vector<64xf32>
    %384 = vector.shape_cast %383 : vector<64xf32> to vector<64x1xf32>
    %385 = vector.broadcast %384 : vector<64x1xf32> to vector<64x128xf32>
    %386 = arith.cmpf oeq, %382, %385 : vector<64x128xf32>
    %cst_131 = arith.constant 1.280000e+02 : f32
    %387 = vector.broadcast %cst_131 : f32 to vector<64x128xf32>
    %388 = arith.select %386, %18, %387 : vector<64x128xi1>, vector<64x128xf32>
    %cst_132 = arith.constant dense<0x7F800000> : vector<64xf32>
    %389 = vector.multi_reduction <minimumf>, %388, %cst_132 [1] : vector<64x128xf32> to vector<64xf32>
    %390 = vector.shape_cast %389 : vector<64xf32> to vector<64x1xf32>
    %391 = math.sqrt %204 : vector<64x1xf32>
    %392 = math.sqrt %384 : vector<64x1xf32>
    %393 = arith.maximumf %391, %392 : vector<64x1xf32>
    %394 = arith.subf %391, %393 : vector<64x1xf32>
    %395 = math.exp %394 : vector<64x1xf32>
    %396 = arith.subf %392, %393 : vector<64x1xf32>
    %397 = math.exp %396 : vector<64x1xf32>
    %398 = arith.addf %395, %397 : vector<64x1xf32>
    %399 = math.log %398 : vector<64x1xf32>
    %400 = arith.addf %393, %399 : vector<64x1xf32>
    %401 = arith.subf %391, %400 : vector<64x1xf32>
    %402 = arith.subf %392, %400 : vector<64x1xf32>
    %403 = tpu.iota {dimensions = array<i32: 0>} : vector<64x1xi32>
    %404 = vector.broadcast %2 : i32 to vector<64x1xi32>
    %405 = arith.addi %404, %403 : vector<64x1xi32>
    %406 = vector.broadcast %0 : i32 to vector<64x1xi32>
    %407 = arith.cmpi slt, %405, %406 : vector<64x1xi32>
    %408 = arith.extui %407 : vector<64x1xi1> to vector<64x1xi32>
    %409 = arith.sitofp %408 : vector<64x1xi32> to vector<64x1xf32>
    %410 = arith.index_cast %2 : i32 to index
    %c0_133 = arith.constant 0 : index
    %411 = vector.load %arg5[%410, %c0_133] : memref<128x128xf32, #tpu.memory_space<vmem>>, vector<64x128xf32>
    %c0_134 = arith.constant 0 : index
    %c0_135 = arith.constant 0 : index
    %412 = vector.load %arg5[%c0_134, %c0_135] : memref<128x128xf32, #tpu.memory_space<vmem>>, vector<128x128xf32>
    %cst_136 = arith.constant dense<0.000000e+00> : vector<64x128xf32>
    %413 = tpu.matmul %411, %412, %cst_136 {dimension_numbers = #tpu.dot_dimension_numbers<[1], [1], [0], [0], [0, 0, 1, 0], [], []>} : vector<64x128xf32>, vector<128x128xf32>, vector<64x128xf32> -> vector<64x128xf32>
    %c0_137 = arith.constant 0 : index
    %c0_138 = arith.constant 0 : index
    %414 = vector.load %arg7[%c0_137, %c0_138] : memref<64x1xf32, #tpu.memory_space<vmem>>, vector<64x1xf32>
    %c0_139 = arith.constant 0 : index
    %c0_140 = arith.constant 0 : index
    %415 = vector.load %arg6[%c0_139, %c0_140] : memref<1x128xf32, #tpu.memory_space<vmem>>, vector<1x128xf32>
    %416 = vector.broadcast %414 : vector<64x1xf32> to vector<64x128xf32>
    %417 = vector.broadcast %415 : vector<1x128xf32> to vector<64x128xf32>
    %418 = arith.addf %416, %417 : vector<64x128xf32>
    %cst_141 = arith.constant 2.000000e+00 : f32
    %419 = vector.broadcast %cst_141 : f32 to vector<64x128xf32>
    %420 = arith.mulf %419, %413 : vector<64x128xf32>
    %421 = arith.subf %418, %420 : vector<64x128xf32>
    %cst_142 = arith.constant 9.99999996E-13 : f32
    %422 = vector.broadcast %cst_142 : f32 to vector<64x128xf32>
    %423 = arith.maximumf %421, %422 : vector<64x128xf32>
    %424 = vector.broadcast %210 : vector<64x1xf32> to vector<64x128xf32>
    %425 = arith.cmpf oeq, %18, %424 : vector<64x128xf32>
    %cst_143 = arith.constant 0.000000e+00 : f32
    %426 = vector.broadcast %cst_143 : f32 to vector<64x128xf32>
    %427 = arith.select %425, %423, %426 : vector<64x128xi1>, vector<64x128xf32>
    %cst_144 = arith.constant dense<0.000000e+00> : vector<64xf32>
    %428 = vector.multi_reduction <add>, %427, %cst_144 [1] : vector<64x128xf32> to vector<64xf32>
    %429 = vector.shape_cast %428 : vector<64xf32> to vector<64x1xf32>
    %430 = vector.broadcast %390 : vector<64x1xf32> to vector<64x128xf32>
    %431 = arith.cmpf oeq, %18, %430 : vector<64x128xf32>
    %cst_145 = arith.constant 0.000000e+00 : f32
    %432 = vector.broadcast %cst_145 : f32 to vector<64x128xf32>
    %433 = arith.select %431, %423, %432 : vector<64x128xi1>, vector<64x128xf32>
    %cst_146 = arith.constant dense<0.000000e+00> : vector<64xf32>
    %434 = vector.multi_reduction <add>, %433, %cst_146 [1] : vector<64x128xf32> to vector<64xf32>
    %435 = vector.shape_cast %434 : vector<64xf32> to vector<64x1xf32>
    %436 = math.sqrt %429 : vector<64x1xf32>
    %437 = math.sqrt %435 : vector<64x1xf32>
    %438 = arith.maximumf %436, %437 : vector<64x1xf32>
    %439 = arith.subf %436, %438 : vector<64x1xf32>
    %440 = math.exp %439 : vector<64x1xf32>
    %441 = arith.subf %437, %438 : vector<64x1xf32>
    %442 = math.exp %441 : vector<64x1xf32>
    %443 = arith.mulf %440, %401 : vector<64x1xf32>
    %444 = arith.mulf %442, %402 : vector<64x1xf32>
    %445 = arith.addf %443, %444 : vector<64x1xf32>
    %cst_147 = arith.constant 0.000000e+00 : f32
    %446 = vector.broadcast %cst_147 : f32 to vector<64x1xf32>
    %447 = arith.subf %446, %445 : vector<64x1xf32>
    %448 = arith.addf %440, %442 : vector<64x1xf32>
    %449 = arith.divf %447, %448 : vector<64x1xf32>
    %450 = arith.mulf %449, %409 : vector<64x1xf32>
    %451 = vector.shape_cast %450 : vector<64x1xf32> to vector<1x64x1xf32>
    %cst_148 = arith.constant dense<0.000000e+00> : vector<1xf32>
    %452 = vector.multi_reduction <add>, %451, %cst_148 [1, 2] : vector<1x64x1xf32> to vector<1xf32>
    %453 = vector.shape_cast %452 : vector<1xf32> to vector<1x1x1xf32>
    %454 = vector.extract %453[0, 0, 0] : f32 from vector<1x1x1xf32>
    %cst_149 = arith.constant 0.000000e+00 : f32
    %455 = vector.broadcast %cst_149 : f32 to vector<1x1x128xf32>
    %456 = vector.broadcast %454 : f32 to vector<1x1x128xf32>
    %457 = arith.addf %455, %456 : vector<1x1x128xf32>
    %c0_150 = arith.constant 0 : index
    %c0_151 = arith.constant 0 : index
    %c0_152 = arith.constant 0 : index
    %458 = vector.load %arg8[%c0_150, %c0_151, %c0_152] : memref<1x1x128xf32, #tpu.memory_space<vmem>>, vector<1x1x128xf32>
    tpu.vector_store %arg8[%c0_150, %c0_151, %c0_152], %457 {strides = array<i32>} : memref<1x1x128xf32, #tpu.memory_space<vmem>>, vector<1x1x128xf32>,
    return
  }
  func.func @transform_0(%arg0: i32, %arg1: memref<1xi32, #tpu.memory_space<smem>>) -> (i32, i32) {
    %c0_i32 = arith.constant 0 : i32
    %c0_i32_0 = arith.constant 0 : i32
    %c0_i32_1 = arith.constant 0 : i32
    return %c0_i32, %c0_i32_0 : i32, i32
  }
  func.func @transform_1(%arg0: i32, %arg1: memref<1xi32, #tpu.memory_space<smem>>) -> (i32, i32) {
    %c0_i32 = arith.constant 0 : i32
    %c0_i32_0 = arith.constant 0 : i32
    %c0_i32_1 = arith.constant 0 : i32
    return %c0_i32, %c0_i32_0 : i32, i32
  }
  func.func @transform_2(%arg0: i32, %arg1: memref<1xi32, #tpu.memory_space<smem>>) -> (i32, i32) {
    %c0_i32 = arith.constant 0 : i32
    %c0_i32_0 = arith.constant 0 : i32
    return %arg0, %c0_i32 : i32, i32
  }
  func.func @transform_3(%arg0: i32, %arg1: memref<1xi32, #tpu.memory_space<smem>>) -> (i32, i32) {
    %c0_i32 = arith.constant 0 : i32
    %c0_i32_0 = arith.constant 0 : i32
    %c0_i32_1 = arith.constant 0 : i32
    return %c0_i32, %c0_i32_0 : i32, i32
  }
  func.func @transform_4(%arg0: i32, %arg1: memref<1xi32, #tpu.memory_space<smem>>) -> (i32, i32) {
    %c0_i32 = arith.constant 0 : i32
    %c0_i32_0 = arith.constant 0 : i32
    %c0_i32_1 = arith.constant 0 : i32
    return %c0_i32, %c0_i32_0 : i32, i32
  }
  func.func @transform_5(%arg0: i32, %arg1: memref<1xi32, #tpu.memory_space<smem>>) -> (i32, i32) {
    %c0_i32 = arith.constant 0 : i32
    %c0_i32_0 = arith.constant 0 : i32
    return %arg0, %c0_i32 : i32, i32
  }
  func.func @transform_6(%arg0: i32, %arg1: memref<1xi32, #tpu.memory_space<smem>>) -> (i32, i32, i32) {
    %c0_i32 = arith.constant 0 : i32
    %c0_i32_0 = arith.constant 0 : i32
    %c0_i32_1 = arith.constant 0 : i32
    return %arg0, %c0_i32, %c0_i32_0 : i32, i32, i32
  }
}

</mosaic_0001>

<bundles_post_ra>
// kernel: tpu_custom_call.1
= control target key start
LH: loop header
LB: loop body
LE: loop exit
PB: predicated region body
PF: predicated region fallthrough
CT: control target
= control target key end

     0   :  { %s7110_s0 = inlined_call_operand.<no memory space> [shape: s32[1], index: 0, kind: input, shape index: {}]   ;;  %s7111_s1 = inlined_call_operand.hbm [shape: f32[128,128], index: 1, kind: input, shape index: {}]   ;;  %s7112_s2 = inlined_call_operand.hbm [shape: f32[1,128], index: 2, kind: input, shape index: {}]   ;;  %s7113_s3 = inlined_call_operand.hbm [shape: f32[128,1], index: 3, kind: input, shape index: {}]   ;;  %s7114_s4 = inlined_call_operand.hbm [shape: f32[128,128], index: 4, kind: input, shape index: {}]   ;;  %s7115_s5 = inlined_call_operand.hbm [shape: f32[1,128], index: 5, kind: input, shape index: {}]   ;;  %s7116_s6 = inlined_call_operand.hbm [shape: f32[128,1], index: 6, kind: input, shape index: {}]   ;;  %s7117_s7 = inlined_call_operand.hbm [shape: f32[2,1,128], index: 7, kind: output, shape index: {}]  }
   0x1   :  { %7137 = sst [smem:[#allocation27_spill]] %s7111_s1 }
   0x2   :  { %7138 = sst [smem:[#allocation28_spill]] %s7112_s2 }
   0x3   :  { %7139 = sst [smem:[#allocation29_spill]] %s7113_s3 }
   0x4   :  { %12 = sst [smem:[#allocation3]] %s7110_s0 }
   0x5   :  { %13 = vsyncpa [#allocation5], 0 }
   0x6   :  { %14 = vsyncpa [#allocation8], 0 }
   0x7   :  { %15 = vsyncpa [#allocation12], 0 }
   0x8   :  { %16 = vsyncpa [#allocation6], 0 }
   0x9   :  { %18 = vsyncpa [#allocation6 + $0x1], 0  ;;  %s4304_s26 = smov 0   ;;  %s4306_s27 = smov 0  }
   0xa   :  { %s4308_s28 = smov 0   ;;  %s4310_s29 = smov 0  }
   0xb LB: > { %7140 = sst [smem:[#allocation22_spill]] %s4236_s26  ;;  %s4325_s0 = sadd.s32 4294967295, %s4248_s29   ;;  %s4248_s29 = sphi %s4310_s29, %s7189_s29   ;;  %s4244_s28 = sphi %s4308_s28, %s7191_s28   ;;  %s4240_s27 = sphi %s4306_s27, %s7193_s27   ;;  %s4236_s26 = sphi %s4304_s26, %s7192_s26  }
   0xc   : > { %7141 = sst [smem:[#allocation23_spill]] %s4244_s28  ;;  %s3494_s30 = sadd.s32 4294967294, %s4248_s29  }
   0xd   : > { %p86_p0 = scmp.ne.s32.totalorder %s4240_s27, %s4236_s26  ;;  %p7118_p1 = scmp.eq.s32.totalorder %s4325_s0, 0 }
   0xe   : > { %p184_p3 = scmp.eq.s32.totalorder %s3494_s30, 1  ;;  %p3495_p5 = scmp.ge.s32.totalorder %s4248_s29, 1 }
   0xf   : > { %p4334_p4 = por %p7118_p1, %p86_p0  ;;  %p191_p7 = scmp.lt.s32.totalorder %s4248_s29, 3 }
  0x10   : > { %p4339_p6 = por %p184_p3, %p86_p0  ;;  %s4250_s11 = smov [#allocation4]  }
  0x11   : > { %s7142_s8 = scalar_select %p4334_p4, 1, 0 }
  0x12   : > { %s7143_s9 = scalar_select %p4339_p6, 1, 0 }
  0x13   : > { %p4344_p8 = pnand %p3495_p5, %p191_p7  ;;  %s203_s12 = sshll.u32 %s4250_s11, 4  ;;  %s4348_s12 = int_to_ptr.vmem [resolvable:$true] %s203_s12 }
  0x14   : > { %7144 = sst [smem:[#allocation24_spill]] %s7143_s9  ;;  %s4251_s14 = smov [#allocation7]  }
  0x15   : > { %s7145_s10 = scalar_select %p4344_p8, 1, 0 }
  0x16   : > { %p3754_p9 = pneg %p4344_p8  ;;  %s217_s15 = sshll.u32 %s4251_s14, 4  ;;  %s4359_s15 = int_to_ptr.vmem [resolvable:$true] %s217_s15 }
  0x17   : > { %s7147_s1 = sld [smem:[#allocation27_spill]] }
  0x18   : > { %p4355_p11 = pnand %p3754_p9, %p7118_p1 }
  0x1a   : > { %s7146_s13 = scalar_select %p4355_p11, 1, 0 }
  0x1b   : > { %p4369_p13 = pneg %p4355_p11 }
  0x1d   : > { %s3990_s18 = scalar_lea.hbm %s7147_s1, 2048 }
  0x1e   : > { %p3991_p12 = scmp.ne.s32.totalorder %s7147_s1, %s3990_s18  ;;  %p3997_p5 = scmp.lt.u32.totalorder %s3990_s18, %s7147_s1 }
  0x20   : > { %p3993_p0 = pnand %p4369_p13, %p3991_p12 }
  0x22   : > { %p3994_p3 = pneg %p3993_p0 }
  0x24   : > { %p3999_p7 = pnand %p3997_p5, %p3994_p3 }
  0x26   : > { %4002 = shalt.err (!%p3999_p7)
}
  0x27   : > { %s4003_s24 = scalar_lea.vmem %s4348_s12, 2048  ;;  %p4011_p2 = scmp.lt.s32.totalorder %s4348_s12, %s4348_s12 }
  0x28   : > { %p4004_p9 = scmp.ne.s32.totalorder %s4348_s12, %s4003_s24  ;;  %p4012_p6 = scmp.lt.s32.totalorder %s4003_s24, %s4003_s24 }
  0x2a   : > { %p4006_p10 = pnand %p4004_p9, %p4369_p13  ;;  %p4013_p12 = por %p4012_p6, %p4011_p2 }
  0x2c   : > { %p4007_p1 = pneg %p4006_p10 }
  0x2e   : > { %p4014_p0 = pnand %p4013_p12, %p4007_p1 }
  0x30   : > { %4017 = shalt.err (!%p4014_p0)
}
  0x31   : > { %s7119_s25 = smov 128   ;;  %s7121_s30 = smov 8  }
  0x32   : > { %3757 = dma.hbm_to_vmem [thread:$0]  (!%p4355_p11), %s7147_s1, 2048, %s4348_s12, [#allocation5], %s7119_s25, %s7119_s25, %s7121_s30  }
  0x33   : > { %s7149_s2 = sld [smem:[#allocation28_spill]] }
  0x39   : > { %s4018_s18 = scalar_lea.hbm %s7149_s2, 16 }
  0x3a   : > { %p4019_p1 = scmp.ne.s32.totalorder %s7149_s2, %s4018_s18  ;;  %p4025_p10 = scmp.lt.u32.totalorder %s4018_s18, %s7149_s2 }
  0x3c   : > { %p4021_p2 = pnand %p4019_p1, %p4369_p13 }
  0x3e   : > { %p4022_p6 = pneg %p4021_p2 }
  0x40   : > { %p4027_p3 = pnand %p4025_p10, %p4022_p6 }
  0x42   : > { %4030 = shalt.err (!%p4027_p3)
}
  0x43   : > { %s4031_s12 = scalar_lea.vmem %s4359_s15, 16  ;;  %s4038_s24 = scalar_lea.vmem %s4359_s15, 32 }
  0x44   : > { %p4032_p5 = scmp.ne.s32.totalorder %s4359_s15, %s4031_s12  ;;  %p4039_p12 = scmp.lt.s32.totalorder %s4359_s15, %s4359_s15 }
  0x45   : > { %p4040_p0 = scmp.lt.s32.totalorder %s4038_s24, %s4031_s12 }
  0x46   : > { %p4034_p7 = pnand %p4032_p5, %p4369_p13 }
  0x47   : > { %p4041_p1 = por %p4040_p0, %p4039_p12 }
  0x48   : > { %p4035_p9 = pneg %p4034_p7 }
  0x4a   : > { %p4042_p2 = pnand %p4041_p1, %p4035_p9 }
  0x4c   : > { %4045 = shalt.err (!%p4042_p2)
}
  0x4d   : > { %3760 = dma.hbm_to_vmem [thread:$0]  (!%p4355_p11), %s7149_s2, 16, %s4359_s15, [#allocation8]  }
  0x4e   : > { %s4418_s16 = sadd.s32 1, %s4248_s29   ;;  %s73_s17 = sadd.s32 1, %s4244_s28 }
  0x4f   : > { %7150 = sst [smem:[#allocation25_spill]] %s4418_s16  ;;  %s70_s18 = ssub.s32 %s4248_s29, %s4418_s16 }
  0x50   : > { %p80_p6 = scmp.ne.s32.totalorder %s4244_s28, %s4240_s27  ;;  %p71_p10 = scmp.eq.s32.totalorder %s70_s18, 0 }
  0x51   : > { %p81_p3 = scmp.eq.s32.totalorder %s4248_s29, 0  ;;  %p7151_p5 = scmp.eq.s32.totalorder %s4325_s0, 1 }
  0x52   : > { %p3782_p9 = scmp.lt.s32.totalorder %s4248_s29, 2  ;;  %s252_s22 = sand.u32 1, %s4248_s29  }
  0x53   : > { %p4428_p7 = por %p7151_p5, %p80_p6  ;;  %p82_p12 = por %p81_p3, %p80_p6 }
  0x54   : > { %s4434_s20 = scalar_select %p71_p10, %s4244_s28, %s73_s17  }
  0x55   : > { %s7152_s19 = scalar_select %p4428_p7, 1, 0 }
  0x56   : > { %7153 = sst [smem:[#allocation26_spill]] %s4434_s20  ;;  %s254_s23 = sand.u32 1, %s4244_s28  }
  0x57   : > { %s4438_s15 = sshll.u32 %s254_s23, 6  ;;  %s7123_s12 = sshll.u32 %s4248_s29, 10 }
  0x58   : > { %s7154_s3 = sld [smem:[#allocation29_spill]]  ;;  %s256_s18 = scalar_lea.vmem [#allocation9], %s4438_s15 }
  0x59   : > { %s263_s17 = sshll.u32 %s256_s18, 4  ;;  %p4449_p0 = pnand %p3782_p9, %p82_p12  ;;  %s4453_s17 = int_to_ptr.vmem [resolvable:$true] %s263_s17 }
  0x5a   : > { %s4254_s23 = smov [#allocation10]   ;;  %s4457_s24 = scalar_lea.sflag [#allocation5], %s252_s22 }
  0x5b   : > { %s7155_s25 = scalar_select %p4449_p0, 1, 0 }
  0x5c   : > { %s4455_s30 = sshll.u32 %s4254_s23, 4  ;;  %p7130_p2 = pneg %p4449_p0  ;;  %s228_s30 = int_to_ptr.vmem [resolvable:$true] %s4455_s30 }
  0x5e   : > { %s4446_s14 = scalar_lea.hbm %s7154_s3, %s7123_s12  ;;  %s4051_s1 = scalar_lea.hbm %s7154_s3, 2048 }
  0x5f   : > { %s4046_s11 = scalar_lea.hbm %s4446_s14, 1024  ;;  %p4052_p3 = scmp.lt.u32.totalorder %s4446_s14, %s7154_s3 }
  0x60   : > { %p4047_p1 = scmp.ne.s32.totalorder %s4446_s14, %s4046_s11  ;;  %p4053_p5 = scmp.lt.u32.totalorder %s4051_s1, %s4046_s11 }
  0x61   : > { %p4055_p12 = scmp.lt.u32.totalorder %s4046_s11, %s4446_s14 }
  0x62   : > { %p4049_p6 = pnand %p7130_p2, %p4047_p1  ;;  %p4054_p9 = por %p4053_p5, %p4052_p3 }
  0x64   : > { %p4050_p10 = pneg %p4049_p6  ;;  %p4056_p7 = por %p4055_p12, %p4054_p9 }
  0x66   : > { %p4057_p4 = pnand %p4056_p7, %p4050_p10 }
  0x68   : > { %4060 = shalt.err (!%p4057_p4)
}
  0x69   : > { %s4061_s22 = scalar_lea.vmem %s4453_s17, 1024  ;;  %s4255_s12 = smov [#allocation9]  }
  0x6a   : > { %p4062_p1 = scmp.ne.s32.totalorder %s4453_s17, %s4061_s22  ;;  %s4066_s23 = sshll.u32 %s4255_s12, 4  ;;  %s4067_s23 = int_to_ptr.vmem [resolvable:$false] %s4066_s23 }
  0x6b   : > { %s4068_s2 = scalar_lea.vmem %s4067_s23, 2048  ;;  %p4069_p11 = scmp.lt.s32.totalorder %s4453_s17, %s4067_s23 }
  0x6c   : > { %p4064_p6 = pnand %p4062_p1, %p7130_p2  ;;  %p4070_p3 = scmp.lt.s32.totalorder %s4068_s2, %s4061_s22 }
  0x6e   : > { %p4065_p8 = pneg %p4064_p6  ;;  %p4071_p5 = por %p4070_p3, %p4069_p11 }
  0x70   : > { %p4072_p9 = pnand %p4071_p5, %p4065_p8 }
  0x72   : > { %4075 = shalt.err (!%p4072_p9)
}
  0x73   : > { %s7156_s1 = smov 8   ;;  %s7157_s20 = smov 128  }
  0x74   : > { %3770 = dma.hbm_to_vmem [thread:$0]  (!%p4449_p0), %s4446_s14, 1024, %s4453_s17, %s4457_s24, %s7157_s20, %s7157_s20, %s7156_s1  }
  0x75   : > { %s4076_s12 = scalar_lea.hbm %s7114_s4, 2048 }
  0x76   : > { %p4077_p4 = scmp.ne.s32.totalorder %s7114_s4, %s4076_s12  ;;  %p4083_p7 = scmp.lt.u32.totalorder %s4076_s12, %s7114_s4 }
  0x78   : > { %p4079_p8 = pnand %p4077_p4, %p4369_p13 }
  0x7a   : > { %p4080_p11 = pneg %p4079_p8 }
  0x7c   : > { %p4085_p10 = pnand %p4083_p7, %p4080_p11 }
  0x7e   : > { %4088 = shalt.err (!%p4085_p10)
}
  0x7f   : > { %s4089_s28 = scalar_lea.vmem %s228_s30, 2048  ;;  %p4097_p3 = scmp.lt.s32.totalorder %s228_s30, %s228_s30 }
  0x80   : > { %p4090_p12 = scmp.ne.s32.totalorder %s228_s30, %s4089_s28  ;;  %p4098_p5 = scmp.lt.s32.totalorder %s4089_s28, %s4089_s28 }
  0x82   : > { %p4092_p1 = pnand %p4090_p12, %p4369_p13  ;;  %p4099_p9 = por %p4098_p5, %p4097_p3 }
  0x84   : > { %p4093_p6 = pneg %p4092_p1 }
  0x86   : > { %p4100_p2 = pnand %p4099_p9, %p4093_p6 }
  0x88   : > { %4103 = shalt.err (!%p4100_p2)
}
  0x89   : > { %p7158_p4 = scmp.ne.s32.totalorder %s7146_s13, 0  ;;  %s4256_s17 = smov [#allocation11]  }
  0x8a   : > { %s241_s11 = sshll.u32 %s4256_s17, 4  ;;  %s7159_s18 = sshll.u32 %s4248_s29, 10  ;;  %s242_s11 = int_to_ptr.vmem [resolvable:$true] %s241_s11 }
  0x8b   : > { %3763 = dma.hbm_to_vmem [thread:$0]  (!%p7158_p4), %s7114_s4, 2048, %s228_s30, [#allocation8], %s7157_s20, %s7157_s20, %s7156_s1  }
  0x8c   : > { %s4515_s22 = scalar_lea.hbm %s7116_s6, %s7159_s18  ;;  %s4104_s16 = scalar_lea.hbm %s7115_s5, 16 }
  0x8d   : > { %p4105_p2 = scmp.ne.s32.totalorder %s7115_s5, %s4104_s16  ;;  %p4111_p7 = scmp.lt.u32.totalorder %s4104_s16, %s7115_s5 }
  0x8f   : > { %p4107_p8 = pnand %p4105_p2, %p4369_p13 }
  0x91   : > { %p4108_p11 = pneg %p4107_p8 }
  0x93   : > { %p4113_p10 = pnand %p4111_p7, %p4108_p11 }
  0x95   : > { %4116 = shalt.err (!%p4113_p10)
}
  0x96   : > { %s4117_s14 = scalar_lea.vmem %s242_s11, 16  ;;  %s4124_s17 = scalar_lea.vmem %s242_s11, 32 }
  0x97   : > { %p4118_p12 = scmp.ne.s32.totalorder %s242_s11, %s4117_s14  ;;  %p4125_p3 = scmp.lt.s32.totalorder %s242_s11, %s242_s11 }
  0x98   : > { %p4126_p5 = scmp.lt.s32.totalorder %s4124_s17, %s4117_s14 }
  0x99   : > { %p4120_p1 = pnand %p4118_p12, %p4369_p13 }
  0x9a   : > { %p4127_p9 = por %p4126_p5, %p4125_p3 }
  0x9b   : > { %p4121_p6 = pneg %p4120_p1 }
  0x9d   : > { %p4128_p0 = pnand %p4127_p9, %p4121_p6 }
  0x9f   : > { %4131 = shalt.err (!%p4128_p0)
}
  0xa0   : > { %3766 = dma.hbm_to_vmem [thread:$0]  (!%p7158_p4), %s7115_s5, 16, %s242_s11, [#allocation12]  }
  0xa1   : > { %s277_s21 = scalar_lea.vmem [#allocation13], %s4438_s15  ;;  %s4132_s18 = scalar_lea.hbm %s4515_s22, 1024 }
  0xa2   : > { %s284_s16 = sshll.u32 %s277_s21, 4  ;;  %p4133_p13 = scmp.ne.s32.totalorder %s4515_s22, %s4132_s18  ;;  %s4536_s16 = int_to_ptr.vmem [resolvable:$true] %s284_s16 }
  0xa3   : > { %p7160_p2 = scmp.ne.s32.totalorder %s7155_s25, 0  ;;  %s4137_s28 = scalar_lea.hbm %s7116_s6, 2048 }
  0xa4   : > { %p4138_p7 = scmp.lt.u32.totalorder %s4515_s22, %s7116_s6  ;;  %p4139_p10 = scmp.lt.u32.totalorder %s4137_s28, %s4132_s18 }
  0xa5   : > { %p7161_p0 = pneg %p7160_p2  ;;  %p4141_p12 = scmp.lt.u32.totalorder %s4132_s18, %s4515_s22 }
  0xa6   : > { %p4140_p4 = por %p4139_p10, %p4138_p7 }
  0xa7   : > { %p4135_p8 = pnand %p4133_p13, %p7161_p0 }
  0xa8   : > { %p4142_p1 = por %p4141_p12, %p4140_p4 }
  0xa9   : > { %p4136_p11 = pneg %p4135_p8 }
  0xab   : > { %p4143_p6 = pnand %p4142_p1, %p4136_p11 }
  0xad   : > { %4146 = shalt.err (!%p4143_p6)
}
  0xae   : > { %s4147_s15 = scalar_lea.vmem %s4536_s16, 1024  ;;  %p7162_p5 = pmov %p7161_p0 }
  0xaf   : > { %p4148_p3 = scmp.ne.s32.totalorder %s4536_s16, %s4147_s15  ;;  %s4257_s11 = smov [#allocation13]  }
  0xb0   : > { %s4152_s30 = sshll.u32 %s4257_s11, 4  ;;  %s4153_s30 = int_to_ptr.vmem [resolvable:$false] %s4152_s30 }
  0xb1   : > { %p4150_p9 = pnand %p4148_p3, %p7162_p5  ;;  %s4154_s3 = scalar_lea.vmem %s4153_s30, 2048 }
  0xb2   : > { %p4155_p0 = scmp.lt.s32.totalorder %s4536_s16, %s4153_s30  ;;  %p4156_p8 = scmp.lt.s32.totalorder %s4154_s3, %s4147_s15 }
  0xb3   : > { %p4151_p13 = pneg %p4150_p9 }
  0xb4   : > { %p4157_p7 = por %p4156_p8, %p4155_p0 }
  0xb6   : > { %p4158_p10 = pnand %p4157_p7, %p4151_p13 }
  0xb8   : > { %4161 = shalt.err (!%p4158_p10)
}
  0xb9   : > { %3773 = dma.hbm_to_vmem [thread:$0]  (!%p7160_p2), %s4515_s22, 1024, %s4536_s16, %s4457_s24, %s7157_s20, %s7157_s20, %s7156_s1  }
  0xba   : > { %p7163_p11 = scmp.ne.s32.totalorder %s7145_s10, 0 }
  0xbb   : > { %p7164_p4 = scmp.eq.s32.totalorder (!%p7163_p11), %s4325_s0, 0 }
  0xbc   : > { %296 = sbr.rel (%p7163_p11) target bundleno = 9883 (0x269b), region = 44 }
  0xc3   : > { %4207 = dma.done.wait (%p7164_p4), [#allocation5], 2048   ;;  %p7165_p12 = pmov %p7164_p4 }
  0xc4   : > { %p7166_p1 = pmov %p7164_p4 }
  0xc5   : > { %4209 = vsyncadd (%p7165_p12), [#allocation5], 4294965248 }
  0xc6   : > { %4211 = dma.done.wait (%p7166_p1), [#allocation8], 16   ;;  %p7167_p6 = pmov %p7166_p1 }
  0xc7   : > { %s306_s25 = sand.u32 1, %s4325_s0   ;;  %s4577_s24 = sand.u32 1, %s4240_s27  }
  0xc8   : > { %4213 = vsyncadd (%p7167_p6), [#allocation8], 4294967280  ;;  %s3510_s10 = sshll.u32 %s4577_s24, 6  ;;  %s307_s1 = scalar_lea.sflag [#allocation5], %s306_s25 }
  0xc9   : > { %s4580_s20 = scalar_lea.vmem [#allocation9], %s3510_s10  ;;  %p7168_p2 = scmp.ne.s32.totalorder %s7142_s8, 0 }
  0xcb   : > { %4215 = dma.done.wait (%p7168_p2), %s307_s1, 1024  }
  0xcc   : > { %4217 = vsyncadd (%p7168_p2), %s307_s1, 4294966272  ;;  %p7169_p3 = pmov %p7166_p1 }
  0xcd   : > { %p7170_p5 = pmov %p7166_p1 }
  0xce   : > { %4219 = dma.done.wait (%p7169_p3), [#allocation8], 2048  }
  0xcf   : > { %4221 = vsyncadd (%p7170_p5), [#allocation8], 4294965248  ;;  %p7171_p9 = pmov %p7166_p1 }
  0xd0   : > { %p7172_p13 = pmov %p7166_p1 }
  0xd1   : > { %4223 = dma.done.wait (%p7171_p9), [#allocation12], 16  }
  0xd2   : > { %4225 = vsyncadd (%p7172_p13), [#allocation12], 4294967280  ;;  %s4594_s22 = scalar_lea.vmem [#allocation13], %s3510_s10 }
  0xd3   : > { %4227 = dma.done.wait (%p7168_p2), %s307_s1, 1024  }
  0xd4   : > { %4229 = vsyncadd (%p7168_p2), %s307_s1, 4294966272  ;;  %v4258_v0 = vmov 0   ;;  %s4601_s14 = sshll.u32 %s4325_s0, 6  ;;  %v373_v1 = vld [vmem:[#allocation4] sm:$0xff]  ;;  %v374_v2 = vld [vmem:[#allocation4 + $0x8] sm:$0xff]  ;;  %s362_s17 = sld [smem:[#allocation3]]  ;;  %v581_v44 = vlaneseq }
  0xd5   : > { %3828 = vset.pattern.permute.xlu0 %v4258_v0  ;;  %3829 = vset.pattern.permute.xlu1 %v4258_v0  ;;  %v375_v3 = vld [vmem:[#allocation4 + $0x10] sm:$0xff]  ;;  %v3666_v4 = vpack.c.bf16 %v374_v2, %v373_v1  ;;  %v376_v5 = vld [vmem:[#allocation4 + $0x18] sm:$0xff]  ;;  %s4604_s8 = scalar_lea.vmem [#allocation4], %s4601_s14  ;;  %v377_v8 = vld [vmem:[#allocation4 + $0x20] sm:$0xff]  ;;  %s6308_s26 = scalar_lea.vmem [#allocation10], %s4601_s14 }
  0xd6   : > { %v3670_v6 = vpack.c.bf16 %v376_v5, %v375_v3  ;;  %v365_v7 = vld [vmem:[%s4604_s8] sm:$0xff]  ;;  %v378_v9 = vld [vmem:[#allocation4 + $0x28] sm:$0xff]  ;;  %v496_v11 = vld [vmem:[%s4580_s20 + $0x10] sm:$0xff]  ;;  %v582_v50 = vand.u32 127, %v581_v44  ;;  %s359_s9 = scalar_lea.vmem [#allocation14], %s4577_s24  ;;  %s3525_s16 = sshll.u32 %s4325_s0, 4 }
  0xd7   : > { %3667 = vmatprep.subr.bf16.mxu0 %v3666_v4  ;;  %3610 = vmatprep.mubr.f32.mxu0 %v365_v7  ;;  %v494_v10 = vld [vmem:[%s4580_s20] sm:$0xff]  ;;  %v3674_v12 = vpack.c.bf16 %v378_v9, %v377_v8  ;;  %v495_v13 = vld [vmem:[%s4580_s20 + $0x8] sm:$0xff]  ;;  %v497_v14 = vld [vmem:[%s4580_s20 + $0x18] sm:$0xff]  ;;  %s3366_s21 = sshll.u32 %s359_s9, 4  ;;  %s7068_s28 = scalar_lea.hbm %s7117_s7, %s3525_s16  ;;  %s7063_s21 = int_to_ptr.vmem [resolvable:$true] %s3366_s21 }
  0xd8   : > { %3669 = vmatpush3.bf16.xpose.msra.mxu0 %v3666_v4  ;;  %505 = vperm.xlu0 %3828, %v494_v10   ;;  %v379_v15 = vld [vmem:[#allocation4 + $0x30] sm:$0xff]  ;;  %v380_v16 = vld [vmem:[#allocation4 + $0x38] sm:$0xff]  ;;  %v498_v17 = vld [vmem:[%s4580_s20 + $0x20] sm:$0xff]  ;;  %s3354_s23 = scalar_lea.sflag [#allocation6], %s4577_s24  ;;  %s4162_s2 = scalar_lea.vmem %s7063_s21, 16 }
  0xd9   : > { %3671 = vmatprep.subr.bf16.mxu0 %v3670_v6  ;;  %515 = vperm.xlu1 %3829, %v496_v11   ;;  %v499_v18 = vld [vmem:[%s4580_s20 + $0x28] sm:$0xff]  ;;  %v3678_v19 = vpack.c.bf16 %v380_v16, %v379_v15  ;;  %v500_v20 = vld [vmem:[%s4580_s20 + $0x30] sm:$0xff]  ;;  %v501_v21 = vld [vmem:[%s4580_s20 + $0x38] sm:$0xff]  ;;  %p4163_p0 = scmp.ne.s32.totalorder %s7063_s21, %s4162_s2  ;;  %p7184_p8 = scmp.ne.s32.totalorder %s7152_s19, 0 }
  0xda   : > { %v381_v22 = vld [vmem:[#allocation4 + $0x40] sm:$0xff]  ;;  %v382_v23 = vld [vmem:[#allocation4 + $0x48] sm:$0xff]  ;;  %v383_v25 = vld [vmem:[#allocation4 + $0x50] sm:$0xff]  ;;  %v4623_v53 = vstv %s362_s17  ;;  %s4260_s0 = smov [#allocation14]  }
  0xdb   : > { %v3682_v24 = vpack.c.bf16 %v382_v23, %v381_v22  ;;  %v384_v26 = vld [vmem:[#allocation4 + $0x58] sm:$0xff]  ;;  %v385_v28 = vld [vmem:[#allocation4 + $0x60] sm:$0xff]  ;;  %v386_v29 = vld [vmem:[#allocation4 + $0x68] sm:$0xff]  ;;  %vm4626_vm0 = vcmp.ge.s32.totalorder %v582_v50, %v4623_v53  ;;  %p4164_p7 = pnand %p4163_p0, %p7184_p8  ;;  %s4166_s15 = sshll.u32 %s4260_s0, 4  ;;  %s4167_s15 = int_to_ptr.vmem [resolvable:$false] %s4166_s15 }
  0xdc   : > { %510 = vperm.xlu0 %3828, %v495_v13   ;;  %v3686_v27 = vpack.c.bf16 %v384_v26, %v383_v25  ;;  %v3690_v30 = vpack.c.bf16 %v386_v29, %v385_v28  ;;  %v387_v31 = vld [vmem:[#allocation4 + $0x70] sm:$0xff]  ;;  %v388_v32 = vld [vmem:[#allocation4 + $0x78] sm:$0xff]  ;;  %v366_v34 = vld [vmem:[%s4604_s8 + $0x8] sm:$0xff]  ;;  %s4168_s11 = scalar_lea.vmem %s4167_s15, 32  ;;  %p4169_p11 = scmp.lt.s32.totalorder %s7063_s21, %s4167_s15 }
  0xdd   : > { %520 = vperm.xlu1 %3829, %v497_v14   ;;  %v3694_v33 = vpack.c.bf16 %v388_v32, %v387_v31  ;;  %v367_v35 = vld [vmem:[%s4604_s8 + $0x10] sm:$0xff]  ;;  %v368_v36 = vld [vmem:[%s4604_s8 + $0x18] sm:$0xff]  ;;  %v369_v37 = vld [vmem:[%s4604_s8 + $0x20] sm:$0xff]  ;;  %p4165_p10 = pneg %p4164_p7  ;;  %p4170_p4 = scmp.lt.s32.totalorder %s4168_s11, %s4162_s2 }
  0xde   : > { %v370_v38 = vld [vmem:[%s4604_s8 + $0x28] sm:$0xff]  ;;  %v371_v39 = vld [vmem:[%s4604_s8 + $0x30] sm:$0xff]  ;;  %v372_v40 = vld [vmem:[%s4604_s8 + $0x38] sm:$0xff] }
  0xdf   : > { %v3515_v43 = vld [vmem:[#allocation7] ss:$0 sm:$0xff]  ;;  %p4171_p12 = por %p4170_p4, %p4169_p11 }
  0xe0   : > { %3673 = vmatpush3.bf16.xpose.msra.mxu0 %v3670_v6  ;;  %525 = vperm.xlu0 %3828, %v498_v17  }
  0xe1   : > { %3675 = vmatprep.subr.bf16.mxu0 %v3674_v12  ;;  %530 = vperm.xlu1 %3829, %v499_v18   ;;  %p4172_p1 = pnand %p4171_p12, %p4165_p10 }
  0xe4   : > { %535 = vperm.xlu0 %3828, %v500_v20  }
  0xe5   : > { %540 = vperm.xlu1 %3829, %v501_v21  }
  0xe8   : > { %3677 = vmatpush3.bf16.xpose.msra.mxu0 %v3674_v12 }
  0xe9   : > { %3679 = vmatprep.subr.bf16.mxu0 %v3678_v19 }
  0xf0   : > { %3681 = vmatpush3.bf16.xpose.msra.mxu0 %v3678_v19 }
  0xf1   : > { %3683 = vmatprep.subr.bf16.mxu0 %v3682_v24 }
  0xf8   : > { %3685 = vmatpush3.bf16.xpose.msra.mxu0 %v3682_v24 }
  0xf9   : > { %3687 = vmatprep.subr.bf16.mxu0 %v3686_v27 }
 0x100   : > { %3689 = vmatpush3.bf16.xpose.msra.mxu0 %v3686_v27 }
 0x101   : > { %3691 = vmatprep.subr.bf16.mxu0 %v3690_v30 }
 0x108   : > { %3693 = vmatpush3.bf16.xpose.msra.mxu0 %v3690_v30 }
 0x109   : > { %3695 = vmatprep.subr.bf16.mxu0 %v3694_v33 }
 0x110   : > { %3697 = vmatpush3.bf16.xpose.msra.mxu0 %v3694_v33 }
 0x117   : > { %3611 = vmatmul.mubr.f32.vlgmr.msra.gmra.mrb[0].mxu0 %v366_v34 }
 0x118   : > { %3613 = vmatprep.mubr.f32.mxu0 %v367_v35 }
 0x11b   : > { %3614 = vmatmul.mubr.f32.gmra.mrb[2].mxu0 %v368_v36 }
 0x11c   : > { %3616 = vmatprep.mubr.f32.mxu0 %v369_v37 }
 0x11f   : > { %3617 = vmatmul.mubr.f32.gmra.mrb[4].mxu0 %v370_v38  ;;  %v4667_v38 = vcvt.s32.f32 %v582_v50 }
 0x120   : > { %3619 = vmatprep.mubr.f32.mxu0 %v371_v39 }
 0x123   : > { %3620 = vmatmul.mubr.f32.gmra.mrb[6].mxu0 %v372_v40 }
 0x157   : > { %v506_v41 = vpop.permute.xlu0 %505 }
 0x158   : > { %v516_v42 = vpop.permute.xlu1 %515  ;;  %v549_v48 = vadd.f32 %v3515_v43, %v506_v41 }
 0x159   : > { %v551_v57 = vadd.f32 %v3515_v43, %v516_v42 }
 0x15b   : > { %v511_v45 = vpop.permute.xlu0 %510 }
 0x15c   : > { %v550_v46 = vadd.f32 %v3515_v43, %v511_v45  ;;  %v521_v47 = vpop.permute.xlu1 %520 }
 0x15d   : > { %v552_v55 = vadd.f32 %v3515_v43, %v521_v47 }
 0x15f   : > { %v526_v58 = vpop.permute.xlu0 %525 }
 0x160   : > { %v531_v63 = vpop.permute.xlu1 %530  ;;  %v553_v11 = vadd.f32 %v3515_v43, %v526_v58 }
 0x161   : > { %v554_v12 = vadd.f32 %v3515_v43, %v531_v63 }
 0x163   : > { %v536_v15 = vpop.permute.xlu0 %535 }
 0x164   : > { %v541_v17 = vpop.permute.xlu1 %540  ;;  %v555_v24 = vadd.f32 %v3515_v43, %v536_v15 }
 0x165   : > { %v556_v25 = vadd.f32 %v3515_v43, %v541_v17 }
 0x1ea   : > { %v3612_v49 = vpop.f32.mrb[0].mxu0 }
 0x1eb   : > { %v558_v51 = vmul.f32 2.0, %v3612_v49  ;;  %v455_v52 = vpop.f32.mrb[1].mxu0 }
 0x1ec   : > { %v557_v54 = vmul.f32 2.0, %v455_v52 }
 0x1ed   : > { %v566_v56 = vsub.f32 %v550_v46, %v558_v51 }
 0x1ee   : > { %v565_v59 = vsub.f32 %v549_v48, %v557_v54  ;;  %v3615_v60 = vpop.f32.mrb[2].mxu0 }
 0x1ef   : > { %v574_v62 = vmax.f32 %v566_v56, 1e-12  ;;  %v560_v0 = vmul.f32 2.0, %v3615_v60  ;;  %v465_v1 = vpop.f32.mrb[3].mxu0 }
 0x1f0   : > { %v573_v2 = vmax.f32 %v565_v59, 1e-12  ;;  %v559_v3 = vmul.f32 2.0, %v465_v1 }
 0x1f1   : > { %v568_v4 = vsub.f32 %v552_v55, %v560_v0  ;;  %v4632_v5 = vsel %vm4626_vm0, 1e+30, %v574_v62 }
 0x1f2   : > { %v567_v6 = vsub.f32 %v551_v57, %v559_v3  ;;  %v3618_v7 = vpop.f32.mrb[4].mxu0  ;;  %596 = vmin.xlane.f32.xlu1 %v4632_v5  ;;  %v4637_v8 = vsel %vm4626_vm0, 1e+30, %v573_v2 }
 0x1f3   : > { %v562_v9 = vmul.f32 2.0, %v3618_v7  ;;  %v475_v10 = vpop.f32.mrb[5].mxu0  ;;  %594 = vmin.xlane.f32.xlu0 %v4637_v8  ;;  %v576_v16 = vmax.f32 %v568_v4, 1e-12 }
 0x1f4   : > { %v575_v13 = vmax.f32 %v567_v6, 1e-12  ;;  %v561_v14 = vmul.f32 2.0, %v475_v10 }
 0x1f5   : > { %v570_v18 = vsub.f32 %v554_v12, %v562_v9  ;;  %v4647_v28 = vsel %vm4626_vm0, 1e+30, %v576_v16 }
 0x1f6   : > { %v569_v19 = vsub.f32 %v553_v11, %v561_v14  ;;  %v3621_v20 = vpop.f32.mrb[6].mxu0  ;;  %v4642_v21 = vsel %vm4626_vm0, 1e+30, %v575_v13 }
 0x1f7   : > { %v564_v22 = vmul.f32 2.0, %v3621_v20  ;;  %v485_v23 = vpop.f32.mrb[7].mxu0  ;;  %598 = vmin.xlane.f32.xlu0 %v4642_v21  ;;  %v578_v29 = vmax.f32 %v570_v18, 1e-12 }
 0x1f8   : > { %v577_v26 = vmax.f32 %v569_v19, 1e-12  ;;  %v563_v27 = vmul.f32 2.0, %v485_v23 }
 0x1f9   : > { %v572_v30 = vsub.f32 %v556_v25, %v564_v22  ;;  %v4658_v36 = vsel %vm4626_vm0, 1e+30, %v578_v29 }
 0x1fa   : > { %v571_v31 = vsub.f32 %v555_v24, %v563_v27  ;;  %v590_v32 = vsel %vm4626_vm0, 1e+30, %v577_v26 }
 0x1fb   : > { %602 = vmin.xlane.f32.xlu1 %v590_v32  ;;  %600 = vmin.xlane.f32.xlu0 %v4647_v28  ;;  %v580_v34 = vmax.f32 %v572_v30, 1e-12 }
 0x1fc   : > { %v579_v33 = vmax.f32 %v571_v31, 1e-12 }
 0x1fd   : > { %v4664_v37 = vsel %vm4626_vm0, 1e+30, %v580_v34 }
 0x1fe   : > { %v4654_v35 = vsel %vm4626_vm0, 1e+30, %v579_v33 }
 0x1ff   : > { %606 = vmin.xlane.f32.xlu1 %v4654_v35  ;;  %604 = vmin.xlane.f32.xlu0 %v4658_v36 }
 0x203   : > { %608 = vmin.xlane.f32.xlu0 %v4664_v37 }
 0x27f   : > { %v597_v39 = vpop.xlane.xlu1 %596 }
 0x280   : > { %v595_v40 = vpop.xlane.xlu0 %594  ;;  %vm611_vm1 = vcmp.eq.f32.partialorder %v4632_v5, %v597_v39 }
 0x281   : > { %v619_v41 = vsel %vm611_vm1, %v4667_v38, 128.0  ;;  %vm610_vm2 = vcmp.eq.f32.partialorder %v4637_v8, %v595_v40 }
 0x282   : > { %628 = vmin.xlane.f32.xlu0 %v619_v41  ;;  %v618_v42 = vsel %vm610_vm2, %v4667_v38, 128.0 }
 0x283   : > { %626 = vmin.xlane.f32.xlu1 %v618_v42 }
 0x284   : > { %v599_v43 = vpop.xlane.xlu0 %598 }
 0x285   : > { %vm612_vm3 = vcmp.eq.f32.partialorder %v4642_v21, %v599_v43 }
 0x286   : > { %v620_v45 = vsel %vm612_vm3, %v4667_v38, 128.0 }
 0x287   : > { %630 = vmin.xlane.f32.xlu1 %v620_v45 }
 0x288   : > { %v603_v46 = vpop.xlane.xlu1 %602  ;;  %v601_v47 = vpop.xlane.xlu0 %600 }
 0x289   : > { %vm614_vm4 = vcmp.eq.f32.partialorder %v590_v32, %v603_v46  ;;  %vm613_vm5 = vcmp.eq.f32.partialorder %v4647_v28, %v601_v47 }
 0x28a   : > { %v622_v48 = vsel %vm614_vm4, %v4667_v38, 128.0  ;;  %v621_v49 = vsel %vm613_vm5, %v4667_v38, 128.0 }
 0x28b   : > { %634 = vmin.xlane.f32.xlu1 %v622_v48  ;;  %632 = vmin.xlane.f32.xlu0 %v621_v49 }
 0x28c   : > { %v607_v50 = vpop.xlane.xlu1 %606  ;;  %v605_v51 = vpop.xlane.xlu0 %604 }
 0x28d   : > { %vm616_vm6 = vcmp.eq.f32.partialorder %v4654_v35, %v607_v50  ;;  %vm615_vm7 = vcmp.eq.f32.partialorder %v4658_v36, %v605_v51 }
 0x28e   : > { %v624_v52 = vsel %vm616_vm6, %v4667_v38, 128.0  ;;  %v623_v54 = vsel %vm615_vm7, %v4667_v38, 128.0 }
 0x28f   : > { %638 = vmin.xlane.f32.xlu1 %v624_v52  ;;  %636 = vmin.xlane.f32.xlu0 %v623_v54 }
 0x290   : > { %v609_v55 = vpop.xlane.xlu0 %608 }
 0x291   : > { %vm617_vm8 = vcmp.eq.f32.partialorder %v4664_v37, %v609_v55 }
 0x292   : > { %v625_v56 = vsel %vm617_vm8, %v4667_v38, 128.0 }
 0x293   : > { %640 = vmin.xlane.f32.xlu0 %v625_v56 }
 0x30f   : > { %v629_v57 = vpop.xlane.xlu0 %628 }
 0x310   : > { %vm643_vm9 = vcmp.eq.f32.partialorder %v4667_v38, %v629_v57  ;;  %v627_v58 = vpop.xlane.xlu1 %626 }
 0x311   : > { %vm642_vm10 = vcmp.eq.f32.partialorder %v4667_v38, %v627_v58  ;;  %v4687_v59 = vsel %vm643_vm9, 1e+30, %v4632_v5 }
 0x312   : > { %660 = vmin.xlane.f32.xlu0 %v4687_v59  ;;  %v4691_v60 = vsel %vm642_vm10, 1e+30, %v4637_v8 }
 0x313   : > { %658 = vmin.xlane.f32.xlu1 %v4691_v60 }
 0x314   : > { %v631_v61 = vpop.xlane.xlu1 %630 }
 0x315   : > { %vm644_vm11 = vcmp.eq.f32.partialorder %v4667_v38, %v631_v61 }
 0x316   : > { %v4696_v62 = vsel %vm644_vm11, 1e+30, %v4642_v21 }
 0x317   : > { %662 = vmin.xlane.f32.xlu1 %v4696_v62 }
 0x318   : > { %v635_v63 = vpop.xlane.xlu1 %634  ;;  %v633_v0 = vpop.xlane.xlu0 %632 }
 0x319   : > { %vm646_vm12 = vcmp.eq.f32.partialorder %v4667_v38, %v635_v63  ;;  %vm645_vm13 = vcmp.eq.f32.partialorder %v4667_v38, %v633_v0 }
 0x31a   : > { %v4701_v1 = vsel %vm646_vm12, 1e+30, %v590_v32  ;;  %v4704_v2 = vsel %vm645_vm13, 1e+30, %v4647_v28 }
 0x31b   : > { %666 = vmin.xlane.f32.xlu1 %v4701_v1  ;;  %664 = vmin.xlane.f32.xlu0 %v4704_v2 }
 0x31c   : > { %v639_v3 = vpop.xlane.xlu1 %638  ;;  %v637_v4 = vpop.xlane.xlu0 %636 }
 0x31d   : > { %vm648_vm14 = vcmp.eq.f32.partialorder %v4667_v38, %v639_v3  ;;  %vm647_vm15 = vcmp.eq.f32.partialorder %v4667_v38, %v637_v4 }
 0x31e   : > { %v4711_v5 = vsel %vm648_vm14, 1e+30, %v4654_v35  ;;  %v4714_v6 = vsel %vm647_vm15, 1e+30, %v4658_v36 }
 0x31f   : > { %670 = vmin.xlane.f32.xlu1 %v4711_v5  ;;  %668 = vmin.xlane.f32.xlu0 %v4714_v6 }
 0x320   : > { %v641_v7 = vpop.xlane.xlu0 %640 }
 0x321   : > { %vm649_vm0 = vcmp.eq.f32.partialorder %v4667_v38, %v641_v7 }
 0x322   : > { %v4720_v8 = vsel %vm649_vm0, 1e+30, %v4664_v37 }
 0x323   : > { %672 = vmin.xlane.f32.xlu0 %v4720_v8 }
 0x39f   : > { %v661_v9 = vpop.xlane.xlu0 %660 }
 0x3a0   : > { %v659_v10 = vpop.xlane.xlu1 %658  ;;  %vm675_vm1 = vcmp.eq.f32.partialorder %v4687_v59, %v661_v9 }
 0x3a1   : > { %v683_v11 = vsel %vm675_vm1, %v4667_v38, 128.0  ;;  %vm674_vm2 = vcmp.eq.f32.partialorder %v4691_v60, %v659_v10 }
 0x3a2   : > { %692 = vmin.xlane.f32.xlu0 %v683_v11  ;;  %v682_v12 = vsel %vm674_vm2, %v4667_v38, 128.0 }
 0x3a3   : > { %690 = vmin.xlane.f32.xlu1 %v682_v12 }
 0x3a4   : > { %v663_v13 = vpop.xlane.xlu1 %662 }
 0x3a5   : > { %vm676_vm3 = vcmp.eq.f32.partialorder %v4696_v62, %v663_v13 }
 0x3a6   : > { %v684_v14 = vsel %vm676_vm3, %v4667_v38, 128.0 }
 0x3a7   : > { %694 = vmin.xlane.f32.xlu1 %v684_v14 }
 0x3a8   : > { %v667_v15 = vpop.xlane.xlu1 %666  ;;  %v665_v16 = vpop.xlane.xlu0 %664 }
 0x3a9   : > { %vm678_vm4 = vcmp.eq.f32.partialorder %v4701_v1, %v667_v15  ;;  %vm677_vm5 = vcmp.eq.f32.partialorder %v4704_v2, %v665_v16 }
 0x3aa   : > { %v686_v17 = vsel %vm678_vm4, %v4667_v38, 128.0  ;;  %v685_v18 = vsel %vm677_vm5, %v4667_v38, 128.0 }
 0x3ab   : > { %698 = vmin.xlane.f32.xlu1 %v686_v17  ;;  %696 = vmin.xlane.f32.xlu0 %v685_v18 }
 0x3ac   : > { %v671_v19 = vpop.xlane.xlu1 %670  ;;  %v669_v20 = vpop.xlane.xlu0 %668 }
 0x3ad   : > { %vm680_vm6 = vcmp.eq.f32.partialorder %v4711_v5, %v671_v19  ;;  %vm679_vm7 = vcmp.eq.f32.partialorder %v4714_v6, %v669_v20 }
 0x3ae   : > { %v688_v21 = vsel %vm680_vm6, %v4667_v38, 128.0  ;;  %v687_v22 = vsel %vm679_vm7, %v4667_v38, 128.0 }
 0x3af   : > { %702 = vmin.xlane.f32.xlu1 %v688_v21  ;;  %700 = vmin.xlane.f32.xlu0 %v687_v22 }
 0x3b0   : > { %v673_v23 = vpop.xlane.xlu0 %672 }
 0x3b1   : > { %vm681_vm8 = vcmp.eq.f32.partialorder %v4720_v8, %v673_v23 }
 0x3b2   : > { %v689_v24 = vsel %vm681_vm8, %v4667_v38, 128.0 }
 0x3b3   : > { %704 = vmin.xlane.f32.xlu0 %v689_v24 }
 0x42f   : > { %v693_v25 = vpop.xlane.xlu0 %692 }
 0x430   : > { %vm707_vm9 = vcmp.eq.f32.partialorder %v4667_v38, %v693_v25  ;;  %v691_v26 = vpop.xlane.xlu1 %690 }
 0x431   : > { %vm706_vm10 = vcmp.eq.f32.partialorder %v4667_v38, %v691_v26  ;;  %v4742_v27 = vsel %vm707_vm9, 1e+30, %v4687_v59 }
 0x432   : > { %724 = vmin.xlane.f32.xlu0 %v4742_v27  ;;  %v4746_v28 = vsel %vm706_vm10, 1e+30, %v4691_v60 }
 0x433   : > { %722 = vmin.xlane.f32.xlu1 %v4746_v28 }
 0x434   : > { %v695_v29 = vpop.xlane.xlu1 %694 }
 0x435   : > { %vm708_vm11 = vcmp.eq.f32.partialorder %v4667_v38, %v695_v29 }
 0x436   : > { %v4751_v30 = vsel %vm708_vm11, 1e+30, %v4696_v62 }
 0x437   : > { %726 = vmin.xlane.f32.xlu1 %v4751_v30 }
 0x438   : > { %v699_v31 = vpop.xlane.xlu1 %698  ;;  %v697_v32 = vpop.xlane.xlu0 %696 }
 0x439   : > { %vm710_vm12 = vcmp.eq.f32.partialorder %v4667_v38, %v699_v31  ;;  %vm709_vm13 = vcmp.eq.f32.partialorder %v4667_v38, %v697_v32 }
 0x43a   : > { %v4757_v33 = vsel %vm710_vm12, 1e+30, %v4701_v1  ;;  %v4760_v34 = vsel %vm709_vm13, 1e+30, %v4704_v2 }
 0x43b   : > { %730 = vmin.xlane.f32.xlu1 %v4757_v33  ;;  %728 = vmin.xlane.f32.xlu0 %v4760_v34 }
 0x43c   : > { %v703_v35 = vpop.xlane.xlu1 %702  ;;  %v701_v36 = vpop.xlane.xlu0 %700 }
 0x43d   : > { %vm712_vm14 = vcmp.eq.f32.partialorder %v4667_v38, %v703_v35  ;;  %vm711_vm15 = vcmp.eq.f32.partialorder %v4667_v38, %v701_v36 }
 0x43e   : > { %v4767_v37 = vsel %vm712_vm14, 1e+30, %v4711_v5  ;;  %v4770_v39 = vsel %vm711_vm15, 1e+30, %v4714_v6 }
 0x43f   : > { %734 = vmin.xlane.f32.xlu1 %v4767_v37  ;;  %732 = vmin.xlane.f32.xlu0 %v4770_v39 }
 0x440   : > { %v705_v40 = vpop.xlane.xlu0 %704 }
 0x441   : > { %vm713_vm0 = vcmp.eq.f32.partialorder %v4667_v38, %v705_v40 }
 0x442   : > { %v4776_v41 = vsel %vm713_vm0, 1e+30, %v4720_v8 }
 0x443   : > { %736 = vmin.xlane.f32.xlu0 %v4776_v41 }
 0x4bf   : > { %v725_v42 = vpop.xlane.xlu0 %724 }
 0x4c0   : > { %v723_v43 = vpop.xlane.xlu1 %722  ;;  %vm739_vm1 = vcmp.eq.f32.partialorder %v4742_v27, %v725_v42 }
 0x4c1   : > { %v747_v45 = vsel %vm739_vm1, %v4667_v38, 128.0  ;;  %vm738_vm2 = vcmp.eq.f32.partialorder %v4746_v28, %v723_v43 }
 0x4c2   : > { %756 = vmin.xlane.f32.xlu0 %v747_v45  ;;  %v746_v46 = vsel %vm738_vm2, %v4667_v38, 128.0 }
 0x4c3   : > { %754 = vmin.xlane.f32.xlu1 %v746_v46 }
 0x4c4   : > { %v727_v47 = vpop.xlane.xlu1 %726 }
 0x4c5   : > { %vm740_vm3 = vcmp.eq.f32.partialorder %v4751_v30, %v727_v47 }
 0x4c6   : > { %v748_v48 = vsel %vm740_vm3, %v4667_v38, 128.0 }
 0x4c7   : > { %758 = vmin.xlane.f32.xlu1 %v748_v48 }
 0x4c8   : > { %v731_v49 = vpop.xlane.xlu1 %730  ;;  %v729_v50 = vpop.xlane.xlu0 %728 }
 0x4c9   : > { %vm742_vm4 = vcmp.eq.f32.partialorder %v4757_v33, %v731_v49  ;;  %vm741_vm5 = vcmp.eq.f32.partialorder %v4760_v34, %v729_v50 }
 0x4ca   : > { %v750_v51 = vsel %vm742_vm4, %v4667_v38, 128.0  ;;  %v749_v52 = vsel %vm741_vm5, %v4667_v38, 128.0 }
 0x4cb   : > { %762 = vmin.xlane.f32.xlu1 %v750_v51  ;;  %760 = vmin.xlane.f32.xlu0 %v749_v52 }
 0x4cc   : > { %v735_v54 = vpop.xlane.xlu1 %734  ;;  %v733_v55 = vpop.xlane.xlu0 %732 }
 0x4cd   : > { %vm744_vm6 = vcmp.eq.f32.partialorder %v4767_v37, %v735_v54  ;;  %vm743_vm7 = vcmp.eq.f32.partialorder %v4770_v39, %v733_v55 }
 0x4ce   : > { %v752_v56 = vsel %vm744_vm6, %v4667_v38, 128.0  ;;  %v751_v57 = vsel %vm743_vm7, %v4667_v38, 128.0 }
 0x4cf   : > { %766 = vmin.xlane.f32.xlu1 %v752_v56  ;;  %764 = vmin.xlane.f32.xlu0 %v751_v57 }
 0x4d0   : > { %v737_v58 = vpop.xlane.xlu0 %736 }
 0x4d1   : > { %vm745_vm8 = vcmp.eq.f32.partialorder %v4776_v41, %v737_v58 }
 0x4d2   : > { %v753_v59 = vsel %vm745_vm8, %v4667_v38, 128.0 }
 0x4d3   : > { %768 = vmin.xlane.f32.xlu0 %v753_v59 }
 0x54f   : > { %v757_v60 = vpop.xlane.xlu0 %756 }
 0x550   : > { %vm771_vm9 = vcmp.eq.f32.partialorder %v4667_v38, %v757_v60  ;;  %v755_v61 = vpop.xlane.xlu1 %754 }
 0x551   : > { %vm770_vm10 = vcmp.eq.f32.partialorder %v4667_v38, %v755_v61  ;;  %v4798_v62 = vsel %vm771_vm9, 1e+30, %v4742_v27 }
 0x552   : > { %788 = vmin.xlane.f32.xlu0 %v4798_v62  ;;  %v4802_v63 = vsel %vm770_vm10, 1e+30, %v4746_v28 }
 0x553   : > { %786 = vmin.xlane.f32.xlu1 %v4802_v63 }
 0x554   : > { %v759_v0 = vpop.xlane.xlu1 %758 }
 0x555   : > { %vm772_vm11 = vcmp.eq.f32.partialorder %v4667_v38, %v759_v0 }
 0x556   : > { %v4807_v1 = vsel %vm772_vm11, 1e+30, %v4751_v30 }
 0x557   : > { %790 = vmin.xlane.f32.xlu1 %v4807_v1 }
 0x558   : > { %v763_v2 = vpop.xlane.xlu1 %762  ;;  %v761_v3 = vpop.xlane.xlu0 %760 }
 0x559   : > { %vm774_vm12 = vcmp.eq.f32.partialorder %v4667_v38, %v763_v2  ;;  %vm773_vm13 = vcmp.eq.f32.partialorder %v4667_v38, %v761_v3 }
 0x55a   : > { %v4813_v4 = vsel %vm774_vm12, 1e+30, %v4757_v33  ;;  %v4816_v5 = vsel %vm773_vm13, 1e+30, %v4760_v34 }
 0x55b   : > { %794 = vmin.xlane.f32.xlu1 %v4813_v4  ;;  %792 = vmin.xlane.f32.xlu0 %v4816_v5 }
 0x55c   : > { %v767_v6 = vpop.xlane.xlu1 %766  ;;  %v765_v7 = vpop.xlane.xlu0 %764 }
 0x55d   : > { %vm776_vm14 = vcmp.eq.f32.partialorder %v4667_v38, %v767_v6  ;;  %vm775_vm15 = vcmp.eq.f32.partialorder %v4667_v38, %v765_v7 }
 0x55e   : > { %v4823_v8 = vsel %vm776_vm14, 1e+30, %v4767_v37  ;;  %v4826_v9 = vsel %vm775_vm15, 1e+30, %v4770_v39 }
 0x55f   : > { %798 = vmin.xlane.f32.xlu1 %v4823_v8  ;;  %796 = vmin.xlane.f32.xlu0 %v4826_v9 }
 0x560   : > { %v769_v10 = vpop.xlane.xlu0 %768 }
 0x561   : > { %vm777_vm0 = vcmp.eq.f32.partialorder %v4667_v38, %v769_v10 }
 0x562   : > { %v4832_v11 = vsel %vm777_vm0, 1e+30, %v4776_v41 }
 0x563   : > { %800 = vmin.xlane.f32.xlu0 %v4832_v11 }
 0x5df   : > { %v789_v12 = vpop.xlane.xlu0 %788 }
 0x5e0   : > { %v787_v13 = vpop.xlane.xlu1 %786  ;;  %vm803_vm1 = vcmp.eq.f32.partialorder %v4798_v62, %v789_v12 }
 0x5e1   : > { %v811_v14 = vsel %vm803_vm1, %v4667_v38, 128.0  ;;  %vm802_vm2 = vcmp.eq.f32.partialorder %v4802_v63, %v787_v13 }
 0x5e2   : > { %820 = vmin.xlane.f32.xlu0 %v811_v14  ;;  %v810_v15 = vsel %vm802_vm2, %v4667_v38, 128.0 }
 0x5e3   : > { %818 = vmin.xlane.f32.xlu1 %v810_v15 }
 0x5e4   : > { %v791_v16 = vpop.xlane.xlu1 %790 }
 0x5e5   : > { %vm804_vm3 = vcmp.eq.f32.partialorder %v4807_v1, %v791_v16 }
 0x5e6   : > { %v812_v17 = vsel %vm804_vm3, %v4667_v38, 128.0 }
 0x5e7   : > { %822 = vmin.xlane.f32.xlu1 %v812_v17 }
 0x5e8   : > { %v795_v18 = vpop.xlane.xlu1 %794  ;;  %v793_v19 = vpop.xlane.xlu0 %792 }
 0x5e9   : > { %vm806_vm4 = vcmp.eq.f32.partialorder %v4813_v4, %v795_v18  ;;  %vm805_vm5 = vcmp.eq.f32.partialorder %v4816_v5, %v793_v19 }
 0x5ea   : > { %v814_v20 = vsel %vm806_vm4, %v4667_v38, 128.0  ;;  %v813_v21 = vsel %vm805_vm5, %v4667_v38, 128.0 }
 0x5eb   : > { %826 = vmin.xlane.f32.xlu1 %v814_v20  ;;  %824 = vmin.xlane.f32.xlu0 %v813_v21 }
 0x5ec   : > { %v799_v22 = vpop.xlane.xlu1 %798  ;;  %v797_v23 = vpop.xlane.xlu0 %796 }
 0x5ed   : > { %vm808_vm6 = vcmp.eq.f32.partialorder %v4823_v8, %v799_v22  ;;  %vm807_vm7 = vcmp.eq.f32.partialorder %v4826_v9, %v797_v23 }
 0x5ee   : > { %v816_v24 = vsel %vm808_vm6, %v4667_v38, 128.0  ;;  %v815_v25 = vsel %vm807_vm7, %v4667_v38, 128.0 }
 0x5ef   : > { %830 = vmin.xlane.f32.xlu1 %v816_v24  ;;  %828 = vmin.xlane.f32.xlu0 %v815_v25 }
 0x5f0   : > { %v801_v26 = vpop.xlane.xlu0 %800 }
 0x5f1   : > { %vm809_vm8 = vcmp.eq.f32.partialorder %v4832_v11, %v801_v26 }
 0x5f2   : > { %v817_v27 = vsel %vm809_vm8, %v4667_v38, 128.0 }
 0x5f3   : > { %832 = vmin.xlane.f32.xlu0 %v817_v27 }
 0x66f   : > { %v821_v28 = vpop.xlane.xlu0 %820 }
 0x670   : > { %vm835_vm9 = vcmp.eq.f32.partialorder %v4667_v38, %v821_v28  ;;  %v819_v29 = vpop.xlane.xlu1 %818 }
 0x671   : > { %vm834_vm10 = vcmp.eq.f32.partialorder %v4667_v38, %v819_v29  ;;  %v4854_v30 = vsel %vm835_vm9, 1e+30, %v4798_v62 }
 0x672   : > { %852 = vmin.xlane.f32.xlu0 %v4854_v30  ;;  %v4858_v31 = vsel %vm834_vm10, 1e+30, %v4802_v63 }
 0x673   : > { %850 = vmin.xlane.f32.xlu1 %v4858_v31 }
 0x674   : > { %v823_v32 = vpop.xlane.xlu1 %822 }
 0x675   : > { %vm836_vm11 = vcmp.eq.f32.partialorder %v4667_v38, %v823_v32 }
 0x676   : > { %v4863_v33 = vsel %vm836_vm11, 1e+30, %v4807_v1 }
 0x677   : > { %854 = vmin.xlane.f32.xlu1 %v4863_v33 }
 0x678   : > { %v827_v34 = vpop.xlane.xlu1 %826  ;;  %v825_v35 = vpop.xlane.xlu0 %824 }
 0x679   : > { %vm838_vm12 = vcmp.eq.f32.partialorder %v4667_v38, %v827_v34  ;;  %vm837_vm13 = vcmp.eq.f32.partialorder %v4667_v38, %v825_v35 }
 0x67a   : > { %v4869_v36 = vsel %vm838_vm12, 1e+30, %v4813_v4  ;;  %v4872_v37 = vsel %vm837_vm13, 1e+30, %v4816_v5 }
 0x67b   : > { %858 = vmin.xlane.f32.xlu1 %v4869_v36  ;;  %856 = vmin.xlane.f32.xlu0 %v4872_v37 }
 0x67c   : > { %v831_v39 = vpop.xlane.xlu1 %830  ;;  %v829_v40 = vpop.xlane.xlu0 %828 }
 0x67d   : > { %vm840_vm14 = vcmp.eq.f32.partialorder %v4667_v38, %v831_v39  ;;  %vm839_vm15 = vcmp.eq.f32.partialorder %v4667_v38, %v829_v40 }
 0x67e   : > { %v4879_v41 = vsel %vm840_vm14, 1e+30, %v4823_v8  ;;  %v4882_v42 = vsel %vm839_vm15, 1e+30, %v4826_v9 }
 0x67f   : > { %862 = vmin.xlane.f32.xlu1 %v4879_v41  ;;  %860 = vmin.xlane.f32.xlu0 %v4882_v42 }
 0x680   : > { %v833_v43 = vpop.xlane.xlu0 %832 }
 0x681   : > { %vm841_vm0 = vcmp.eq.f32.partialorder %v4667_v38, %v833_v43 }
 0x682   : > { %v4888_v45 = vsel %vm841_vm0, 1e+30, %v4832_v11 }
 0x683   : > { %864 = vmin.xlane.f32.xlu0 %v4888_v45 }
 0x6ff   : > { %v853_v46 = vpop.xlane.xlu0 %852 }
 0x700   : > { %v851_v47 = vpop.xlane.xlu1 %850  ;;  %vm867_vm1 = vcmp.eq.f32.partialorder %v4854_v30, %v853_v46 }
 0x701   : > { %v875_v48 = vsel %vm867_vm1, %v4667_v38, 128.0  ;;  %vm866_vm2 = vcmp.eq.f32.partialorder %v4858_v31, %v851_v47 }
 0x702   : > { %884 = vmin.xlane.f32.xlu0 %v875_v48  ;;  %v874_v49 = vsel %vm866_vm2, %v4667_v38, 128.0 }
 0x703   : > { %882 = vmin.xlane.f32.xlu1 %v874_v49 }
 0x704   : > { %v855_v50 = vpop.xlane.xlu1 %854 }
 0x705   : > { %vm868_vm3 = vcmp.eq.f32.partialorder %v4863_v33, %v855_v50 }
 0x706   : > { %v876_v51 = vsel %vm868_vm3, %v4667_v38, 128.0 }
 0x707   : > { %886 = vmin.xlane.f32.xlu1 %v876_v51 }
 0x708   : > { %v859_v52 = vpop.xlane.xlu1 %858  ;;  %v857_v54 = vpop.xlane.xlu0 %856 }
 0x709   : > { %vm870_vm4 = vcmp.eq.f32.partialorder %v4869_v36, %v859_v52  ;;  %vm869_vm5 = vcmp.eq.f32.partialorder %v4872_v37, %v857_v54 }
 0x70a   : > { %v878_v55 = vsel %vm870_vm4, %v4667_v38, 128.0  ;;  %v877_v56 = vsel %vm869_vm5, %v4667_v38, 128.0 }
 0x70b   : > { %890 = vmin.xlane.f32.xlu1 %v878_v55  ;;  %888 = vmin.xlane.f32.xlu0 %v877_v56 }
 0x70c   : > { %v863_v57 = vpop.xlane.xlu1 %862  ;;  %v861_v58 = vpop.xlane.xlu0 %860 }
 0x70d   : > { %vm872_vm6 = vcmp.eq.f32.partialorder %v4879_v41, %v863_v57  ;;  %vm871_vm7 = vcmp.eq.f32.partialorder %v4882_v42, %v861_v58 }
 0x70e   : > { %v880_v59 = vsel %vm872_vm6, %v4667_v38, 128.0  ;;  %v879_v60 = vsel %vm871_vm7, %v4667_v38, 128.0 }
 0x70f   : > { %894 = vmin.xlane.f32.xlu1 %v880_v59  ;;  %892 = vmin.xlane.f32.xlu0 %v879_v60 }
 0x710   : > { %v865_v61 = vpop.xlane.xlu0 %864 }
 0x711   : > { %vm873_vm8 = vcmp.eq.f32.partialorder %v4888_v45, %v865_v61 }
 0x712   : > { %v881_v62 = vsel %vm873_vm8, %v4667_v38, 128.0 }
 0x713   : > { %896 = vmin.xlane.f32.xlu0 %v881_v62 }
 0x78f   : > { %v885_v63 = vpop.xlane.xlu0 %884 }
 0x790   : > { %vm899_vm9 = vcmp.eq.f32.partialorder %v4667_v38, %v885_v63  ;;  %v883_v0 = vpop.xlane.xlu1 %882 }
 0x791   : > { %vm898_vm10 = vcmp.eq.f32.partialorder %v4667_v38, %v883_v0  ;;  %v4910_v1 = vsel %vm899_vm9, 1e+30, %v4854_v30 }
 0x792   : > { %916 = vmin.xlane.f32.xlu0 %v4910_v1  ;;  %v4914_v2 = vsel %vm898_vm10, 1e+30, %v4858_v31 }
 0x793   : > { %914 = vmin.xlane.f32.xlu1 %v4914_v2 }
 0x794   : > { %v887_v3 = vpop.xlane.xlu1 %886 }
 0x795   : > { %vm900_vm11 = vcmp.eq.f32.partialorder %v4667_v38, %v887_v3 }
 0x796   : > { %v4919_v4 = vsel %vm900_vm11, 1e+30, %v4863_v33 }
 0x797   : > { %918 = vmin.xlane.f32.xlu1 %v4919_v4 }
 0x798   : > { %v891_v5 = vpop.xlane.xlu1 %890  ;;  %v889_v6 = vpop.xlane.xlu0 %888 }
 0x799   : > { %vm902_vm12 = vcmp.eq.f32.partialorder %v4667_v38, %v891_v5  ;;  %vm901_vm13 = vcmp.eq.f32.partialorder %v4667_v38, %v889_v6 }
 0x79a   : > { %v4925_v7 = vsel %vm902_vm12, 1e+30, %v4869_v36  ;;  %v4928_v8 = vsel %vm901_vm13, 1e+30, %v4872_v37 }
 0x79b   : > { %922 = vmin.xlane.f32.xlu1 %v4925_v7  ;;  %920 = vmin.xlane.f32.xlu0 %v4928_v8 }
 0x79c   : > { %v895_v9 = vpop.xlane.xlu1 %894  ;;  %v893_v10 = vpop.xlane.xlu0 %892 }
 0x79d   : > { %vm904_vm14 = vcmp.eq.f32.partialorder %v4667_v38, %v895_v9  ;;  %vm903_vm15 = vcmp.eq.f32.partialorder %v4667_v38, %v893_v10 }
 0x79e   : > { %v4935_v11 = vsel %vm904_vm14, 1e+30, %v4879_v41  ;;  %v4938_v12 = vsel %vm903_vm15, 1e+30, %v4882_v42 }
 0x79f   : > { %926 = vmin.xlane.f32.xlu1 %v4935_v11  ;;  %924 = vmin.xlane.f32.xlu0 %v4938_v12 }
 0x7a0   : > { %v897_v13 = vpop.xlane.xlu0 %896 }
 0x7a1   : > { %vm905_vm0 = vcmp.eq.f32.partialorder %v4667_v38, %v897_v13 }
 0x7a2   : > { %v4944_v14 = vsel %vm905_vm0, 1e+30, %v4888_v45 }
 0x7a3   : > { %928 = vmin.xlane.f32.xlu0 %v4944_v14 }
 0x81f   : > { %v917_v15 = vpop.xlane.xlu0 %916 }
 0x820   : > { %vm931_vm1 = vcmp.eq.f32.partialorder %v4910_v1, %v917_v15  ;;  %v915_v16 = vpop.xlane.xlu1 %914 }
 0x821   : > { %v939_v17 = vsel %vm931_vm1, %v4667_v38, 128.0  ;;  %vm930_vm2 = vcmp.eq.f32.partialorder %v4914_v2, %v915_v16 }
 0x822   : > { %948 = vmin.xlane.f32.xlu0 %v939_v17  ;;  %v938_v18 = vsel %vm930_vm2, %v4667_v38, 128.0 }
 0x823   : > { %946 = vmin.xlane.f32.xlu1 %v938_v18 }
 0x824   : > { %v919_v19 = vpop.xlane.xlu1 %918 }
 0x825   : > { %vm932_vm3 = vcmp.eq.f32.partialorder %v4919_v4, %v919_v19 }
 0x826   : > { %v940_v20 = vsel %vm932_vm3, %v4667_v38, 128.0 }
 0x827   : > { %950 = vmin.xlane.f32.xlu1 %v940_v20 }
 0x828   : > { %v923_v21 = vpop.xlane.xlu1 %922  ;;  %v921_v22 = vpop.xlane.xlu0 %920 }
 0x829   : > { %vm934_vm4 = vcmp.eq.f32.partialorder %v4925_v7, %v923_v21  ;;  %vm933_vm5 = vcmp.eq.f32.partialorder %v4928_v8, %v921_v22 }
 0x82a   : > { %v942_v23 = vsel %vm934_vm4, %v4667_v38, 128.0  ;;  %v941_v24 = vsel %vm933_vm5, %v4667_v38, 128.0 }
 0x82b   : > { %954 = vmin.xlane.f32.xlu1 %v942_v23  ;;  %952 = vmin.xlane.f32.xlu0 %v941_v24 }
 0x82c   : > { %v927_v25 = vpop.xlane.xlu1 %926  ;;  %v925_v26 = vpop.xlane.xlu0 %924 }
 0x82d   : > { %vm936_vm6 = vcmp.eq.f32.partialorder %v4935_v11, %v927_v25  ;;  %vm935_vm7 = vcmp.eq.f32.partialorder %v4938_v12, %v925_v26 }
 0x82e   : > { %v944_v27 = vsel %vm936_vm6, %v4667_v38, 128.0  ;;  %v943_v28 = vsel %vm935_vm7, %v4667_v38, 128.0 }
 0x82f   : > { %958 = vmin.xlane.f32.xlu1 %v944_v27  ;;  %956 = vmin.xlane.f32.xlu0 %v943_v28 }
 0x830   : > { %v929_v29 = vpop.xlane.xlu0 %928 }
 0x831   : > { %vm937_vm8 = vcmp.eq.f32.partialorder %v4944_v14, %v929_v29 }
 0x832   : > { %v945_v30 = vsel %vm937_vm8, %v4667_v38, 128.0 }
 0x833   : > { %960 = vmin.xlane.f32.xlu0 %v945_v30 }
 0x8af   : > { %v949_v31 = vpop.xlane.xlu0 %948 }
 0x8b0   : > { %vm963_vm9 = vcmp.eq.f32.partialorder %v4667_v38, %v949_v31  ;;  %v947_v32 = vpop.xlane.xlu1 %946 }
 0x8b1   : > { %vm962_vm10 = vcmp.eq.f32.partialorder %v4667_v38, %v947_v32  ;;  %v4966_v33 = vsel %vm963_vm9, 1e+30, %v4910_v1 }
 0x8b2   : > { %980 = vmin.xlane.f32.xlu0 %v4966_v33  ;;  %v4970_v34 = vsel %vm962_vm10, 1e+30, %v4914_v2 }
 0x8b3   : > { %978 = vmin.xlane.f32.xlu1 %v4970_v34 }
 0x8b4   : > { %v951_v35 = vpop.xlane.xlu1 %950 }
 0x8b5   : > { %vm964_vm11 = vcmp.eq.f32.partialorder %v4667_v38, %v951_v35 }
 0x8b6   : > { %v4975_v36 = vsel %vm964_vm11, 1e+30, %v4919_v4 }
 0x8b7   : > { %982 = vmin.xlane.f32.xlu1 %v4975_v36 }
 0x8b8   : > { %v955_v37 = vpop.xlane.xlu1 %954  ;;  %v953_v39 = vpop.xlane.xlu0 %952 }
 0x8b9   : > { %vm966_vm12 = vcmp.eq.f32.partialorder %v4667_v38, %v955_v37  ;;  %vm965_vm13 = vcmp.eq.f32.partialorder %v4667_v38, %v953_v39 }
 0x8ba   : > { %v4981_v40 = vsel %vm966_vm12, 1e+30, %v4925_v7  ;;  %v4984_v41 = vsel %vm965_vm13, 1e+30, %v4928_v8 }
 0x8bb   : > { %986 = vmin.xlane.f32.xlu1 %v4981_v40  ;;  %984 = vmin.xlane.f32.xlu0 %v4984_v41 }
 0x8bc   : > { %v959_v42 = vpop.xlane.xlu1 %958  ;;  %v957_v43 = vpop.xlane.xlu0 %956 }
 0x8bd   : > { %vm968_vm14 = vcmp.eq.f32.partialorder %v4667_v38, %v959_v42  ;;  %vm967_vm15 = vcmp.eq.f32.partialorder %v4667_v38, %v957_v43 }
 0x8be   : > { %v4991_v45 = vsel %vm968_vm14, 1e+30, %v4935_v11  ;;  %v4994_v46 = vsel %vm967_vm15, 1e+30, %v4938_v12 }
 0x8bf   : > { %990 = vmin.xlane.f32.xlu1 %v4991_v45  ;;  %988 = vmin.xlane.f32.xlu0 %v4994_v46 }
 0x8c0   : > { %v961_v47 = vpop.xlane.xlu0 %960 }
 0x8c1   : > { %vm969_vm0 = vcmp.eq.f32.partialorder %v4667_v38, %v961_v47 }
 0x8c2   : > { %v5000_v48 = vsel %vm969_vm0, 1e+30, %v4944_v14 }
 0x8c3   : > { %992 = vmin.xlane.f32.xlu0 %v5000_v48 }
 0x93f   : > { %v981_v49 = vpop.xlane.xlu0 %980 }
 0x940   : > { %vm995_vm1 = vcmp.eq.f32.partialorder %v4966_v33, %v981_v49  ;;  %v979_v50 = vpop.xlane.xlu1 %978 }
 0x941   : > { %vm994_vm2 = vcmp.eq.f32.partialorder %v4970_v34, %v979_v50  ;;  %v1003_v51 = vsel %vm995_vm1, %v4667_v38, 128.0 }
 0x942   : > { %1012 = vmin.xlane.f32.xlu0 %v1003_v51  ;;  %v1002_v52 = vsel %vm994_vm2, %v4667_v38, 128.0 }
 0x943   : > { %1010 = vmin.xlane.f32.xlu1 %v1002_v52 }
 0x944   : > { %v983_v54 = vpop.xlane.xlu1 %982 }
 0x945   : > { %vm996_vm3 = vcmp.eq.f32.partialorder %v4975_v36, %v983_v54 }
 0x946   : > { %v1004_v55 = vsel %vm996_vm3, %v4667_v38, 128.0 }
 0x947   : > { %1014 = vmin.xlane.f32.xlu1 %v1004_v55 }
 0x948   : > { %v987_v56 = vpop.xlane.xlu1 %986  ;;  %v985_v57 = vpop.xlane.xlu0 %984 }
 0x949   : > { %vm998_vm4 = vcmp.eq.f32.partialorder %v4981_v40, %v987_v56  ;;  %vm997_vm5 = vcmp.eq.f32.partialorder %v4984_v41, %v985_v57 }
 0x94a   : > { %v1006_v58 = vsel %vm998_vm4, %v4667_v38, 128.0  ;;  %v1005_v59 = vsel %vm997_vm5, %v4667_v38, 128.0 }
 0x94b   : > { %1018 = vmin.xlane.f32.xlu1 %v1006_v58  ;;  %1016 = vmin.xlane.f32.xlu0 %v1005_v59 }
 0x94c   : > { %v991_v60 = vpop.xlane.xlu1 %990  ;;  %v989_v61 = vpop.xlane.xlu0 %988 }
 0x94d   : > { %vm1000_vm6 = vcmp.eq.f32.partialorder %v4991_v45, %v991_v60  ;;  %vm999_vm7 = vcmp.eq.f32.partialorder %v4994_v46, %v989_v61 }
 0x94e   : > { %v1008_v62 = vsel %vm1000_vm6, %v4667_v38, 128.0  ;;  %v1007_v63 = vsel %vm999_vm7, %v4667_v38, 128.0 }
 0x94f   : > { %1022 = vmin.xlane.f32.xlu1 %v1008_v62  ;;  %1020 = vmin.xlane.f32.xlu0 %v1007_v63 }
 0x950   : > { %v993_v0 = vpop.xlane.xlu0 %992 }
 0x951   : > { %vm1001_vm8 = vcmp.eq.f32.partialorder %v5000_v48, %v993_v0 }
 0x952   : > { %v1009_v1 = vsel %vm1001_vm8, %v4667_v38, 128.0 }
 0x953   : > { %1024 = vmin.xlane.f32.xlu0 %v1009_v1 }
 0x9cf   : > { %v1013_v2 = vpop.xlane.xlu0 %1012 }
 0x9d0   : > { %vm1027_vm9 = vcmp.eq.f32.partialorder %v4667_v38, %v1013_v2  ;;  %v1011_v3 = vpop.xlane.xlu1 %1010 }
 0x9d1   : > { %vm1026_vm10 = vcmp.eq.f32.partialorder %v4667_v38, %v1011_v3  ;;  %v5022_v4 = vsel %vm1027_vm9, 1e+30, %v4966_v33 }
 0x9d2   : > { %1044 = vmin.xlane.f32.xlu0 %v5022_v4  ;;  %v5026_v5 = vsel %vm1026_vm10, 1e+30, %v4970_v34 }
 0x9d3   : > { %1042 = vmin.xlane.f32.xlu1 %v5026_v5 }
 0x9d4   : > { %v1015_v6 = vpop.xlane.xlu1 %1014 }
 0x9d5   : > { %vm1028_vm11 = vcmp.eq.f32.partialorder %v4667_v38, %v1015_v6 }
 0x9d6   : > { %v5031_v7 = vsel %vm1028_vm11, 1e+30, %v4975_v36 }
 0x9d7   : > { %1046 = vmin.xlane.f32.xlu1 %v5031_v7 }
 0x9d8   : > { %v1019_v8 = vpop.xlane.xlu1 %1018  ;;  %v1017_v9 = vpop.xlane.xlu0 %1016 }
 0x9d9   : > { %vm1030_vm12 = vcmp.eq.f32.partialorder %v4667_v38, %v1019_v8  ;;  %vm1029_vm13 = vcmp.eq.f32.partialorder %v4667_v38, %v1017_v9 }
 0x9da   : > { %v5037_v10 = vsel %vm1030_vm12, 1e+30, %v4981_v40  ;;  %v5040_v11 = vsel %vm1029_vm13, 1e+30, %v4984_v41 }
 0x9db   : > { %1050 = vmin.xlane.f32.xlu1 %v5037_v10  ;;  %1048 = vmin.xlane.f32.xlu0 %v5040_v11 }
 0x9dc   : > { %v1023_v12 = vpop.xlane.xlu1 %1022  ;;  %v1021_v13 = vpop.xlane.xlu0 %1020 }
 0x9dd   : > { %vm1032_vm14 = vcmp.eq.f32.partialorder %v4667_v38, %v1023_v12  ;;  %vm1031_vm15 = vcmp.eq.f32.partialorder %v4667_v38, %v1021_v13 }
 0x9de   : > { %v5047_v14 = vsel %vm1032_vm14, 1e+30, %v4991_v45  ;;  %v5050_v15 = vsel %vm1031_vm15, 1e+30, %v4994_v46 }
 0x9df   : > { %1054 = vmin.xlane.f32.xlu1 %v5047_v14  ;;  %1052 = vmin.xlane.f32.xlu0 %v5050_v15 }
 0x9e0   : > { %v1025_v16 = vpop.xlane.xlu0 %1024 }
 0x9e1   : > { %vm1033_vm0 = vcmp.eq.f32.partialorder %v4667_v38, %v1025_v16 }
 0x9e2   : > { %v5056_v17 = vsel %vm1033_vm0, 1e+30, %v5000_v48 }
 0x9e3   : > { %1056 = vmin.xlane.f32.xlu0 %v5056_v17 }
 0xa5f   : > { %v1045_v18 = vpop.xlane.xlu0 %1044 }
 0xa60   : > { %vm1059_vm1 = vcmp.eq.f32.partialorder %v5022_v4, %v1045_v18  ;;  %v1043_v19 = vpop.xlane.xlu1 %1042 }
 0xa61   : > { %vm1058_vm2 = vcmp.eq.f32.partialorder %v5026_v5, %v1043_v19  ;;  %v1067_v20 = vsel %vm1059_vm1, %v4667_v38, 128.0 }
 0xa62   : > { %1076 = vmin.xlane.f32.xlu0 %v1067_v20  ;;  %v1066_v21 = vsel %vm1058_vm2, %v4667_v38, 128.0 }
 0xa63   : > { %1074 = vmin.xlane.f32.xlu1 %v1066_v21 }
 0xa64   : > { %v1047_v22 = vpop.xlane.xlu1 %1046 }
 0xa65   : > { %vm1060_vm3 = vcmp.eq.f32.partialorder %v5031_v7, %v1047_v22 }
 0xa66   : > { %v1068_v23 = vsel %vm1060_vm3, %v4667_v38, 128.0 }
 0xa67   : > { %1078 = vmin.xlane.f32.xlu1 %v1068_v23 }
 0xa68   : > { %v1051_v24 = vpop.xlane.xlu1 %1050  ;;  %v1049_v25 = vpop.xlane.xlu0 %1048 }
 0xa69   : > { %vm1062_vm4 = vcmp.eq.f32.partialorder %v5037_v10, %v1051_v24  ;;  %vm1061_vm5 = vcmp.eq.f32.partialorder %v5040_v11, %v1049_v25 }
 0xa6a   : > { %v1070_v26 = vsel %vm1062_vm4, %v4667_v38, 128.0  ;;  %v1069_v27 = vsel %vm1061_vm5, %v4667_v38, 128.0 }
 0xa6b   : > { %1082 = vmin.xlane.f32.xlu1 %v1070_v26  ;;  %1080 = vmin.xlane.f32.xlu0 %v1069_v27 }
 0xa6c   : > { %v1055_v28 = vpop.xlane.xlu1 %1054  ;;  %v1053_v29 = vpop.xlane.xlu0 %1052 }
 0xa6d   : > { %vm1064_vm6 = vcmp.eq.f32.partialorder %v5047_v14, %v1055_v28  ;;  %vm1063_vm7 = vcmp.eq.f32.partialorder %v5050_v15, %v1053_v29 }
 0xa6e   : > { %v1072_v30 = vsel %vm1064_vm6, %v4667_v38, 128.0  ;;  %v1071_v31 = vsel %vm1063_vm7, %v4667_v38, 128.0 }
 0xa6f   : > { %1086 = vmin.xlane.f32.xlu1 %v1072_v30  ;;  %1084 = vmin.xlane.f32.xlu0 %v1071_v31 }
 0xa70   : > { %v1057_v32 = vpop.xlane.xlu0 %1056 }
 0xa71   : > { %vm1065_vm8 = vcmp.eq.f32.partialorder %v5056_v17, %v1057_v32 }
 0xa72   : > { %v1073_v33 = vsel %vm1065_vm8, %v4667_v38, 128.0 }
 0xa73   : > { %1088 = vmin.xlane.f32.xlu0 %v1073_v33 }
 0xaef   : > { %v1077_v34 = vpop.xlane.xlu0 %1076 }
 0xaf0   : > { %vm1091_vm9 = vcmp.eq.f32.partialorder %v4667_v38, %v1077_v34  ;;  %v1075_v35 = vpop.xlane.xlu1 %1074 }
 0xaf1   : > { %vm1090_vm10 = vcmp.eq.f32.partialorder %v4667_v38, %v1075_v35  ;;  %v5078_v36 = vsel %vm1091_vm9, 1e+30, %v5022_v4 }
 0xaf2   : > { %1108 = vmin.xlane.f32.xlu0 %v5078_v36  ;;  %v5082_v37 = vsel %vm1090_vm10, 1e+30, %v5026_v5 }
 0xaf3   : > { %1106 = vmin.xlane.f32.xlu1 %v5082_v37 }
 0xaf4   : > { %v1079_v39 = vpop.xlane.xlu1 %1078 }
 0xaf5   : > { %vm1092_vm11 = vcmp.eq.f32.partialorder %v4667_v38, %v1079_v39 }
 0xaf6   : > { %v5087_v40 = vsel %vm1092_vm11, 1e+30, %v5031_v7 }
 0xaf7   : > { %1110 = vmin.xlane.f32.xlu1 %v5087_v40 }
 0xaf8   : > { %v1083_v41 = vpop.xlane.xlu1 %1082  ;;  %v1081_v42 = vpop.xlane.xlu0 %1080 }
 0xaf9   : > { %vm1094_vm12 = vcmp.eq.f32.partialorder %v4667_v38, %v1083_v41  ;;  %vm1093_vm13 = vcmp.eq.f32.partialorder %v4667_v38, %v1081_v42 }
 0xafa   : > { %v5093_v43 = vsel %vm1094_vm12, 1e+30, %v5037_v10  ;;  %v5096_v45 = vsel %vm1093_vm13, 1e+30, %v5040_v11 }
 0xafb   : > { %1114 = vmin.xlane.f32.xlu1 %v5093_v43  ;;  %1112 = vmin.xlane.f32.xlu0 %v5096_v45 }
 0xafc   : > { %v1087_v46 = vpop.xlane.xlu1 %1086  ;;  %v1085_v47 = vpop.xlane.xlu0 %1084 }
 0xafd   : > { %vm1096_vm14 = vcmp.eq.f32.partialorder %v4667_v38, %v1087_v46  ;;  %vm1095_vm15 = vcmp.eq.f32.partialorder %v4667_v38, %v1085_v47 }
 0xafe   : > { %v5103_v48 = vsel %vm1096_vm14, 1e+30, %v5047_v14  ;;  %v5106_v49 = vsel %vm1095_vm15, 1e+30, %v5050_v15 }
 0xaff   : > { %1118 = vmin.xlane.f32.xlu1 %v5103_v48  ;;  %1116 = vmin.xlane.f32.xlu0 %v5106_v49 }
 0xb00   : > { %v1089_v50 = vpop.xlane.xlu0 %1088 }
 0xb01   : > { %vm1097_vm0 = vcmp.eq.f32.partialorder %v4667_v38, %v1089_v50 }
 0xb02   : > { %v5112_v51 = vsel %vm1097_vm0, 1e+30, %v5056_v17 }
 0xb03   : > { %1120 = vmin.xlane.f32.xlu0 %v5112_v51 }
 0xb7f   : > { %v1109_v52 = vpop.xlane.xlu0 %1108 }
 0xb80   : > { %vm1123_vm1 = vcmp.eq.f32.partialorder %v5078_v36, %v1109_v52  ;;  %v1107_v54 = vpop.xlane.xlu1 %1106 }
 0xb81   : > { %vm1122_vm2 = vcmp.eq.f32.partialorder %v5082_v37, %v1107_v54  ;;  %v1131_v55 = vsel %vm1123_vm1, %v4667_v38, 128.0 }
 0xb82   : > { %1140 = vmin.xlane.f32.xlu0 %v1131_v55  ;;  %v1130_v56 = vsel %vm1122_vm2, %v4667_v38, 128.0 }
 0xb83   : > { %1138 = vmin.xlane.f32.xlu1 %v1130_v56 }
 0xb84   : > { %v1111_v57 = vpop.xlane.xlu1 %1110 }
 0xb85   : > { %vm1124_vm3 = vcmp.eq.f32.partialorder %v5087_v40, %v1111_v57 }
 0xb86   : > { %v1132_v58 = vsel %vm1124_vm3, %v4667_v38, 128.0 }
 0xb87   : > { %1142 = vmin.xlane.f32.xlu1 %v1132_v58 }
 0xb88   : > { %v1115_v59 = vpop.xlane.xlu1 %1114  ;;  %v1113_v60 = vpop.xlane.xlu0 %1112 }
 0xb89   : > { %vm1126_vm4 = vcmp.eq.f32.partialorder %v5093_v43, %v1115_v59  ;;  %vm1125_vm5 = vcmp.eq.f32.partialorder %v5096_v45, %v1113_v60 }
 0xb8a   : > { %v1134_v61 = vsel %vm1126_vm4, %v4667_v38, 128.0  ;;  %v1133_v62 = vsel %vm1125_vm5, %v4667_v38, 128.0 }
 0xb8b   : > { %1146 = vmin.xlane.f32.xlu1 %v1134_v61  ;;  %1144 = vmin.xlane.f32.xlu0 %v1133_v62 }
 0xb8c   : > { %v1119_v63 = vpop.xlane.xlu1 %1118  ;;  %v1117_v0 = vpop.xlane.xlu0 %1116 }
 0xb8d   : > { %vm1128_vm6 = vcmp.eq.f32.partialorder %v5103_v48, %v1119_v63  ;;  %vm1127_vm7 = vcmp.eq.f32.partialorder %v5106_v49, %v1117_v0 }
 0xb8e   : > { %v1136_v1 = vsel %vm1128_vm6, %v4667_v38, 128.0  ;;  %v1135_v2 = vsel %vm1127_vm7, %v4667_v38, 128.0 }
 0xb8f   : > { %1150 = vmin.xlane.f32.xlu1 %v1136_v1  ;;  %1148 = vmin.xlane.f32.xlu0 %v1135_v2 }
 0xb90   : > { %v1121_v3 = vpop.xlane.xlu0 %1120 }
 0xb91   : > { %vm1129_vm8 = vcmp.eq.f32.partialorder %v5112_v51, %v1121_v3 }
 0xb92   : > { %v1137_v4 = vsel %vm1129_vm8, %v4667_v38, 128.0 }
 0xb93   : > { %1152 = vmin.xlane.f32.xlu0 %v1137_v4 }
 0xc0f   : > { %v1141_v5 = vpop.xlane.xlu0 %1140 }
 0xc10   : > { %vm1155_vm9 = vcmp.eq.f32.partialorder %v4667_v38, %v1141_v5  ;;  %v1139_v6 = vpop.xlane.xlu1 %1138 }
 0xc11   : > { %vm1154_vm10 = vcmp.eq.f32.partialorder %v4667_v38, %v1139_v6  ;;  %v5134_v7 = vsel %vm1155_vm9, 1e+30, %v5078_v36 }
 0xc12   : > { %1172 = vmin.xlane.f32.xlu0 %v5134_v7  ;;  %v5138_v8 = vsel %vm1154_vm10, 1e+30, %v5082_v37 }
 0xc13   : > { %1170 = vmin.xlane.f32.xlu1 %v5138_v8 }
 0xc14   : > { %v1143_v9 = vpop.xlane.xlu1 %1142 }
 0xc15   : > { %vm1156_vm11 = vcmp.eq.f32.partialorder %v4667_v38, %v1143_v9 }
 0xc16   : > { %v5143_v10 = vsel %vm1156_vm11, 1e+30, %v5087_v40 }
 0xc17   : > { %1174 = vmin.xlane.f32.xlu1 %v5143_v10 }
 0xc18   : > { %v1147_v11 = vpop.xlane.xlu1 %1146  ;;  %v1145_v12 = vpop.xlane.xlu0 %1144 }
 0xc19   : > { %vm1158_vm12 = vcmp.eq.f32.partialorder %v4667_v38, %v1147_v11  ;;  %vm1157_vm13 = vcmp.eq.f32.partialorder %v4667_v38, %v1145_v12 }
 0xc1a   : > { %v5149_v13 = vsel %vm1158_vm12, 1e+30, %v5093_v43  ;;  %v5152_v14 = vsel %vm1157_vm13, 1e+30, %v5096_v45 }
 0xc1b   : > { %1178 = vmin.xlane.f32.xlu1 %v5149_v13  ;;  %1176 = vmin.xlane.f32.xlu0 %v5152_v14 }
 0xc1c   : > { %v1151_v15 = vpop.xlane.xlu1 %1150  ;;  %v1149_v16 = vpop.xlane.xlu0 %1148 }
 0xc1d   : > { %vm1160_vm14 = vcmp.eq.f32.partialorder %v4667_v38, %v1151_v15  ;;  %vm1159_vm15 = vcmp.eq.f32.partialorder %v4667_v38, %v1149_v16 }
 0xc1e   : > { %v5159_v17 = vsel %vm1160_vm14, 1e+30, %v5103_v48  ;;  %v5162_v18 = vsel %vm1159_vm15, 1e+30, %v5106_v49 }
 0xc1f   : > { %1182 = vmin.xlane.f32.xlu1 %v5159_v17  ;;  %1180 = vmin.xlane.f32.xlu0 %v5162_v18 }
 0xc20   : > { %v1153_v19 = vpop.xlane.xlu0 %1152 }
 0xc21   : > { %vm1161_vm0 = vcmp.eq.f32.partialorder %v4667_v38, %v1153_v19 }
 0xc22   : > { %v5168_v20 = vsel %vm1161_vm0, 1e+30, %v5112_v51 }
 0xc23   : > { %1184 = vmin.xlane.f32.xlu0 %v5168_v20 }
 0xc9f   : > { %v1173_v21 = vpop.xlane.xlu0 %1172 }
 0xca0   : > { %vm1187_vm1 = vcmp.eq.f32.partialorder %v5134_v7, %v1173_v21  ;;  %v1171_v22 = vpop.xlane.xlu1 %1170 }
 0xca1   : > { %vm1186_vm2 = vcmp.eq.f32.partialorder %v5138_v8, %v1171_v22  ;;  %v1195_v23 = vsel %vm1187_vm1, %v4667_v38, 128.0 }
 0xca2   : > { %1204 = vmin.xlane.f32.xlu0 %v1195_v23  ;;  %v1194_v24 = vsel %vm1186_vm2, %v4667_v38, 128.0 }
 0xca3   : > { %1202 = vmin.xlane.f32.xlu1 %v1194_v24 }
 0xca4   : > { %v1175_v25 = vpop.xlane.xlu1 %1174 }
 0xca5   : > { %vm1188_vm3 = vcmp.eq.f32.partialorder %v5143_v10, %v1175_v25 }
 0xca6   : > { %v1196_v26 = vsel %vm1188_vm3, %v4667_v38, 128.0 }
 0xca7   : > { %1206 = vmin.xlane.f32.xlu1 %v1196_v26 }
 0xca8   : > { %v1179_v27 = vpop.xlane.xlu1 %1178  ;;  %v1177_v28 = vpop.xlane.xlu0 %1176 }
 0xca9   : > { %vm1190_vm4 = vcmp.eq.f32.partialorder %v5149_v13, %v1179_v27  ;;  %vm1189_vm5 = vcmp.eq.f32.partialorder %v5152_v14, %v1177_v28 }
 0xcaa   : > { %v1198_v29 = vsel %vm1190_vm4, %v4667_v38, 128.0  ;;  %v1197_v30 = vsel %vm1189_vm5, %v4667_v38, 128.0 }
 0xcab   : > { %1210 = vmin.xlane.f32.xlu1 %v1198_v29  ;;  %1208 = vmin.xlane.f32.xlu0 %v1197_v30 }
 0xcac   : > { %v1183_v31 = vpop.xlane.xlu1 %1182  ;;  %v1181_v32 = vpop.xlane.xlu0 %1180 }
 0xcad   : > { %vm1192_vm6 = vcmp.eq.f32.partialorder %v5159_v17, %v1183_v31  ;;  %vm1191_vm7 = vcmp.eq.f32.partialorder %v5162_v18, %v1181_v32 }
 0xcae   : > { %v1200_v33 = vsel %vm1192_vm6, %v4667_v38, 128.0  ;;  %v1199_v34 = vsel %vm1191_vm7, %v4667_v38, 128.0 }
 0xcaf   : > { %1214 = vmin.xlane.f32.xlu1 %v1200_v33  ;;  %1212 = vmin.xlane.f32.xlu0 %v1199_v34 }
 0xcb0   : > { %v1185_v35 = vpop.xlane.xlu0 %1184 }
 0xcb1   : > { %vm1193_vm8 = vcmp.eq.f32.partialorder %v5168_v20, %v1185_v35 }
 0xcb2   : > { %v1201_v36 = vsel %vm1193_vm8, %v4667_v38, 128.0 }
 0xcb3   : > { %1216 = vmin.xlane.f32.xlu0 %v1201_v36 }
 0xd2f   : > { %v1205_v37 = vpop.xlane.xlu0 %1204 }
 0xd30   : > { %vm1219_vm9 = vcmp.eq.f32.partialorder %v4667_v38, %v1205_v37  ;;  %v1203_v39 = vpop.xlane.xlu1 %1202 }
 0xd31   : > { %vm1218_vm10 = vcmp.eq.f32.partialorder %v4667_v38, %v1203_v39  ;;  %v5190_v40 = vsel %vm1219_vm9, 1e+30, %v5134_v7 }
 0xd32   : > { %1236 = vmin.xlane.f32.xlu0 %v5190_v40  ;;  %v5194_v41 = vsel %vm1218_vm10, 1e+30, %v5138_v8 }
 0xd33   : > { %1234 = vmin.xlane.f32.xlu1 %v5194_v41 }
 0xd34   : > { %v1207_v42 = vpop.xlane.xlu1 %1206 }
 0xd35   : > { %vm1220_vm11 = vcmp.eq.f32.partialorder %v4667_v38, %v1207_v42 }
 0xd36   : > { %v5199_v43 = vsel %vm1220_vm11, 1e+30, %v5143_v10 }
 0xd37   : > { %1238 = vmin.xlane.f32.xlu1 %v5199_v43 }
 0xd38   : > { %v1211_v45 = vpop.xlane.xlu1 %1210  ;;  %v1209_v46 = vpop.xlane.xlu0 %1208 }
 0xd39   : > { %vm1222_vm12 = vcmp.eq.f32.partialorder %v4667_v38, %v1211_v45  ;;  %vm1221_vm13 = vcmp.eq.f32.partialorder %v4667_v38, %v1209_v46 }
 0xd3a   : > { %v5205_v47 = vsel %vm1222_vm12, 1e+30, %v5149_v13  ;;  %v5208_v48 = vsel %vm1221_vm13, 1e+30, %v5152_v14 }
 0xd3b   : > { %1242 = vmin.xlane.f32.xlu1 %v5205_v47  ;;  %1240 = vmin.xlane.f32.xlu0 %v5208_v48 }
 0xd3c   : > { %v1215_v49 = vpop.xlane.xlu1 %1214  ;;  %v1213_v50 = vpop.xlane.xlu0 %1212 }
 0xd3d   : > { %vm1224_vm14 = vcmp.eq.f32.partialorder %v4667_v38, %v1215_v49  ;;  %vm1223_vm15 = vcmp.eq.f32.partialorder %v4667_v38, %v1213_v50 }
 0xd3e   : > { %v5215_v51 = vsel %vm1224_vm14, 1e+30, %v5159_v17  ;;  %v5218_v52 = vsel %vm1223_vm15, 1e+30, %v5162_v18 }
 0xd3f   : > { %1246 = vmin.xlane.f32.xlu1 %v5215_v51  ;;  %1244 = vmin.xlane.f32.xlu0 %v5218_v52 }
 0xd40   : > { %v1217_v54 = vpop.xlane.xlu0 %1216 }
 0xd41   : > { %vm1225_vm0 = vcmp.eq.f32.partialorder %v4667_v38, %v1217_v54 }
 0xd42   : > { %v5224_v55 = vsel %vm1225_vm0, 1e+30, %v5168_v20 }
 0xd43   : > { %1248 = vmin.xlane.f32.xlu0 %v5224_v55 }
 0xdbf   : > { %v1237_v56 = vpop.xlane.xlu0 %1236 }
 0xdc0   : > { %vm1251_vm1 = vcmp.eq.f32.partialorder %v5190_v40, %v1237_v56  ;;  %v1235_v57 = vpop.xlane.xlu1 %1234 }
 0xdc1   : > { %vm1250_vm2 = vcmp.eq.f32.partialorder %v5194_v41, %v1235_v57  ;;  %v1259_v58 = vsel %vm1251_vm1, %v4667_v38, 128.0 }
 0xdc2   : > { %1268 = vmin.xlane.f32.xlu0 %v1259_v58  ;;  %v1258_v59 = vsel %vm1250_vm2, %v4667_v38, 128.0 }
 0xdc3   : > { %1266 = vmin.xlane.f32.xlu1 %v1258_v59 }
 0xdc4   : > { %v1239_v60 = vpop.xlane.xlu1 %1238 }
 0xdc5   : > { %vm1252_vm3 = vcmp.eq.f32.partialorder %v5199_v43, %v1239_v60 }
 0xdc6   : > { %v1260_v61 = vsel %vm1252_vm3, %v4667_v38, 128.0 }
 0xdc7   : > { %1270 = vmin.xlane.f32.xlu1 %v1260_v61 }
 0xdc8   : > { %v1243_v62 = vpop.xlane.xlu1 %1242  ;;  %v1241_v63 = vpop.xlane.xlu0 %1240 }
 0xdc9   : > { %vm1254_vm4 = vcmp.eq.f32.partialorder %v5205_v47, %v1243_v62  ;;  %vm1253_vm5 = vcmp.eq.f32.partialorder %v5208_v48, %v1241_v63 }
 0xdca   : > { %v1262_v0 = vsel %vm1254_vm4, %v4667_v38, 128.0  ;;  %v1261_v1 = vsel %vm1253_vm5, %v4667_v38, 128.0 }
 0xdcb   : > { %1274 = vmin.xlane.f32.xlu1 %v1262_v0  ;;  %1272 = vmin.xlane.f32.xlu0 %v1261_v1 }
 0xdcc   : > { %v1247_v2 = vpop.xlane.xlu1 %1246  ;;  %v1245_v3 = vpop.xlane.xlu0 %1244 }
 0xdcd   : > { %vm1256_vm6 = vcmp.eq.f32.partialorder %v5215_v51, %v1247_v2  ;;  %vm1255_vm7 = vcmp.eq.f32.partialorder %v5218_v52, %v1245_v3 }
 0xdce   : > { %v1264_v4 = vsel %vm1256_vm6, %v4667_v38, 128.0  ;;  %v1263_v5 = vsel %vm1255_vm7, %v4667_v38, 128.0 }
 0xdcf   : > { %1278 = vmin.xlane.f32.xlu1 %v1264_v4  ;;  %1276 = vmin.xlane.f32.xlu0 %v1263_v5 }
 0xdd0   : > { %v1249_v6 = vpop.xlane.xlu0 %1248 }
 0xdd1   : > { %vm1257_vm8 = vcmp.eq.f32.partialorder %v5224_v55, %v1249_v6 }
 0xdd2   : > { %v1265_v7 = vsel %vm1257_vm8, %v4667_v38, 128.0 }
 0xdd3   : > { %1280 = vmin.xlane.f32.xlu0 %v1265_v7 }
 0xe4f   : > { %v1269_v8 = vpop.xlane.xlu0 %1268 }
 0xe50   : > { %vm1283_vm9 = vcmp.eq.f32.partialorder %v4667_v38, %v1269_v8  ;;  %v1267_v9 = vpop.xlane.xlu1 %1266 }
 0xe51   : > { %vm1282_vm10 = vcmp.eq.f32.partialorder %v4667_v38, %v1267_v9  ;;  %v5246_v10 = vsel %vm1283_vm9, 1e+30, %v5190_v40 }
 0xe52   : > { %1300 = vmin.xlane.f32.xlu0 %v5246_v10  ;;  %v5250_v11 = vsel %vm1282_vm10, 1e+30, %v5194_v41 }
 0xe53   : > { %1298 = vmin.xlane.f32.xlu1 %v5250_v11 }
 0xe54   : > { %v1271_v12 = vpop.xlane.xlu1 %1270 }
 0xe55   : > { %vm1284_vm11 = vcmp.eq.f32.partialorder %v4667_v38, %v1271_v12 }
 0xe56   : > { %v5255_v13 = vsel %vm1284_vm11, 1e+30, %v5199_v43 }
 0xe57   : > { %1302 = vmin.xlane.f32.xlu1 %v5255_v13 }
 0xe58   : > { %v1275_v14 = vpop.xlane.xlu1 %1274  ;;  %v1273_v15 = vpop.xlane.xlu0 %1272 }
 0xe59   : > { %vm1286_vm12 = vcmp.eq.f32.partialorder %v4667_v38, %v1275_v14  ;;  %vm1285_vm13 = vcmp.eq.f32.partialorder %v4667_v38, %v1273_v15 }
 0xe5a   : > { %v5261_v16 = vsel %vm1286_vm12, 1e+30, %v5205_v47  ;;  %v5264_v17 = vsel %vm1285_vm13, 1e+30, %v5208_v48 }
 0xe5b   : > { %1306 = vmin.xlane.f32.xlu1 %v5261_v16  ;;  %1304 = vmin.xlane.f32.xlu0 %v5264_v17 }
 0xe5c   : > { %v1279_v18 = vpop.xlane.xlu1 %1278  ;;  %v1277_v19 = vpop.xlane.xlu0 %1276 }
 0xe5d   : > { %vm1288_vm14 = vcmp.eq.f32.partialorder %v4667_v38, %v1279_v18  ;;  %vm1287_vm15 = vcmp.eq.f32.partialorder %v4667_v38, %v1277_v19 }
 0xe5e   : > { %v5271_v20 = vsel %vm1288_vm14, 1e+30, %v5215_v51  ;;  %v5274_v21 = vsel %vm1287_vm15, 1e+30, %v5218_v52 }
 0xe5f   : > { %1310 = vmin.xlane.f32.xlu1 %v5271_v20  ;;  %1308 = vmin.xlane.f32.xlu0 %v5274_v21 }
 0xe60   : > { %v1281_v22 = vpop.xlane.xlu0 %1280 }
 0xe61   : > { %vm1289_vm0 = vcmp.eq.f32.partialorder %v4667_v38, %v1281_v22 }
 0xe62   : > { %v5280_v23 = vsel %vm1289_vm0, 1e+30, %v5224_v55 }
 0xe63   : > { %1312 = vmin.xlane.f32.xlu0 %v5280_v23 }
 0xedf   : > { %v1301_v24 = vpop.xlane.xlu0 %1300 }
 0xee0   : > { %vm1315_vm1 = vcmp.eq.f32.partialorder %v5246_v10, %v1301_v24  ;;  %v1299_v25 = vpop.xlane.xlu1 %1298 }
 0xee1   : > { %vm1314_vm2 = vcmp.eq.f32.partialorder %v5250_v11, %v1299_v25  ;;  %v1323_v26 = vsel %vm1315_vm1, %v4667_v38, 128.0 }
 0xee2   : > { %1332 = vmin.xlane.f32.xlu0 %v1323_v26  ;;  %v1322_v27 = vsel %vm1314_vm2, %v4667_v38, 128.0 }
 0xee3   : > { %1330 = vmin.xlane.f32.xlu1 %v1322_v27 }
 0xee4   : > { %v1303_v28 = vpop.xlane.xlu1 %1302 }
 0xee5   : > { %vm1316_vm3 = vcmp.eq.f32.partialorder %v5255_v13, %v1303_v28 }
 0xee6   : > { %v1324_v29 = vsel %vm1316_vm3, %v4667_v38, 128.0 }
 0xee7   : > { %1334 = vmin.xlane.f32.xlu1 %v1324_v29 }
 0xee8   : > { %v1307_v30 = vpop.xlane.xlu1 %1306  ;;  %v1305_v31 = vpop.xlane.xlu0 %1304 }
 0xee9   : > { %vm1318_vm4 = vcmp.eq.f32.partialorder %v5261_v16, %v1307_v30  ;;  %vm1317_vm5 = vcmp.eq.f32.partialorder %v5264_v17, %v1305_v31 }
 0xeea   : > { %v1326_v32 = vsel %vm1318_vm4, %v4667_v38, 128.0  ;;  %v1325_v33 = vsel %vm1317_vm5, %v4667_v38, 128.0 }
 0xeeb   : > { %1338 = vmin.xlane.f32.xlu1 %v1326_v32  ;;  %1336 = vmin.xlane.f32.xlu0 %v1325_v33 }
 0xeec   : > { %v1311_v34 = vpop.xlane.xlu1 %1310  ;;  %v1309_v35 = vpop.xlane.xlu0 %1308 }
 0xeed   : > { %vm1320_vm6 = vcmp.eq.f32.partialorder %v5271_v20, %v1311_v34  ;;  %vm1319_vm7 = vcmp.eq.f32.partialorder %v5274_v21, %v1309_v35 }
 0xeee   : > { %v1328_v36 = vsel %vm1320_vm6, %v4667_v38, 128.0  ;;  %v1327_v37 = vsel %vm1319_vm7, %v4667_v38, 128.0 }
 0xeef   : > { %1342 = vmin.xlane.f32.xlu1 %v1328_v36  ;;  %1340 = vmin.xlane.f32.xlu0 %v1327_v37 }
 0xef0   : > { %v1313_v39 = vpop.xlane.xlu0 %1312 }
 0xef1   : > { %vm1321_vm8 = vcmp.eq.f32.partialorder %v5280_v23, %v1313_v39 }
 0xef2   : > { %v1329_v40 = vsel %vm1321_vm8, %v4667_v38, 128.0 }
 0xef3   : > { %1344 = vmin.xlane.f32.xlu0 %v1329_v40 }
 0xf6f   : > { %v1333_v41 = vpop.xlane.xlu0 %1332 }
 0xf70   : > { %vm1347_vm9 = vcmp.eq.f32.partialorder %v4667_v38, %v1333_v41  ;;  %v1331_v42 = vpop.xlane.xlu1 %1330 }
 0xf71   : > { %vm1346_vm10 = vcmp.eq.f32.partialorder %v4667_v38, %v1331_v42  ;;  %v5302_v43 = vsel %vm1347_vm9, 1e+30, %v5246_v10 }
 0xf72   : > { %1364 = vmin.xlane.f32.xlu0 %v5302_v43  ;;  %v5306_v45 = vsel %vm1346_vm10, 1e+30, %v5250_v11 }
 0xf73   : > { %1362 = vmin.xlane.f32.xlu1 %v5306_v45 }
 0xf74   : > { %v1335_v46 = vpop.xlane.xlu1 %1334 }
 0xf75   : > { %vm1348_vm11 = vcmp.eq.f32.partialorder %v4667_v38, %v1335_v46 }
 0xf76   : > { %v5311_v47 = vsel %vm1348_vm11, 1e+30, %v5255_v13 }
 0xf77   : > { %1366 = vmin.xlane.f32.xlu1 %v5311_v47 }
 0xf78   : > { %v1339_v48 = vpop.xlane.xlu1 %1338  ;;  %v1337_v49 = vpop.xlane.xlu0 %1336 }
 0xf79   : > { %vm1350_vm12 = vcmp.eq.f32.partialorder %v4667_v38, %v1339_v48  ;;  %vm1349_vm13 = vcmp.eq.f32.partialorder %v4667_v38, %v1337_v49 }
 0xf7a   : > { %v5317_v50 = vsel %vm1350_vm12, 1e+30, %v5261_v16  ;;  %v5320_v51 = vsel %vm1349_vm13, 1e+30, %v5264_v17 }
 0xf7b   : > { %1370 = vmin.xlane.f32.xlu1 %v5317_v50  ;;  %1368 = vmin.xlane.f32.xlu0 %v5320_v51 }
 0xf7c   : > { %v1343_v52 = vpop.xlane.xlu1 %1342  ;;  %v1341_v54 = vpop.xlane.xlu0 %1340 }
 0xf7d   : > { %vm1352_vm14 = vcmp.eq.f32.partialorder %v4667_v38, %v1343_v52  ;;  %vm1351_vm15 = vcmp.eq.f32.partialorder %v4667_v38, %v1341_v54 }
 0xf7e   : > { %v5327_v55 = vsel %vm1352_vm14, 1e+30, %v5271_v20  ;;  %v5330_v56 = vsel %vm1351_vm15, 1e+30, %v5274_v21 }
 0xf7f   : > { %1374 = vmin.xlane.f32.xlu1 %v5327_v55  ;;  %1372 = vmin.xlane.f32.xlu0 %v5330_v56 }
 0xf80   : > { %v1345_v57 = vpop.xlane.xlu0 %1344 }
 0xf81   : > { %vm1353_vm0 = vcmp.eq.f32.partialorder %v4667_v38, %v1345_v57 }
 0xf82   : > { %v5336_v58 = vsel %vm1353_vm0, 1e+30, %v5280_v23 }
 0xf83   : > { %1376 = vmin.xlane.f32.xlu0 %v5336_v58 }
 0xfff   : > { %v1365_v59 = vpop.xlane.xlu0 %1364 }
0x1000   : > { %vm1379_vm1 = vcmp.eq.f32.partialorder %v5302_v43, %v1365_v59  ;;  %v1363_v60 = vpop.xlane.xlu1 %1362 }
0x1001   : > { %vm1378_vm2 = vcmp.eq.f32.partialorder %v5306_v45, %v1363_v60  ;;  %v1387_v61 = vsel %vm1379_vm1, %v4667_v38, 128.0 }
0x1002   : > { %1396 = vmin.xlane.f32.xlu0 %v1387_v61  ;;  %v1386_v62 = vsel %vm1378_vm2, %v4667_v38, 128.0 }
0x1003   : > { %1394 = vmin.xlane.f32.xlu1 %v1386_v62 }
0x1004   : > { %v1367_v63 = vpop.xlane.xlu1 %1366 }
0x1005   : > { %vm1380_vm3 = vcmp.eq.f32.partialorder %v5311_v47, %v1367_v63 }
0x1006   : > { %v1388_v0 = vsel %vm1380_vm3, %v4667_v38, 128.0 }
0x1007   : > { %1398 = vmin.xlane.f32.xlu1 %v1388_v0 }
0x1008   : > { %v1371_v1 = vpop.xlane.xlu1 %1370  ;;  %v1369_v2 = vpop.xlane.xlu0 %1368 }
0x1009   : > { %vm1382_vm4 = vcmp.eq.f32.partialorder %v5317_v50, %v1371_v1  ;;  %vm1381_vm5 = vcmp.eq.f32.partialorder %v5320_v51, %v1369_v2 }
0x100a   : > { %v1390_v3 = vsel %vm1382_vm4, %v4667_v38, 128.0  ;;  %v1389_v4 = vsel %vm1381_vm5, %v4667_v38, 128.0 }
0x100b   : > { %1402 = vmin.xlane.f32.xlu1 %v1390_v3  ;;  %1400 = vmin.xlane.f32.xlu0 %v1389_v4 }
0x100c   : > { %v1375_v5 = vpop.xlane.xlu1 %1374  ;;  %v1373_v6 = vpop.xlane.xlu0 %1372 }
0x100d   : > { %vm1384_vm6 = vcmp.eq.f32.partialorder %v5327_v55, %v1375_v5  ;;  %vm1383_vm7 = vcmp.eq.f32.partialorder %v5330_v56, %v1373_v6 }
0x100e   : > { %v1392_v7 = vsel %vm1384_vm6, %v4667_v38, 128.0  ;;  %v1391_v8 = vsel %vm1383_vm7, %v4667_v38, 128.0 }
0x100f   : > { %1406 = vmin.xlane.f32.xlu1 %v1392_v7  ;;  %1404 = vmin.xlane.f32.xlu0 %v1391_v8 }
0x1010   : > { %v1377_v9 = vpop.xlane.xlu0 %1376 }
0x1011   : > { %vm1385_vm8 = vcmp.eq.f32.partialorder %v5336_v58, %v1377_v9 }
0x1012   : > { %v1393_v10 = vsel %vm1385_vm8, %v4667_v38, 128.0 }
0x1013   : > { %1408 = vmin.xlane.f32.xlu0 %v1393_v10 }
0x108f   : > { %v1397_v11 = vpop.xlane.xlu0 %1396 }
0x1090   : > { %vm1411_vm9 = vcmp.eq.f32.partialorder %v4667_v38, %v1397_v11  ;;  %v1395_v12 = vpop.xlane.xlu1 %1394 }
0x1091   : > { %vm1410_vm10 = vcmp.eq.f32.partialorder %v4667_v38, %v1395_v12  ;;  %v5358_v13 = vsel %vm1411_vm9, 1e+30, %v5302_v43 }
0x1092   : > { %1428 = vmin.xlane.f32.xlu0 %v5358_v13  ;;  %v5362_v14 = vsel %vm1410_vm10, 1e+30, %v5306_v45 }
0x1093   : > { %1426 = vmin.xlane.f32.xlu1 %v5362_v14 }
0x1094   : > { %v1399_v15 = vpop.xlane.xlu1 %1398 }
0x1095   : > { %vm1412_vm11 = vcmp.eq.f32.partialorder %v4667_v38, %v1399_v15 }
0x1096   : > { %v5367_v16 = vsel %vm1412_vm11, 1e+30, %v5311_v47 }
0x1097   : > { %1430 = vmin.xlane.f32.xlu1 %v5367_v16 }
0x1098   : > { %v1403_v17 = vpop.xlane.xlu1 %1402  ;;  %v1401_v18 = vpop.xlane.xlu0 %1400 }
0x1099   : > { %vm1414_vm12 = vcmp.eq.f32.partialorder %v4667_v38, %v1403_v17  ;;  %vm1413_vm13 = vcmp.eq.f32.partialorder %v4667_v38, %v1401_v18 }
0x109a   : > { %v5373_v19 = vsel %vm1414_vm12, 1e+30, %v5317_v50  ;;  %v5376_v20 = vsel %vm1413_vm13, 1e+30, %v5320_v51 }
0x109b   : > { %1434 = vmin.xlane.f32.xlu1 %v5373_v19  ;;  %1432 = vmin.xlane.f32.xlu0 %v5376_v20 }
0x109c   : > { %v1407_v21 = vpop.xlane.xlu1 %1406  ;;  %v1405_v22 = vpop.xlane.xlu0 %1404 }
0x109d   : > { %vm1416_vm14 = vcmp.eq.f32.partialorder %v4667_v38, %v1407_v21  ;;  %vm1415_vm15 = vcmp.eq.f32.partialorder %v4667_v38, %v1405_v22 }
0x109e   : > { %v5383_v23 = vsel %vm1416_vm14, 1e+30, %v5327_v55  ;;  %v5386_v24 = vsel %vm1415_vm15, 1e+30, %v5330_v56 }
0x109f   : > { %1438 = vmin.xlane.f32.xlu1 %v5383_v23  ;;  %1436 = vmin.xlane.f32.xlu0 %v5386_v24 }
0x10a0   : > { %v1409_v25 = vpop.xlane.xlu0 %1408 }
0x10a1   : > { %vm1417_vm0 = vcmp.eq.f32.partialorder %v4667_v38, %v1409_v25 }
0x10a2   : > { %v5392_v26 = vsel %vm1417_vm0, 1e+30, %v5336_v58 }
0x10a3   : > { %1440 = vmin.xlane.f32.xlu0 %v5392_v26 }
0x111f   : > { %v1429_v27 = vpop.xlane.xlu0 %1428 }
0x1120   : > { %vm1443_vm1 = vcmp.eq.f32.partialorder %v5358_v13, %v1429_v27  ;;  %v1427_v28 = vpop.xlane.xlu1 %1426 }
0x1121   : > { %vm1442_vm2 = vcmp.eq.f32.partialorder %v5362_v14, %v1427_v28  ;;  %v1451_v29 = vsel %vm1443_vm1, %v4667_v38, 128.0 }
0x1122   : > { %1460 = vmin.xlane.f32.xlu0 %v1451_v29  ;;  %v1450_v30 = vsel %vm1442_vm2, %v4667_v38, 128.0 }
0x1123   : > { %1458 = vmin.xlane.f32.xlu1 %v1450_v30 }
0x1124   : > { %v1431_v31 = vpop.xlane.xlu1 %1430 }
0x1125   : > { %vm1444_vm3 = vcmp.eq.f32.partialorder %v5367_v16, %v1431_v31 }
0x1126   : > { %v1452_v32 = vsel %vm1444_vm3, %v4667_v38, 128.0 }
0x1127   : > { %1462 = vmin.xlane.f32.xlu1 %v1452_v32 }
0x1128   : > { %v1435_v33 = vpop.xlane.xlu1 %1434  ;;  %v1433_v34 = vpop.xlane.xlu0 %1432 }
0x1129   : > { %vm1446_vm4 = vcmp.eq.f32.partialorder %v5373_v19, %v1435_v33  ;;  %vm1445_vm5 = vcmp.eq.f32.partialorder %v5376_v20, %v1433_v34 }
0x112a   : > { %v1454_v35 = vsel %vm1446_vm4, %v4667_v38, 128.0  ;;  %v1453_v36 = vsel %vm1445_vm5, %v4667_v38, 128.0 }
0x112b   : > { %1466 = vmin.xlane.f32.xlu1 %v1454_v35  ;;  %1464 = vmin.xlane.f32.xlu0 %v1453_v36 }
0x112c   : > { %v1439_v37 = vpop.xlane.xlu1 %1438  ;;  %v1437_v39 = vpop.xlane.xlu0 %1436 }
0x112d   : > { %vm1448_vm6 = vcmp.eq.f32.partialorder %v5383_v23, %v1439_v37  ;;  %vm1447_vm7 = vcmp.eq.f32.partialorder %v5386_v24, %v1437_v39 }
0x112e   : > { %v1456_v40 = vsel %vm1448_vm6, %v4667_v38, 128.0  ;;  %v1455_v41 = vsel %vm1447_vm7, %v4667_v38, 128.0 }
0x112f   : > { %1470 = vmin.xlane.f32.xlu1 %v1456_v40  ;;  %1468 = vmin.xlane.f32.xlu0 %v1455_v41 }
0x1130   : > { %v1441_v42 = vpop.xlane.xlu0 %1440 }
0x1131   : > { %vm1449_vm8 = vcmp.eq.f32.partialorder %v5392_v26, %v1441_v42 }
0x1132   : > { %v1457_v43 = vsel %vm1449_vm8, %v4667_v38, 128.0 }
0x1133   : > { %1472 = vmin.xlane.f32.xlu0 %v1457_v43 }
0x11af   : > { %v1461_v45 = vpop.xlane.xlu0 %1460 }
0x11b0   : > { %vm1475_vm9 = vcmp.eq.f32.partialorder %v4667_v38, %v1461_v45  ;;  %v1459_v46 = vpop.xlane.xlu1 %1458 }
0x11b1   : > { %vm1474_vm10 = vcmp.eq.f32.partialorder %v4667_v38, %v1459_v46  ;;  %v5414_v47 = vsel %vm1475_vm9, 1e+30, %v5358_v13 }
0x11b2   : > { %1492 = vmin.xlane.f32.xlu0 %v5414_v47  ;;  %v5418_v48 = vsel %vm1474_vm10, 1e+30, %v5362_v14 }
0x11b3   : > { %1490 = vmin.xlane.f32.xlu1 %v5418_v48 }
0x11b4   : > { %v1463_v49 = vpop.xlane.xlu1 %1462 }
0x11b5   : > { %vm1476_vm11 = vcmp.eq.f32.partialorder %v4667_v38, %v1463_v49 }
0x11b6   : > { %v5423_v50 = vsel %vm1476_vm11, 1e+30, %v5367_v16 }
0x11b7   : > { %1494 = vmin.xlane.f32.xlu1 %v5423_v50 }
0x11b8   : > { %v1467_v51 = vpop.xlane.xlu1 %1466  ;;  %v1465_v52 = vpop.xlane.xlu0 %1464 }
0x11b9   : > { %vm1478_vm12 = vcmp.eq.f32.partialorder %v4667_v38, %v1467_v51  ;;  %vm1477_vm13 = vcmp.eq.f32.partialorder %v4667_v38, %v1465_v52 }
0x11ba   : > { %v5429_v54 = vsel %vm1478_vm12, 1e+30, %v5373_v19  ;;  %v5432_v55 = vsel %vm1477_vm13, 1e+30, %v5376_v20 }
0x11bb   : > { %1498 = vmin.xlane.f32.xlu1 %v5429_v54  ;;  %1496 = vmin.xlane.f32.xlu0 %v5432_v55 }
0x11bc   : > { %v1471_v56 = vpop.xlane.xlu1 %1470  ;;  %v1469_v57 = vpop.xlane.xlu0 %1468 }
0x11bd   : > { %vm1480_vm14 = vcmp.eq.f32.partialorder %v4667_v38, %v1471_v56  ;;  %vm1479_vm15 = vcmp.eq.f32.partialorder %v4667_v38, %v1469_v57 }
0x11be   : > { %v5439_v58 = vsel %vm1480_vm14, 1e+30, %v5383_v23  ;;  %v5442_v59 = vsel %vm1479_vm15, 1e+30, %v5386_v24 }
0x11bf   : > { %1502 = vmin.xlane.f32.xlu1 %v5439_v58  ;;  %1500 = vmin.xlane.f32.xlu0 %v5442_v59 }
0x11c0   : > { %v1473_v60 = vpop.xlane.xlu0 %1472 }
0x11c1   : > { %vm1481_vm0 = vcmp.eq.f32.partialorder %v4667_v38, %v1473_v60 }
0x11c2   : > { %v5448_v61 = vsel %vm1481_vm0, 1e+30, %v5392_v26 }
0x11c3   : > { %1504 = vmin.xlane.f32.xlu0 %v5448_v61 }
0x123f   : > { %v1493_v62 = vpop.xlane.xlu0 %1492 }
0x1240   : > { %vm1507_vm1 = vcmp.eq.f32.partialorder %v5414_v47, %v1493_v62  ;;  %v1491_v63 = vpop.xlane.xlu1 %1490 }
0x1241   : > { %vm1506_vm2 = vcmp.eq.f32.partialorder %v5418_v48, %v1491_v63  ;;  %v1515_v0 = vsel %vm1507_vm1, %v4667_v38, 128.0 }
0x1242   : > { %1524 = vmin.xlane.f32.xlu0 %v1515_v0  ;;  %v1514_v1 = vsel %vm1506_vm2, %v4667_v38, 128.0 }
0x1243   : > { %1522 = vmin.xlane.f32.xlu1 %v1514_v1 }
0x1244   : > { %v1495_v2 = vpop.xlane.xlu1 %1494 }
0x1245   : > { %vm1508_vm3 = vcmp.eq.f32.partialorder %v5423_v50, %v1495_v2 }
0x1246   : > { %v1516_v3 = vsel %vm1508_vm3, %v4667_v38, 128.0 }
0x1247   : > { %1526 = vmin.xlane.f32.xlu1 %v1516_v3 }
0x1248   : > { %v1499_v4 = vpop.xlane.xlu1 %1498  ;;  %v1497_v5 = vpop.xlane.xlu0 %1496 }
0x1249   : > { %vm1510_vm4 = vcmp.eq.f32.partialorder %v5429_v54, %v1499_v4  ;;  %vm1509_vm5 = vcmp.eq.f32.partialorder %v5432_v55, %v1497_v5 }
0x124a   : > { %v1518_v6 = vsel %vm1510_vm4, %v4667_v38, 128.0  ;;  %v1517_v7 = vsel %vm1509_vm5, %v4667_v38, 128.0 }
0x124b   : > { %1530 = vmin.xlane.f32.xlu1 %v1518_v6  ;;  %1528 = vmin.xlane.f32.xlu0 %v1517_v7 }
0x124c   : > { %v1503_v8 = vpop.xlane.xlu1 %1502  ;;  %v1501_v9 = vpop.xlane.xlu0 %1500 }
0x124d   : > { %vm1512_vm6 = vcmp.eq.f32.partialorder %v5439_v58, %v1503_v8  ;;  %vm1511_vm7 = vcmp.eq.f32.partialorder %v5442_v59, %v1501_v9 }
0x124e   : > { %v1520_v10 = vsel %vm1512_vm6, %v4667_v38, 128.0  ;;  %v1519_v11 = vsel %vm1511_vm7, %v4667_v38, 128.0 }
0x124f   : > { %1534 = vmin.xlane.f32.xlu1 %v1520_v10  ;;  %1532 = vmin.xlane.f32.xlu0 %v1519_v11 }
0x1250   : > { %v1505_v12 = vpop.xlane.xlu0 %1504 }
0x1251   : > { %vm1513_vm8 = vcmp.eq.f32.partialorder %v5448_v61, %v1505_v12 }
0x1252   : > { %v1521_v13 = vsel %vm1513_vm8, %v4667_v38, 128.0 }
0x1253   : > { %1536 = vmin.xlane.f32.xlu0 %v1521_v13 }
0x12cf   : > { %v1525_v14 = vpop.xlane.xlu0 %1524 }
0x12d0   : > { %vm1539_vm9 = vcmp.eq.f32.partialorder %v4667_v38, %v1525_v14  ;;  %v1523_v15 = vpop.xlane.xlu1 %1522 }
0x12d1   : > { %vm1538_vm10 = vcmp.eq.f32.partialorder %v4667_v38, %v1523_v15  ;;  %v5470_v16 = vsel %vm1539_vm9, 1e+30, %v5414_v47 }
0x12d2   : > { %1556 = vmin.xlane.f32.xlu0 %v5470_v16  ;;  %v5474_v17 = vsel %vm1538_vm10, 1e+30, %v5418_v48 }
0x12d3   : > { %1554 = vmin.xlane.f32.xlu1 %v5474_v17 }
0x12d4   : > { %v1527_v18 = vpop.xlane.xlu1 %1526 }
0x12d5   : > { %vm1540_vm11 = vcmp.eq.f32.partialorder %v4667_v38, %v1527_v18 }
0x12d6   : > { %v5479_v19 = vsel %vm1540_vm11, 1e+30, %v5423_v50 }
0x12d7   : > { %1558 = vmin.xlane.f32.xlu1 %v5479_v19 }
0x12d8   : > { %v1531_v20 = vpop.xlane.xlu1 %1530  ;;  %v1529_v21 = vpop.xlane.xlu0 %1528 }
0x12d9   : > { %vm1542_vm12 = vcmp.eq.f32.partialorder %v4667_v38, %v1531_v20  ;;  %vm1541_vm13 = vcmp.eq.f32.partialorder %v4667_v38, %v1529_v21 }
0x12da   : > { %v5485_v22 = vsel %vm1542_vm12, 1e+30, %v5429_v54  ;;  %v5488_v23 = vsel %vm1541_vm13, 1e+30, %v5432_v55 }
0x12db   : > { %1562 = vmin.xlane.f32.xlu1 %v5485_v22  ;;  %1560 = vmin.xlane.f32.xlu0 %v5488_v23 }
0x12dc   : > { %v1535_v24 = vpop.xlane.xlu1 %1534  ;;  %v1533_v25 = vpop.xlane.xlu0 %1532 }
0x12dd   : > { %vm1544_vm14 = vcmp.eq.f32.partialorder %v4667_v38, %v1535_v24  ;;  %vm1543_vm15 = vcmp.eq.f32.partialorder %v4667_v38, %v1533_v25 }
0x12de   : > { %v5495_v26 = vsel %vm1544_vm14, 1e+30, %v5439_v58  ;;  %v5498_v27 = vsel %vm1543_vm15, 1e+30, %v5442_v59 }
0x12df   : > { %1566 = vmin.xlane.f32.xlu1 %v5495_v26  ;;  %1564 = vmin.xlane.f32.xlu0 %v5498_v27 }
0x12e0   : > { %v1537_v28 = vpop.xlane.xlu0 %1536 }
0x12e1   : > { %vm1545_vm0 = vcmp.eq.f32.partialorder %v4667_v38, %v1537_v28 }
0x12e2   : > { %v5504_v29 = vsel %vm1545_vm0, 1e+30, %v5448_v61 }
0x12e3   : > { %1568 = vmin.xlane.f32.xlu0 %v5504_v29 }
0x135f   : > { %v5507_v30 = vpop.xlane.xlu0 %1556 }
0x1360   : > { %v5509_v31 = vpop.xlane.xlu1 %1554  ;;  %vm1571_vm1 = vcmp.eq.f32.partialorder %v5470_v16, %v5507_v30  ;;  %3830 = vrsqrt.f32 %v5507_v30 }
0x1361   : > { %vm1570_vm2 = vcmp.eq.f32.partialorder %v5474_v17, %v5509_v31  ;;  %v1579_v32 = vsel %vm1571_vm1, %v4667_v38, 128.0  ;;  %3832 = vrsqrt.f32 %v5509_v31 }
0x1362   : > { %v1578_v33 = vsel %vm1570_vm2, %v4667_v38, 128.0  ;;  %1588 = vmin.xlane.f32.xlu0 %v1579_v32 }
0x1363   : > { %1586 = vmin.xlane.f32.xlu1 %v1578_v33 }
0x1364   : > { %v5517_v34 = vpop.xlane.xlu1 %1558 }
0x1365   : > { %vm1572_vm3 = vcmp.eq.f32.partialorder %v5479_v19, %v5517_v34  ;;  %3834 = vrsqrt.f32 %v5517_v34 }
0x1366   : > { %v1580_v35 = vsel %vm1572_vm3, %v4667_v38, 128.0 }
0x1367   : > { %1590 = vmin.xlane.f32.xlu1 %v1580_v35 }
0x1368   : > { %v5522_v36 = vpop.xlane.xlu1 %1562  ;;  %v5524_v37 = vpop.xlane.xlu0 %1560 }
0x1369   : > { %vm1574_vm4 = vcmp.eq.f32.partialorder %v5485_v22, %v5522_v36  ;;  %vm1573_vm5 = vcmp.eq.f32.partialorder %v5488_v23, %v5524_v37 }
0x136a   : > { %v1582_v39 = vsel %vm1574_vm4, %v4667_v38, 128.0  ;;  %v1581_v40 = vsel %vm1573_vm5, %v4667_v38, 128.0 }
0x136b   : > { %1594 = vmin.xlane.f32.xlu1 %v1582_v39  ;;  %1592 = vmin.xlane.f32.xlu0 %v1581_v40 }
0x136c   : > { %v5532_v41 = vpop.xlane.xlu0 %1564  ;;  %v5534_v42 = vpop.xlane.xlu1 %1566 }
0x136d   : > { %vm1576_vm6 = vcmp.eq.f32.partialorder %v5495_v26, %v5534_v42  ;;  %vm1575_vm7 = vcmp.eq.f32.partialorder %v5498_v27, %v5532_v41 }
0x136e   : > { %v1584_v45 = vsel %vm1576_vm6, %v4667_v38, 128.0  ;;  %v1583_v46 = vsel %vm1575_vm7, %v4667_v38, 128.0 }
0x136f   : > { %1598 = vmin.xlane.f32.xlu1 %v1584_v45  ;;  %1596 = vmin.xlane.f32.xlu0 %v1583_v46 }
0x1370   : > { %v5540_v43 = vpop.xlane.xlu0 %1568 }
0x1371   : > { %vm1577_vm8 = vcmp.eq.f32.partialorder %v5504_v29, %v5540_v43 }
0x1372   : > { %v1585_v47 = vsel %vm1577_vm8, %v4667_v38, 128.0 }
0x1373   : > { %1600 = vmin.xlane.f32.xlu0 %v1585_v47 }
0x13ef   : > { %v5547_v48 = vpop.xlane.xlu0 %1588 }
0x13f0   : > { %v5549_v49 = vpop.xlane.xlu1 %1586  ;;  %vm1603_vm9 = vcmp.eq.f32.partialorder %v4667_v38, %v5547_v48 }
0x13f1   : > { %vm1602_vm10 = vcmp.eq.f32.partialorder %v4667_v38, %v5549_v49  ;;  %v5559_v50 = vsel %vm1603_vm9, 1e+30, %v5470_v16 }
0x13f2   : > { %v5565_v51 = vsel %vm1602_vm10, 1e+30, %v5474_v17  ;;  %1620 = vmin.xlane.f32.xlu0 %v5559_v50 }
0x13f3   : > { %1618 = vmin.xlane.f32.xlu1 %v5565_v51 }
0x13f4   : > { %v5569_v52 = vpop.xlane.xlu1 %1590 }
0x13f5   : > { %vm1604_vm11 = vcmp.eq.f32.partialorder %v4667_v38, %v5569_v52 }
0x13f6   : > { %v5577_v54 = vsel %vm1604_vm11, 1e+30, %v5479_v19 }
0x13f7   : > { %1622 = vmin.xlane.f32.xlu1 %v5577_v54 }
0x13f8   : > { %v5580_v55 = vpop.xlane.xlu1 %1594  ;;  %v5582_v56 = vpop.xlane.xlu0 %1592 }
0x13f9   : > { %vm1606_vm12 = vcmp.eq.f32.partialorder %v4667_v38, %v5580_v55  ;;  %vm1605_vm13 = vcmp.eq.f32.partialorder %v4667_v38, %v5582_v56 }
0x13fa   : > { %v5592_v57 = vsel %vm1606_vm12, 1e+30, %v5485_v22  ;;  %v5598_v58 = vsel %vm1605_vm13, 1e+30, %v5488_v23 }
0x13fb   : > { %1626 = vmin.xlane.f32.xlu1 %v5592_v57  ;;  %1624 = vmin.xlane.f32.xlu0 %v5598_v58 }
0x13fc   : > { %v5602_v59 = vpop.xlane.xlu1 %1598  ;;  %v5604_v60 = vpop.xlane.xlu0 %1596 }
0x13fd   : > { %vm1608_vm14 = vcmp.eq.f32.partialorder %v4667_v38, %v5602_v59  ;;  %vm1607_vm15 = vcmp.eq.f32.partialorder %v4667_v38, %v5604_v60 }
0x13fe   : > { %v5614_v61 = vsel %vm1608_vm14, 1e+30, %v5495_v26  ;;  %v5620_v62 = vsel %vm1607_vm15, 1e+30, %v5498_v27 }
0x13ff   : > { %1630 = vmin.xlane.f32.xlu1 %v5614_v61  ;;  %1628 = vmin.xlane.f32.xlu0 %v5620_v62 }
0x1400   : > { %v5624_v63 = vpop.xlane.xlu0 %1600 }
0x1401   : > { %vm1609_vm0 = vcmp.eq.f32.partialorder %v4667_v38, %v5624_v63 }
0x1402   : > { %v5632_v0 = vsel %vm1609_vm0, 1e+30, %v5504_v29 }
0x1403   : > { %1632 = vmin.xlane.f32.xlu0 %v5632_v0 }
0x147f   : > { %v1621_v1 = vpop.xlane.xlu0 %1620 }
0x1480   : > { %v1619_v2 = vpop.xlane.xlu1 %1618  ;;  %vm1635_vm1 = vcmp.eq.f32.partialorder %v5559_v50, %v1621_v1 }
0x1481   : > { %vm1634_vm2 = vcmp.eq.f32.partialorder %v5565_v51, %v1619_v2  ;;  %v1643_v3 = vsel %vm1635_vm1, %v4667_v38, 128.0 }
0x1482   : > { %v1642_v4 = vsel %vm1634_vm2, %v4667_v38, 128.0  ;;  %1652 = vmin.xlane.f32.xlu0 %v1643_v3 }
0x1483   : > { %1650 = vmin.xlane.f32.xlu1 %v1642_v4 }
0x1484   : > { %v1623_v5 = vpop.xlane.xlu1 %1622 }
0x1485   : > { %vm1636_vm3 = vcmp.eq.f32.partialorder %v5577_v54, %v1623_v5 }
0x1486   : > { %v1644_v6 = vsel %vm1636_vm3, %v4667_v38, 128.0 }
0x1487   : > { %1654 = vmin.xlane.f32.xlu1 %v1644_v6 }
0x1488   : > { %v1627_v7 = vpop.xlane.xlu1 %1626  ;;  %v1625_v8 = vpop.xlane.xlu0 %1624 }
0x1489   : > { %vm1638_vm4 = vcmp.eq.f32.partialorder %v5592_v57, %v1627_v7  ;;  %vm1637_vm5 = vcmp.eq.f32.partialorder %v5598_v58, %v1625_v8 }
0x148a   : > { %v1646_v9 = vsel %vm1638_vm4, %v4667_v38, 128.0  ;;  %v1645_v10 = vsel %vm1637_vm5, %v4667_v38, 128.0 }
0x148b   : > { %1658 = vmin.xlane.f32.xlu1 %v1646_v9  ;;  %1656 = vmin.xlane.f32.xlu0 %v1645_v10 }
0x148c   : > { %v1631_v11 = vpop.xlane.xlu1 %1630  ;;  %v1629_v12 = vpop.xlane.xlu0 %1628 }
0x148d   : > { %vm1640_vm6 = vcmp.eq.f32.partialorder %v5614_v61, %v1631_v11  ;;  %vm1639_vm7 = vcmp.eq.f32.partialorder %v5620_v62, %v1629_v12 }
0x148e   : > { %v1648_v13 = vsel %vm1640_vm6, %v4667_v38, 128.0  ;;  %v1647_v14 = vsel %vm1639_vm7, %v4667_v38, 128.0 }
0x148f   : > { %1662 = vmin.xlane.f32.xlu1 %v1648_v13  ;;  %1660 = vmin.xlane.f32.xlu0 %v1647_v14 }
0x1490   : > { %v1633_v15 = vpop.xlane.xlu0 %1632 }
0x1491   : > { %vm1641_vm8 = vcmp.eq.f32.partialorder %v5632_v0, %v1633_v15 }
0x1492   : > { %v1649_v16 = vsel %vm1641_vm8, %v4667_v38, 128.0 }
0x1493   : > { %1664 = vmin.xlane.f32.xlu0 %v1649_v16 }
0x150f   : > { %v1653_v17 = vpop.xlane.xlu0 %1652 }
0x1510   : > { %v1651_v18 = vpop.xlane.xlu1 %1650  ;;  %vm1667_vm1 = vcmp.eq.f32.partialorder %v4667_v38, %v1653_v17 }
0x1511   : > { %vm1666_vm2 = vcmp.eq.f32.partialorder %v4667_v38, %v1651_v18  ;;  %v5654_v19 = vsel %vm1667_vm1, 1e+30, %v5559_v50 }
0x1512   : > { %v5657_v20 = vsel %vm1666_vm2, 1e+30, %v5565_v51  ;;  %1684 = vmin.xlane.f32.xlu0 %v5654_v19 }
0x1513   : > { %1682 = vmin.xlane.f32.xlu1 %v5657_v20 }
0x1514   : > { %v1655_v21 = vpop.xlane.xlu1 %1654 }
0x1515   : > { %vm1668_vm3 = vcmp.eq.f32.partialorder %v4667_v38, %v1655_v21 }
0x1516   : > { %v5663_v22 = vsel %vm1668_vm3, 1e+30, %v5577_v54 }
0x1517   : > { %1686 = vmin.xlane.f32.xlu1 %v5663_v22 }
0x1518   : > { %v1659_v23 = vpop.xlane.xlu1 %1658  ;;  %v1657_v24 = vpop.xlane.xlu0 %1656 }
0x1519   : > { %vm1670_vm4 = vcmp.eq.f32.partialorder %v4667_v38, %v1659_v23  ;;  %vm1669_vm5 = vcmp.eq.f32.partialorder %v4667_v38, %v1657_v24 }
0x151a   : > { %v5669_v25 = vsel %vm1670_vm4, 1e+30, %v5592_v57  ;;  %v5672_v26 = vsel %vm1669_vm5, 1e+30, %v5598_v58 }
0x151b   : > { %1690 = vmin.xlane.f32.xlu1 %v5669_v25  ;;  %1688 = vmin.xlane.f32.xlu0 %v5672_v26 }
0x151c   : > { %v1663_v27 = vpop.xlane.xlu1 %1662  ;;  %v1661_v28 = vpop.xlane.xlu0 %1660 }
0x151d   : > { %vm1672_vm6 = vcmp.eq.f32.partialorder %v4667_v38, %v1663_v27  ;;  %vm1671_vm7 = vcmp.eq.f32.partialorder %v4667_v38, %v1661_v28 }
0x151e   : > { %v5679_v29 = vsel %vm1672_vm6, 1e+30, %v5614_v61  ;;  %v5682_v32 = vsel %vm1671_vm7, 1e+30, %v5620_v62 }
0x151f   : > { %1694 = vmin.xlane.f32.xlu1 %v5679_v29  ;;  %1692 = vmin.xlane.f32.xlu0 %v5682_v32 }
0x1520   : > { %v1665_v33 = vpop.xlane.xlu0 %1664 }
0x1521   : > { %vm1673_vm8 = vcmp.eq.f32.partialorder %v4667_v38, %v1665_v33 }
0x1522   : > { %v5688_v35 = vsel %vm1673_vm8, 1e+30, %v5632_v0 }
0x1523   : > { %1696 = vmin.xlane.f32.xlu0 %v5688_v35 }
0x159f   : > { %v1685_v39 = vpop.xlane.xlu0 %1684 }
0x15a0   : > { %v1683_v40 = vpop.xlane.xlu1 %1682  ;;  %vm1699_vm1 = vcmp.eq.f32.partialorder %v5654_v19, %v1685_v39 }
0x15a1   : > { %vm1698_vm2 = vcmp.eq.f32.partialorder %v5657_v20, %v1683_v40  ;;  %v1707_v45 = vsel %vm1699_vm1, %v4667_v38, 128.0 }
0x15a2   : > { %v1706_v46 = vsel %vm1698_vm2, %v4667_v38, 128.0  ;;  %1716 = vmin.xlane.f32.xlu0 %v1707_v45 }
0x15a3   : > { %1714 = vmin.xlane.f32.xlu1 %v1706_v46 }
0x15a4   : > { %v1687_v47 = vpop.xlane.xlu1 %1686 }
0x15a5   : > { %vm1700_vm3 = vcmp.eq.f32.partialorder %v5663_v22, %v1687_v47 }
0x15a6   : > { %v1708_v50 = vsel %vm1700_vm3, %v4667_v38, 128.0 }
0x15a7   : > { %1718 = vmin.xlane.f32.xlu1 %v1708_v50 }
0x15a8   : > { %v1691_v51 = vpop.xlane.xlu1 %1690  ;;  %v1689_v54 = vpop.xlane.xlu0 %1688 }
0x15a9   : > { %vm1702_vm4 = vcmp.eq.f32.partialorder %v5669_v25, %v1691_v51  ;;  %vm1701_vm5 = vcmp.eq.f32.partialorder %v5672_v26, %v1689_v54 }
0x15aa   : > { %v1710_v57 = vsel %vm1702_vm4, %v4667_v38, 128.0  ;;  %v1709_v58 = vsel %vm1701_vm5, %v4667_v38, 128.0 }
0x15ab   : > { %1722 = vmin.xlane.f32.xlu1 %v1710_v57  ;;  %1720 = vmin.xlane.f32.xlu0 %v1709_v58 }
0x15ac   : > { %v1695_v61 = vpop.xlane.xlu1 %1694  ;;  %v1693_v62 = vpop.xlane.xlu0 %1692 }
0x15ad   : > { %vm1704_vm6 = vcmp.eq.f32.partialorder %v5679_v29, %v1695_v61  ;;  %vm1703_vm7 = vcmp.eq.f32.partialorder %v5682_v32, %v1693_v62 }
0x15ae   : > { %v1712_v0 = vsel %vm1704_vm6, %v4667_v38, 128.0  ;;  %v1711_v1 = vsel %vm1703_vm7, %v4667_v38, 128.0 }
0x15af   : > { %1726 = vmin.xlane.f32.xlu1 %v1712_v0  ;;  %1724 = vmin.xlane.f32.xlu0 %v1711_v1 }
0x15b0   : > { %v1697_v2 = vpop.xlane.xlu0 %1696 }
0x15b1   : > { %vm1705_vm8 = vcmp.eq.f32.partialorder %v5688_v35, %v1697_v2 }
0x15b2   : > { %v1713_v3 = vsel %vm1705_vm8, %v4667_v38, 128.0 }
0x15b3   : > { %1728 = vmin.xlane.f32.xlu0 %v1713_v3 }
0x162f   : > { %v1717_v4 = vpop.xlane.xlu0 %1716 }
0x1630   : > { %v1715_v5 = vpop.xlane.xlu1 %1714  ;;  %vm1731_vm1 = vcmp.eq.f32.partialorder %v4667_v38, %v1717_v4 }
0x1631   : > { %vm1730_vm2 = vcmp.eq.f32.partialorder %v4667_v38, %v1715_v5  ;;  %v5710_v6 = vsel %vm1731_vm1, 1e+30, %v5654_v19 }
0x1632   : > { %v5713_v7 = vsel %vm1730_vm2, 1e+30, %v5657_v20  ;;  %1748 = vmin.xlane.f32.xlu0 %v5710_v6 }
0x1633   : > { %1746 = vmin.xlane.f32.xlu1 %v5713_v7 }
0x1634   : > { %v1719_v8 = vpop.xlane.xlu1 %1718 }
0x1635   : > { %vm1732_vm3 = vcmp.eq.f32.partialorder %v4667_v38, %v1719_v8 }
0x1636   : > { %v5719_v9 = vsel %vm1732_vm3, 1e+30, %v5663_v22 }
0x1637   : > { %1750 = vmin.xlane.f32.xlu1 %v5719_v9 }
0x1638   : > { %v1723_v10 = vpop.xlane.xlu1 %1722  ;;  %v1721_v11 = vpop.xlane.xlu0 %1720 }
0x1639   : > { %vm1734_vm4 = vcmp.eq.f32.partialorder %v4667_v38, %v1723_v10  ;;  %vm1733_vm5 = vcmp.eq.f32.partialorder %v4667_v38, %v1721_v11 }
0x163a   : > { %v5725_v12 = vsel %vm1734_vm4, 1e+30, %v5669_v25  ;;  %v5728_v13 = vsel %vm1733_vm5, 1e+30, %v5672_v26 }
0x163b   : > { %1754 = vmin.xlane.f32.xlu1 %v5725_v12  ;;  %1752 = vmin.xlane.f32.xlu0 %v5728_v13 }
0x163c   : > { %v1727_v14 = vpop.xlane.xlu1 %1726  ;;  %v1725_v15 = vpop.xlane.xlu0 %1724 }
0x163d   : > { %vm1736_vm6 = vcmp.eq.f32.partialorder %v4667_v38, %v1727_v14  ;;  %vm1735_vm7 = vcmp.eq.f32.partialorder %v4667_v38, %v1725_v15 }
0x163e   : > { %v5735_v16 = vsel %vm1736_vm6, 1e+30, %v5679_v29  ;;  %v5738_v17 = vsel %vm1735_vm7, 1e+30, %v5682_v32 }
0x163f   : > { %1758 = vmin.xlane.f32.xlu1 %v5735_v16  ;;  %1756 = vmin.xlane.f32.xlu0 %v5738_v17 }
0x1640   : > { %v1729_v18 = vpop.xlane.xlu0 %1728 }
0x1641   : > { %vm1737_vm8 = vcmp.eq.f32.partialorder %v4667_v38, %v1729_v18 }
0x1642   : > { %v5744_v19 = vsel %vm1737_vm8, 1e+30, %v5688_v35 }
0x1643   : > { %1760 = vmin.xlane.f32.xlu0 %v5744_v19 }
0x16bf   : > { %v1749_v20 = vpop.xlane.xlu0 %1748 }
0x16c0   : > { %v1747_v21 = vpop.xlane.xlu1 %1746  ;;  %vm1763_vm1 = vcmp.eq.f32.partialorder %v5710_v6, %v1749_v20 }
0x16c1   : > { %vm1762_vm2 = vcmp.eq.f32.partialorder %v5713_v7, %v1747_v21  ;;  %v1771_v22 = vsel %vm1763_vm1, %v4667_v38, 128.0 }
0x16c2   : > { %v1770_v23 = vsel %vm1762_vm2, %v4667_v38, 128.0  ;;  %1780 = vmin.xlane.f32.xlu0 %v1771_v22 }
0x16c3   : > { %1778 = vmin.xlane.f32.xlu1 %v1770_v23 }
0x16c4   : > { %v1751_v24 = vpop.xlane.xlu1 %1750 }
0x16c5   : > { %vm1764_vm3 = vcmp.eq.f32.partialorder %v5719_v9, %v1751_v24 }
0x16c6   : > { %v1772_v25 = vsel %vm1764_vm3, %v4667_v38, 128.0 }
0x16c7   : > { %1782 = vmin.xlane.f32.xlu1 %v1772_v25 }
0x16c8   : > { %v1755_v26 = vpop.xlane.xlu1 %1754  ;;  %v1753_v27 = vpop.xlane.xlu0 %1752 }
0x16c9   : > { %vm1766_vm4 = vcmp.eq.f32.partialorder %v5725_v12, %v1755_v26  ;;  %vm1765_vm5 = vcmp.eq.f32.partialorder %v5728_v13, %v1753_v27 }
0x16ca   : > { %v1774_v28 = vsel %vm1766_vm4, %v4667_v38, 128.0  ;;  %v1773_v29 = vsel %vm1765_vm5, %v4667_v38, 128.0 }
0x16cb   : > { %1786 = vmin.xlane.f32.xlu1 %v1774_v28  ;;  %1784 = vmin.xlane.f32.xlu0 %v1773_v29 }
0x16cc   : > { %v1759_v32 = vpop.xlane.xlu1 %1758  ;;  %v1757_v33 = vpop.xlane.xlu0 %1756 }
0x16cd   : > { %vm1768_vm6 = vcmp.eq.f32.partialorder %v5735_v16, %v1759_v32  ;;  %vm1767_vm7 = vcmp.eq.f32.partialorder %v5738_v17, %v1757_v33 }
0x16ce   : > { %v1776_v35 = vsel %vm1768_vm6, %v4667_v38, 128.0  ;;  %v1775_v39 = vsel %vm1767_vm7, %v4667_v38, 128.0 }
0x16cf   : > { %1790 = vmin.xlane.f32.xlu1 %v1776_v35  ;;  %1788 = vmin.xlane.f32.xlu0 %v1775_v39 }
0x16d0   : > { %v1761_v40 = vpop.xlane.xlu0 %1760 }
0x16d1   : > { %vm1769_vm8 = vcmp.eq.f32.partialorder %v5744_v19, %v1761_v40 }
0x16d2   : > { %v1777_v45 = vsel %vm1769_vm8, %v4667_v38, 128.0 }
0x16d3   : > { %1792 = vmin.xlane.f32.xlu0 %v1777_v45 }
0x174f   : > { %v1781_v46 = vpop.xlane.xlu0 %1780 }
0x1750   : > { %v1779_v47 = vpop.xlane.xlu1 %1778  ;;  %vm1795_vm1 = vcmp.eq.f32.partialorder %v4667_v38, %v1781_v46 }
0x1751   : > { %vm1794_vm2 = vcmp.eq.f32.partialorder %v4667_v38, %v1779_v47  ;;  %v5766_v50 = vsel %vm1795_vm1, 1e+30, %v5710_v6 }
0x1752   : > { %v5769_v51 = vsel %vm1794_vm2, 1e+30, %v5713_v7  ;;  %1812 = vmin.xlane.f32.xlu0 %v5766_v50 }
0x1753   : > { %1810 = vmin.xlane.f32.xlu1 %v5769_v51 }
0x1754   : > { %v1783_v54 = vpop.xlane.xlu1 %1782 }
0x1755   : > { %vm1796_vm3 = vcmp.eq.f32.partialorder %v4667_v38, %v1783_v54 }
0x1756   : > { %v5775_v57 = vsel %vm1796_vm3, 1e+30, %v5719_v9 }
0x1757   : > { %1814 = vmin.xlane.f32.xlu1 %v5775_v57 }
0x1758   : > { %v1787_v58 = vpop.xlane.xlu1 %1786  ;;  %v1785_v61 = vpop.xlane.xlu0 %1784 }
0x1759   : > { %vm1798_vm4 = vcmp.eq.f32.partialorder %v4667_v38, %v1787_v58  ;;  %vm1797_vm5 = vcmp.eq.f32.partialorder %v4667_v38, %v1785_v61 }
0x175a   : > { %v5781_v62 = vsel %vm1798_vm4, 1e+30, %v5725_v12  ;;  %v5784_v0 = vsel %vm1797_vm5, 1e+30, %v5728_v13 }
0x175b   : > { %1818 = vmin.xlane.f32.xlu1 %v5781_v62  ;;  %1816 = vmin.xlane.f32.xlu0 %v5784_v0 }
0x175c   : > { %v1791_v1 = vpop.xlane.xlu1 %1790  ;;  %v1789_v2 = vpop.xlane.xlu0 %1788 }
0x175d   : > { %vm1800_vm6 = vcmp.eq.f32.partialorder %v4667_v38, %v1791_v1  ;;  %vm1799_vm7 = vcmp.eq.f32.partialorder %v4667_v38, %v1789_v2 }
0x175e   : > { %v5791_v3 = vsel %vm1800_vm6, 1e+30, %v5735_v16  ;;  %v5794_v4 = vsel %vm1799_vm7, 1e+30, %v5738_v17 }
0x175f   : > { %1822 = vmin.xlane.f32.xlu1 %v5791_v3  ;;  %1820 = vmin.xlane.f32.xlu0 %v5794_v4 }
0x1760   : > { %v1793_v5 = vpop.xlane.xlu0 %1792 }
0x1761   : > { %vm1801_vm8 = vcmp.eq.f32.partialorder %v4667_v38, %v1793_v5 }
0x1762   : > { %v5800_v6 = vsel %vm1801_vm8, 1e+30, %v5744_v19 }
0x1763   : > { %1824 = vmin.xlane.f32.xlu0 %v5800_v6 }
0x17df   : > { %v1813_v7 = vpop.xlane.xlu0 %1812 }
0x17e0   : > { %v1811_v8 = vpop.xlane.xlu1 %1810  ;;  %vm1827_vm1 = vcmp.eq.f32.partialorder %v5766_v50, %v1813_v7 }
0x17e1   : > { %vm1826_vm2 = vcmp.eq.f32.partialorder %v5769_v51, %v1811_v8  ;;  %v1835_v9 = vsel %vm1827_vm1, %v4667_v38, 128.0 }
0x17e2   : > { %v1834_v10 = vsel %vm1826_vm2, %v4667_v38, 128.0  ;;  %1844 = vmin.xlane.f32.xlu0 %v1835_v9 }
0x17e3   : > { %1842 = vmin.xlane.f32.xlu1 %v1834_v10 }
0x17e4   : > { %v1815_v11 = vpop.xlane.xlu1 %1814 }
0x17e5   : > { %vm1828_vm3 = vcmp.eq.f32.partialorder %v5775_v57, %v1815_v11 }
0x17e6   : > { %v1836_v12 = vsel %vm1828_vm3, %v4667_v38, 128.0 }
0x17e7   : > { %1846 = vmin.xlane.f32.xlu1 %v1836_v12 }
0x17e8   : > { %v1819_v13 = vpop.xlane.xlu1 %1818  ;;  %v1817_v14 = vpop.xlane.xlu0 %1816 }
0x17e9   : > { %vm1830_vm4 = vcmp.eq.f32.partialorder %v5781_v62, %v1819_v13  ;;  %vm1829_vm5 = vcmp.eq.f32.partialorder %v5784_v0, %v1817_v14 }
0x17ea   : > { %v1838_v15 = vsel %vm1830_vm4, %v4667_v38, 128.0  ;;  %v1837_v16 = vsel %vm1829_vm5, %v4667_v38, 128.0 }
0x17eb   : > { %1850 = vmin.xlane.f32.xlu1 %v1838_v15  ;;  %1848 = vmin.xlane.f32.xlu0 %v1837_v16 }
0x17ec   : > { %v1823_v17 = vpop.xlane.xlu1 %1822  ;;  %v1821_v18 = vpop.xlane.xlu0 %1820 }
0x17ed   : > { %vm1832_vm6 = vcmp.eq.f32.partialorder %v5791_v3, %v1823_v17  ;;  %vm1831_vm7 = vcmp.eq.f32.partialorder %v5794_v4, %v1821_v18 }
0x17ee   : > { %v1840_v19 = vsel %vm1832_vm6, %v4667_v38, 128.0  ;;  %v1839_v20 = vsel %vm1831_vm7, %v4667_v38, 128.0 }
0x17ef   : > { %1854 = vmin.xlane.f32.xlu1 %v1840_v19  ;;  %1852 = vmin.xlane.f32.xlu0 %v1839_v20 }
0x17f0   : > { %v1825_v21 = vpop.xlane.xlu0 %1824 }
0x17f1   : > { %vm1833_vm8 = vcmp.eq.f32.partialorder %v5800_v6, %v1825_v21 }
0x17f2   : > { %v1841_v22 = vsel %vm1833_vm8, %v4667_v38, 128.0 }
0x17f3   : > { %1856 = vmin.xlane.f32.xlu0 %v1841_v22 }
0x186f   : > { %v1845_v23 = vpop.xlane.xlu0 %1844 }
0x1870   : > { %v1843_v24 = vpop.xlane.xlu1 %1842  ;;  %vm1859_vm1 = vcmp.eq.f32.partialorder %v4667_v38, %v1845_v23 }
0x1871   : > { %vm1858_vm2 = vcmp.eq.f32.partialorder %v4667_v38, %v1843_v24  ;;  %v5822_v25 = vsel %vm1859_vm1, 1e+30, %v5766_v50 }
0x1872   : > { %v5825_v26 = vsel %vm1858_vm2, 1e+30, %v5769_v51  ;;  %1876 = vmin.xlane.f32.xlu0 %v5822_v25 }
0x1873   : > { %1874 = vmin.xlane.f32.xlu1 %v5825_v26 }
0x1874   : > { %v1847_v27 = vpop.xlane.xlu1 %1846 }
0x1875   : > { %vm1860_vm3 = vcmp.eq.f32.partialorder %v4667_v38, %v1847_v27 }
0x1876   : > { %v5831_v28 = vsel %vm1860_vm3, 1e+30, %v5775_v57 }
0x1877   : > { %1878 = vmin.xlane.f32.xlu1 %v5831_v28 }
0x1878   : > { %v1851_v29 = vpop.xlane.xlu1 %1850  ;;  %v1849_v32 = vpop.xlane.xlu0 %1848 }
0x1879   : > { %vm1862_vm4 = vcmp.eq.f32.partialorder %v4667_v38, %v1851_v29  ;;  %vm1861_vm5 = vcmp.eq.f32.partialorder %v4667_v38, %v1849_v32 }
0x187a   : > { %v5837_v33 = vsel %vm1862_vm4, 1e+30, %v5781_v62  ;;  %v5840_v35 = vsel %vm1861_vm5, 1e+30, %v5784_v0 }
0x187b   : > { %1882 = vmin.xlane.f32.xlu1 %v5837_v33  ;;  %1880 = vmin.xlane.f32.xlu0 %v5840_v35 }
0x187c   : > { %v1855_v39 = vpop.xlane.xlu1 %1854  ;;  %v1853_v40 = vpop.xlane.xlu0 %1852 }
0x187d   : > { %vm1864_vm6 = vcmp.eq.f32.partialorder %v4667_v38, %v1855_v39  ;;  %vm1863_vm7 = vcmp.eq.f32.partialorder %v4667_v38, %v1853_v40 }
0x187e   : > { %v5847_v45 = vsel %vm1864_vm6, 1e+30, %v5791_v3  ;;  %v5850_v46 = vsel %vm1863_vm7, 1e+30, %v5794_v4 }
0x187f   : > { %1886 = vmin.xlane.f32.xlu1 %v5847_v45  ;;  %1884 = vmin.xlane.f32.xlu0 %v5850_v46 }
0x1880   : > { %v1857_v47 = vpop.xlane.xlu0 %1856 }
0x1881   : > { %vm1865_vm8 = vcmp.eq.f32.partialorder %v4667_v38, %v1857_v47 }
0x1882   : > { %v5856_v50 = vsel %vm1865_vm8, 1e+30, %v5800_v6 }
0x1883   : > { %1888 = vmin.xlane.f32.xlu0 %v5856_v50 }
0x18ff   : > { %v1877_v51 = vpop.xlane.xlu0 %1876 }
0x1900   : > { %v1875_v54 = vpop.xlane.xlu1 %1874  ;;  %vm1891_vm1 = vcmp.eq.f32.partialorder %v5822_v25, %v1877_v51 }
0x1901   : > { %vm1890_vm2 = vcmp.eq.f32.partialorder %v5825_v26, %v1875_v54  ;;  %v1899_v57 = vsel %vm1891_vm1, %v4667_v38, 128.0 }
0x1902   : > { %v1898_v58 = vsel %vm1890_vm2, %v4667_v38, 128.0  ;;  %1908 = vmin.xlane.f32.xlu0 %v1899_v57 }
0x1903   : > { %1906 = vmin.xlane.f32.xlu1 %v1898_v58 }
0x1904   : > { %v1879_v61 = vpop.xlane.xlu1 %1878 }
0x1905   : > { %vm1892_vm3 = vcmp.eq.f32.partialorder %v5831_v28, %v1879_v61 }
0x1906   : > { %v1900_v62 = vsel %vm1892_vm3, %v4667_v38, 128.0 }
0x1907   : > { %1910 = vmin.xlane.f32.xlu1 %v1900_v62 }
0x1908   : > { %v1883_v0 = vpop.xlane.xlu1 %1882  ;;  %v1881_v1 = vpop.xlane.xlu0 %1880 }
0x1909   : > { %vm1894_vm4 = vcmp.eq.f32.partialorder %v5837_v33, %v1883_v0  ;;  %vm1893_vm5 = vcmp.eq.f32.partialorder %v5840_v35, %v1881_v1 }
0x190a   : > { %v1902_v2 = vsel %vm1894_vm4, %v4667_v38, 128.0  ;;  %v1901_v3 = vsel %vm1893_vm5, %v4667_v38, 128.0 }
0x190b   : > { %1914 = vmin.xlane.f32.xlu1 %v1902_v2  ;;  %1912 = vmin.xlane.f32.xlu0 %v1901_v3 }
0x190c   : > { %v1887_v4 = vpop.xlane.xlu1 %1886  ;;  %v1885_v5 = vpop.xlane.xlu0 %1884 }
0x190d   : > { %vm1896_vm6 = vcmp.eq.f32.partialorder %v5847_v45, %v1887_v4  ;;  %vm1895_vm7 = vcmp.eq.f32.partialorder %v5850_v46, %v1885_v5 }
0x190e   : > { %v1904_v6 = vsel %vm1896_vm6, %v4667_v38, 128.0  ;;  %v1903_v7 = vsel %vm1895_vm7, %v4667_v38, 128.0 }
0x190f   : > { %1918 = vmin.xlane.f32.xlu1 %v1904_v6  ;;  %1916 = vmin.xlane.f32.xlu0 %v1903_v7 }
0x1910   : > { %v1889_v8 = vpop.xlane.xlu0 %1888 }
0x1911   : > { %vm1897_vm8 = vcmp.eq.f32.partialorder %v5856_v50, %v1889_v8 }
0x1912   : > { %v1905_v9 = vsel %vm1897_vm8, %v4667_v38, 128.0 }
0x1913   : > { %1920 = vmin.xlane.f32.xlu0 %v1905_v9 }
0x198f   : > { %v1909_v10 = vpop.xlane.xlu0 %1908 }
0x1990   : > { %v1907_v11 = vpop.xlane.xlu1 %1906  ;;  %vm1923_vm1 = vcmp.eq.f32.partialorder %v4667_v38, %v1909_v10 }
0x1991   : > { %vm1922_vm2 = vcmp.eq.f32.partialorder %v4667_v38, %v1907_v11  ;;  %v5878_v12 = vsel %vm1923_vm1, 1e+30, %v5822_v25 }
0x1992   : > { %v5881_v13 = vsel %vm1922_vm2, 1e+30, %v5825_v26  ;;  %1940 = vmin.xlane.f32.xlu0 %v5878_v12 }
0x1993   : > { %1938 = vmin.xlane.f32.xlu1 %v5881_v13 }
0x1994   : > { %v1911_v14 = vpop.xlane.xlu1 %1910 }
0x1995   : > { %vm1924_vm3 = vcmp.eq.f32.partialorder %v4667_v38, %v1911_v14 }
0x1996   : > { %v5887_v15 = vsel %vm1924_vm3, 1e+30, %v5831_v28 }
0x1997   : > { %1942 = vmin.xlane.f32.xlu1 %v5887_v15 }
0x1998   : > { %v1915_v16 = vpop.xlane.xlu1 %1914  ;;  %v1913_v17 = vpop.xlane.xlu0 %1912 }
0x1999   : > { %vm1926_vm4 = vcmp.eq.f32.partialorder %v4667_v38, %v1915_v16  ;;  %vm1925_vm5 = vcmp.eq.f32.partialorder %v4667_v38, %v1913_v17 }
0x199a   : > { %v5893_v18 = vsel %vm1926_vm4, 1e+30, %v5837_v33  ;;  %v5896_v19 = vsel %vm1925_vm5, 1e+30, %v5840_v35 }
0x199b   : > { %1946 = vmin.xlane.f32.xlu1 %v5893_v18  ;;  %1944 = vmin.xlane.f32.xlu0 %v5896_v19 }
0x199c   : > { %v1919_v20 = vpop.xlane.xlu1 %1918  ;;  %v1917_v21 = vpop.xlane.xlu0 %1916 }
0x199d   : > { %vm1928_vm6 = vcmp.eq.f32.partialorder %v4667_v38, %v1919_v20  ;;  %vm1927_vm7 = vcmp.eq.f32.partialorder %v4667_v38, %v1917_v21 }
0x199e   : > { %v5903_v22 = vsel %vm1928_vm6, 1e+30, %v5847_v45  ;;  %v5906_v23 = vsel %vm1927_vm7, 1e+30, %v5850_v46 }
0x199f   : > { %1950 = vmin.xlane.f32.xlu1 %v5903_v22  ;;  %1948 = vmin.xlane.f32.xlu0 %v5906_v23 }
0x19a0   : > { %v1921_v24 = vpop.xlane.xlu0 %1920 }
0x19a1   : > { %vm1929_vm8 = vcmp.eq.f32.partialorder %v4667_v38, %v1921_v24 }
0x19a2   : > { %v5912_v25 = vsel %vm1929_vm8, 1e+30, %v5856_v50 }
0x19a3   : > { %1952 = vmin.xlane.f32.xlu0 %v5912_v25 }
0x1a1f   : > { %v1941_v26 = vpop.xlane.xlu0 %1940 }
0x1a20   : > { %v1939_v27 = vpop.xlane.xlu1 %1938  ;;  %vm1955_vm1 = vcmp.eq.f32.partialorder %v5878_v12, %v1941_v26 }
0x1a21   : > { %vm1954_vm2 = vcmp.eq.f32.partialorder %v5881_v13, %v1939_v27  ;;  %v1963_v28 = vsel %vm1955_vm1, %v4667_v38, 128.0 }
0x1a22   : > { %v1962_v29 = vsel %vm1954_vm2, %v4667_v38, 128.0  ;;  %1972 = vmin.xlane.f32.xlu0 %v1963_v28 }
0x1a23   : > { %1970 = vmin.xlane.f32.xlu1 %v1962_v29 }
0x1a24   : > { %v1943_v32 = vpop.xlane.xlu1 %1942 }
0x1a25   : > { %vm1956_vm3 = vcmp.eq.f32.partialorder %v5887_v15, %v1943_v32 }
0x1a26   : > { %v1964_v33 = vsel %vm1956_vm3, %v4667_v38, 128.0 }
0x1a27   : > { %1974 = vmin.xlane.f32.xlu1 %v1964_v33 }
0x1a28   : > { %v1947_v35 = vpop.xlane.xlu1 %1946  ;;  %v1945_v39 = vpop.xlane.xlu0 %1944 }
0x1a29   : > { %vm1958_vm4 = vcmp.eq.f32.partialorder %v5893_v18, %v1947_v35  ;;  %vm1957_vm5 = vcmp.eq.f32.partialorder %v5896_v19, %v1945_v39 }
0x1a2a   : > { %v1966_v40 = vsel %vm1958_vm4, %v4667_v38, 128.0  ;;  %v1965_v45 = vsel %vm1957_vm5, %v4667_v38, 128.0 }
0x1a2b   : > { %1978 = vmin.xlane.f32.xlu1 %v1966_v40  ;;  %1976 = vmin.xlane.f32.xlu0 %v1965_v45 }
0x1a2c   : > { %v1951_v46 = vpop.xlane.xlu1 %1950  ;;  %v1949_v47 = vpop.xlane.xlu0 %1948 }
0x1a2d   : > { %vm1960_vm6 = vcmp.eq.f32.partialorder %v5903_v22, %v1951_v46  ;;  %vm1959_vm7 = vcmp.eq.f32.partialorder %v5906_v23, %v1949_v47 }
0x1a2e   : > { %v1968_v50 = vsel %vm1960_vm6, %v4667_v38, 128.0  ;;  %v1967_v51 = vsel %vm1959_vm7, %v4667_v38, 128.0 }
0x1a2f   : > { %1982 = vmin.xlane.f32.xlu1 %v1968_v50  ;;  %1980 = vmin.xlane.f32.xlu0 %v1967_v51 }
0x1a30   : > { %v1953_v54 = vpop.xlane.xlu0 %1952 }
0x1a31   : > { %vm1961_vm8 = vcmp.eq.f32.partialorder %v5912_v25, %v1953_v54 }
0x1a32   : > { %v1969_v57 = vsel %vm1961_vm8, %v4667_v38, 128.0 }
0x1a33   : > { %1984 = vmin.xlane.f32.xlu0 %v1969_v57 }
0x1aaf   : > { %v1973_v58 = vpop.xlane.xlu0 %1972 }
0x1ab0   : > { %v1971_v61 = vpop.xlane.xlu1 %1970  ;;  %vm1987_vm1 = vcmp.eq.f32.partialorder %v4667_v38, %v1973_v58 }
0x1ab1   : > { %vm1986_vm2 = vcmp.eq.f32.partialorder %v4667_v38, %v1971_v61  ;;  %v5934_v62 = vsel %vm1987_vm1, 1e+30, %v5878_v12 }
0x1ab2   : > { %v5937_v0 = vsel %vm1986_vm2, 1e+30, %v5881_v13  ;;  %2004 = vmin.xlane.f32.xlu0 %v5934_v62 }
0x1ab3   : > { %2002 = vmin.xlane.f32.xlu1 %v5937_v0 }
0x1ab4   : > { %v1975_v1 = vpop.xlane.xlu1 %1974 }
0x1ab5   : > { %vm1988_vm3 = vcmp.eq.f32.partialorder %v4667_v38, %v1975_v1 }
0x1ab6   : > { %v5943_v2 = vsel %vm1988_vm3, 1e+30, %v5887_v15 }
0x1ab7   : > { %2006 = vmin.xlane.f32.xlu1 %v5943_v2 }
0x1ab8   : > { %v1979_v3 = vpop.xlane.xlu1 %1978  ;;  %v1977_v4 = vpop.xlane.xlu0 %1976 }
0x1ab9   : > { %vm1990_vm4 = vcmp.eq.f32.partialorder %v4667_v38, %v1979_v3  ;;  %vm1989_vm5 = vcmp.eq.f32.partialorder %v4667_v38, %v1977_v4 }
0x1aba   : > { %v5949_v5 = vsel %vm1990_vm4, 1e+30, %v5893_v18  ;;  %v5952_v6 = vsel %vm1989_vm5, 1e+30, %v5896_v19 }
0x1abb   : > { %2010 = vmin.xlane.f32.xlu1 %v5949_v5  ;;  %2008 = vmin.xlane.f32.xlu0 %v5952_v6 }
0x1abc   : > { %v1983_v7 = vpop.xlane.xlu1 %1982  ;;  %v1981_v8 = vpop.xlane.xlu0 %1980 }
0x1abd   : > { %vm1992_vm6 = vcmp.eq.f32.partialorder %v4667_v38, %v1983_v7  ;;  %vm1991_vm7 = vcmp.eq.f32.partialorder %v4667_v38, %v1981_v8 }
0x1abe   : > { %v5959_v9 = vsel %vm1992_vm6, 1e+30, %v5903_v22  ;;  %v5962_v10 = vsel %vm1991_vm7, 1e+30, %v5906_v23 }
0x1abf   : > { %2014 = vmin.xlane.f32.xlu1 %v5959_v9  ;;  %2012 = vmin.xlane.f32.xlu0 %v5962_v10 }
0x1ac0   : > { %v1985_v11 = vpop.xlane.xlu0 %1984 }
0x1ac1   : > { %vm1993_vm8 = vcmp.eq.f32.partialorder %v4667_v38, %v1985_v11 }
0x1ac2   : > { %v5968_v12 = vsel %vm1993_vm8, 1e+30, %v5912_v25 }
0x1ac3   : > { %2016 = vmin.xlane.f32.xlu0 %v5968_v12 }
0x1b3f   : > { %v2005_v13 = vpop.xlane.xlu0 %2004 }
0x1b40   : > { %v2003_v14 = vpop.xlane.xlu1 %2002  ;;  %vm2019_vm1 = vcmp.eq.f32.partialorder %v5934_v62, %v2005_v13 }
0x1b41   : > { %vm2018_vm2 = vcmp.eq.f32.partialorder %v5937_v0, %v2003_v14  ;;  %v2027_v15 = vsel %vm2019_vm1, %v4667_v38, 128.0 }
0x1b42   : > { %v2026_v16 = vsel %vm2018_vm2, %v4667_v38, 128.0  ;;  %2036 = vmin.xlane.f32.xlu0 %v2027_v15 }
0x1b43   : > { %2034 = vmin.xlane.f32.xlu1 %v2026_v16 }
0x1b44   : > { %v2007_v17 = vpop.xlane.xlu1 %2006 }
0x1b45   : > { %vm2020_vm3 = vcmp.eq.f32.partialorder %v5943_v2, %v2007_v17 }
0x1b46   : > { %v2028_v18 = vsel %vm2020_vm3, %v4667_v38, 128.0 }
0x1b47   : > { %2038 = vmin.xlane.f32.xlu1 %v2028_v18 }
0x1b48   : > { %v2011_v19 = vpop.xlane.xlu1 %2010  ;;  %v2009_v20 = vpop.xlane.xlu0 %2008 }
0x1b49   : > { %vm2022_vm4 = vcmp.eq.f32.partialorder %v5949_v5, %v2011_v19  ;;  %vm2021_vm5 = vcmp.eq.f32.partialorder %v5952_v6, %v2009_v20 }
0x1b4a   : > { %v2030_v21 = vsel %vm2022_vm4, %v4667_v38, 128.0  ;;  %v2029_v22 = vsel %vm2021_vm5, %v4667_v38, 128.0 }
0x1b4b   : > { %2042 = vmin.xlane.f32.xlu1 %v2030_v21  ;;  %2040 = vmin.xlane.f32.xlu0 %v2029_v22 }
0x1b4c   : > { %v2015_v23 = vpop.xlane.xlu1 %2014  ;;  %v2013_v24 = vpop.xlane.xlu0 %2012 }
0x1b4d   : > { %vm2024_vm6 = vcmp.eq.f32.partialorder %v5959_v9, %v2015_v23  ;;  %vm2023_vm7 = vcmp.eq.f32.partialorder %v5962_v10, %v2013_v24 }
0x1b4e   : > { %v2032_v25 = vsel %vm2024_vm6, %v4667_v38, 128.0  ;;  %v2031_v26 = vsel %vm2023_vm7, %v4667_v38, 128.0 }
0x1b4f   : > { %2046 = vmin.xlane.f32.xlu1 %v2032_v25  ;;  %2044 = vmin.xlane.f32.xlu0 %v2031_v26 }
0x1b50   : > { %v2017_v27 = vpop.xlane.xlu0 %2016 }
0x1b51   : > { %vm2025_vm8 = vcmp.eq.f32.partialorder %v5968_v12, %v2017_v27 }
0x1b52   : > { %v2033_v28 = vsel %vm2025_vm8, %v4667_v38, 128.0 }
0x1b53   : > { %2048 = vmin.xlane.f32.xlu0 %v2033_v28 }
0x1bcf   : > { %v2037_v29 = vpop.xlane.xlu0 %2036 }
0x1bd0   : > { %v2035_v32 = vpop.xlane.xlu1 %2034  ;;  %vm2051_vm1 = vcmp.eq.f32.partialorder %v4667_v38, %v2037_v29 }
0x1bd1   : > { %vm2050_vm2 = vcmp.eq.f32.partialorder %v4667_v38, %v2035_v32  ;;  %v5990_v33 = vsel %vm2051_vm1, 1e+30, %v5934_v62 }
0x1bd2   : > { %v5993_v35 = vsel %vm2050_vm2, 1e+30, %v5937_v0  ;;  %2068 = vmin.xlane.f32.xlu0 %v5990_v33 }
0x1bd3   : > { %2066 = vmin.xlane.f32.xlu1 %v5993_v35 }
0x1bd4   : > { %v2039_v39 = vpop.xlane.xlu1 %2038 }
0x1bd5   : > { %vm2052_vm3 = vcmp.eq.f32.partialorder %v4667_v38, %v2039_v39 }
0x1bd6   : > { %v5999_v40 = vsel %vm2052_vm3, 1e+30, %v5943_v2 }
0x1bd7   : > { %2070 = vmin.xlane.f32.xlu1 %v5999_v40 }
0x1bd8   : > { %v2043_v45 = vpop.xlane.xlu1 %2042  ;;  %v2041_v46 = vpop.xlane.xlu0 %2040 }
0x1bd9   : > { %vm2054_vm4 = vcmp.eq.f32.partialorder %v4667_v38, %v2043_v45  ;;  %vm2053_vm5 = vcmp.eq.f32.partialorder %v4667_v38, %v2041_v46 }
0x1bda   : > { %v6005_v47 = vsel %vm2054_vm4, 1e+30, %v5949_v5  ;;  %v6008_v50 = vsel %vm2053_vm5, 1e+30, %v5952_v6 }
0x1bdb   : > { %2074 = vmin.xlane.f32.xlu1 %v6005_v47  ;;  %2072 = vmin.xlane.f32.xlu0 %v6008_v50 }
0x1bdc   : > { %v2047_v51 = vpop.xlane.xlu1 %2046  ;;  %v2045_v54 = vpop.xlane.xlu0 %2044 }
0x1bdd   : > { %vm2056_vm6 = vcmp.eq.f32.partialorder %v4667_v38, %v2047_v51  ;;  %vm2055_vm7 = vcmp.eq.f32.partialorder %v4667_v38, %v2045_v54 }
0x1bde   : > { %v6015_v57 = vsel %vm2056_vm6, 1e+30, %v5959_v9  ;;  %v6018_v58 = vsel %vm2055_vm7, 1e+30, %v5962_v10 }
0x1bdf   : > { %2078 = vmin.xlane.f32.xlu1 %v6015_v57  ;;  %2076 = vmin.xlane.f32.xlu0 %v6018_v58 }
0x1be0   : > { %v2049_v61 = vpop.xlane.xlu0 %2048 }
0x1be1   : > { %vm2057_vm8 = vcmp.eq.f32.partialorder %v4667_v38, %v2049_v61 }
0x1be2   : > { %v6024_v62 = vsel %vm2057_vm8, 1e+30, %v5968_v12 }
0x1be3   : > { %2080 = vmin.xlane.f32.xlu0 %v6024_v62 }
0x1c5f   : > { %v2069_v0 = vpop.xlane.xlu0 %2068 }
0x1c60   : > { %v2067_v1 = vpop.xlane.xlu1 %2066  ;;  %vm2083_vm1 = vcmp.eq.f32.partialorder %v5990_v33, %v2069_v0 }
0x1c61   : > { %vm2082_vm2 = vcmp.eq.f32.partialorder %v5993_v35, %v2067_v1  ;;  %v2091_v2 = vsel %vm2083_vm1, %v4667_v38, 128.0 }
0x1c62   : > { %v2090_v3 = vsel %vm2082_vm2, %v4667_v38, 128.0  ;;  %2100 = vmin.xlane.f32.xlu0 %v2091_v2 }
0x1c63   : > { %2098 = vmin.xlane.f32.xlu1 %v2090_v3 }
0x1c64   : > { %v2071_v4 = vpop.xlane.xlu1 %2070 }
0x1c65   : > { %vm2084_vm3 = vcmp.eq.f32.partialorder %v5999_v40, %v2071_v4 }
0x1c66   : > { %v2092_v5 = vsel %vm2084_vm3, %v4667_v38, 128.0 }
0x1c67   : > { %2102 = vmin.xlane.f32.xlu1 %v2092_v5 }
0x1c68   : > { %v2075_v6 = vpop.xlane.xlu1 %2074  ;;  %v2073_v7 = vpop.xlane.xlu0 %2072 }
0x1c69   : > { %vm2086_vm4 = vcmp.eq.f32.partialorder %v6005_v47, %v2075_v6  ;;  %vm2085_vm5 = vcmp.eq.f32.partialorder %v6008_v50, %v2073_v7 }
0x1c6a   : > { %v2094_v8 = vsel %vm2086_vm4, %v4667_v38, 128.0  ;;  %v2093_v9 = vsel %vm2085_vm5, %v4667_v38, 128.0 }
0x1c6b   : > { %2106 = vmin.xlane.f32.xlu1 %v2094_v8  ;;  %2104 = vmin.xlane.f32.xlu0 %v2093_v9 }
0x1c6c   : > { %v2079_v10 = vpop.xlane.xlu1 %2078  ;;  %v2077_v11 = vpop.xlane.xlu0 %2076 }
0x1c6d   : > { %vm2088_vm6 = vcmp.eq.f32.partialorder %v6015_v57, %v2079_v10  ;;  %vm2087_vm7 = vcmp.eq.f32.partialorder %v6018_v58, %v2077_v11 }
0x1c6e   : > { %v2096_v12 = vsel %vm2088_vm6, %v4667_v38, 128.0  ;;  %v2095_v13 = vsel %vm2087_vm7, %v4667_v38, 128.0 }
0x1c6f   : > { %2110 = vmin.xlane.f32.xlu1 %v2096_v12  ;;  %2108 = vmin.xlane.f32.xlu0 %v2095_v13 }
0x1c70   : > { %v2081_v14 = vpop.xlane.xlu0 %2080 }
0x1c71   : > { %vm2089_vm8 = vcmp.eq.f32.partialorder %v6024_v62, %v2081_v14 }
0x1c72   : > { %v2097_v15 = vsel %vm2089_vm8, %v4667_v38, 128.0 }
0x1c73   : > { %2112 = vmin.xlane.f32.xlu0 %v2097_v15 }
0x1cef   : > { %v2101_v16 = vpop.xlane.xlu0 %2100 }
0x1cf0   : > { %v2099_v17 = vpop.xlane.xlu1 %2098  ;;  %vm2115_vm1 = vcmp.eq.f32.partialorder %v4667_v38, %v2101_v16 }
0x1cf1   : > { %vm2114_vm2 = vcmp.eq.f32.partialorder %v4667_v38, %v2099_v17  ;;  %v6046_v18 = vsel %vm2115_vm1, 1e+30, %v5990_v33 }
0x1cf2   : > { %v6049_v19 = vsel %vm2114_vm2, 1e+30, %v5993_v35  ;;  %2132 = vmin.xlane.f32.xlu0 %v6046_v18 }
0x1cf3   : > { %2130 = vmin.xlane.f32.xlu1 %v6049_v19 }
0x1cf4   : > { %v2103_v20 = vpop.xlane.xlu1 %2102 }
0x1cf5   : > { %vm2116_vm3 = vcmp.eq.f32.partialorder %v4667_v38, %v2103_v20 }
0x1cf6   : > { %v6055_v21 = vsel %vm2116_vm3, 1e+30, %v5999_v40 }
0x1cf7   : > { %2134 = vmin.xlane.f32.xlu1 %v6055_v21 }
0x1cf8   : > { %v2107_v22 = vpop.xlane.xlu1 %2106  ;;  %v2105_v23 = vpop.xlane.xlu0 %2104 }
0x1cf9   : > { %vm2118_vm4 = vcmp.eq.f32.partialorder %v4667_v38, %v2107_v22  ;;  %vm2117_vm5 = vcmp.eq.f32.partialorder %v4667_v38, %v2105_v23 }
0x1cfa   : > { %v6061_v24 = vsel %vm2118_vm4, 1e+30, %v6005_v47  ;;  %v6064_v25 = vsel %vm2117_vm5, 1e+30, %v6008_v50 }
0x1cfb   : > { %2138 = vmin.xlane.f32.xlu1 %v6061_v24  ;;  %2136 = vmin.xlane.f32.xlu0 %v6064_v25 }
0x1cfc   : > { %v2111_v26 = vpop.xlane.xlu1 %2110  ;;  %v2109_v27 = vpop.xlane.xlu0 %2108 }
0x1cfd   : > { %vm2120_vm6 = vcmp.eq.f32.partialorder %v4667_v38, %v2111_v26  ;;  %vm2119_vm7 = vcmp.eq.f32.partialorder %v4667_v38, %v2109_v27 }
0x1cfe   : > { %v6071_v28 = vsel %vm2120_vm6, 1e+30, %v6015_v57  ;;  %v6074_v29 = vsel %vm2119_vm7, 1e+30, %v6018_v58 }
0x1cff   : > { %2142 = vmin.xlane.f32.xlu1 %v6071_v28  ;;  %2140 = vmin.xlane.f32.xlu0 %v6074_v29 }
0x1d00   : > { %v2113_v32 = vpop.xlane.xlu0 %2112 }
0x1d01   : > { %vm2121_vm8 = vcmp.eq.f32.partialorder %v4667_v38, %v2113_v32 }
0x1d02   : > { %v6080_v33 = vsel %vm2121_vm8, 1e+30, %v6024_v62 }
0x1d03   : > { %2144 = vmin.xlane.f32.xlu0 %v6080_v33 }
0x1d7f   : > { %v2133_v35 = vpop.xlane.xlu0 %2132 }
0x1d80   : > { %v2131_v39 = vpop.xlane.xlu1 %2130  ;;  %vm2147_vm1 = vcmp.eq.f32.partialorder %v6046_v18, %v2133_v35 }
0x1d81   : > { %vm2146_vm2 = vcmp.eq.f32.partialorder %v6049_v19, %v2131_v39  ;;  %v2155_v40 = vsel %vm2147_vm1, %v4667_v38, 128.0 }
0x1d82   : > { %v2154_v45 = vsel %vm2146_vm2, %v4667_v38, 128.0  ;;  %2164 = vmin.xlane.f32.xlu0 %v2155_v40 }
0x1d83   : > { %2162 = vmin.xlane.f32.xlu1 %v2154_v45 }
0x1d84   : > { %v2135_v46 = vpop.xlane.xlu1 %2134 }
0x1d85   : > { %vm2148_vm3 = vcmp.eq.f32.partialorder %v6055_v21, %v2135_v46 }
0x1d86   : > { %v2156_v47 = vsel %vm2148_vm3, %v4667_v38, 128.0 }
0x1d87   : > { %2166 = vmin.xlane.f32.xlu1 %v2156_v47 }
0x1d88   : > { %v2139_v50 = vpop.xlane.xlu1 %2138  ;;  %v2137_v51 = vpop.xlane.xlu0 %2136 }
0x1d89   : > { %vm2150_vm4 = vcmp.eq.f32.partialorder %v6061_v24, %v2139_v50  ;;  %vm2149_vm5 = vcmp.eq.f32.partialorder %v6064_v25, %v2137_v51 }
0x1d8a   : > { %v2158_v54 = vsel %vm2150_vm4, %v4667_v38, 128.0  ;;  %v2157_v57 = vsel %vm2149_vm5, %v4667_v38, 128.0 }
0x1d8b   : > { %2170 = vmin.xlane.f32.xlu1 %v2158_v54  ;;  %2168 = vmin.xlane.f32.xlu0 %v2157_v57 }
0x1d8c   : > { %v2143_v58 = vpop.xlane.xlu1 %2142  ;;  %v2141_v61 = vpop.xlane.xlu0 %2140 }
0x1d8d   : > { %vm2152_vm6 = vcmp.eq.f32.partialorder %v6071_v28, %v2143_v58  ;;  %vm2151_vm7 = vcmp.eq.f32.partialorder %v6074_v29, %v2141_v61 }
0x1d8e   : > { %v2160_v62 = vsel %vm2152_vm6, %v4667_v38, 128.0  ;;  %v2159_v0 = vsel %vm2151_vm7, %v4667_v38, 128.0 }
0x1d8f   : > { %2174 = vmin.xlane.f32.xlu1 %v2160_v62  ;;  %2172 = vmin.xlane.f32.xlu0 %v2159_v0 }
0x1d90   : > { %v2145_v1 = vpop.xlane.xlu0 %2144 }
0x1d91   : > { %vm2153_vm8 = vcmp.eq.f32.partialorder %v6080_v33, %v2145_v1 }
0x1d92   : > { %v2161_v2 = vsel %vm2153_vm8, %v4667_v38, 128.0 }
0x1d93   : > { %2176 = vmin.xlane.f32.xlu0 %v2161_v2 }
0x1e0f   : > { %v2165_v3 = vpop.xlane.xlu0 %2164 }
0x1e10   : > { %v2163_v4 = vpop.xlane.xlu1 %2162  ;;  %vm2179_vm1 = vcmp.eq.f32.partialorder %v4667_v38, %v2165_v3 }
0x1e11   : > { %vm2178_vm2 = vcmp.eq.f32.partialorder %v4667_v38, %v2163_v4  ;;  %v6102_v5 = vsel %vm2179_vm1, 1e+30, %v6046_v18 }
0x1e12   : > { %v6105_v6 = vsel %vm2178_vm2, 1e+30, %v6049_v19  ;;  %2196 = vmin.xlane.f32.xlu0 %v6102_v5 }
0x1e13   : > { %2194 = vmin.xlane.f32.xlu1 %v6105_v6 }
0x1e14   : > { %v2167_v7 = vpop.xlane.xlu1 %2166 }
0x1e15   : > { %vm2180_vm3 = vcmp.eq.f32.partialorder %v4667_v38, %v2167_v7 }
0x1e16   : > { %v6111_v8 = vsel %vm2180_vm3, 1e+30, %v6055_v21 }
0x1e17   : > { %2198 = vmin.xlane.f32.xlu1 %v6111_v8 }
0x1e18   : > { %v2171_v9 = vpop.xlane.xlu1 %2170  ;;  %v2169_v10 = vpop.xlane.xlu0 %2168 }
0x1e19   : > { %vm2182_vm4 = vcmp.eq.f32.partialorder %v4667_v38, %v2171_v9  ;;  %vm2181_vm5 = vcmp.eq.f32.partialorder %v4667_v38, %v2169_v10 }
0x1e1a   : > { %v6117_v11 = vsel %vm2182_vm4, 1e+30, %v6061_v24  ;;  %v6120_v12 = vsel %vm2181_vm5, 1e+30, %v6064_v25 }
0x1e1b   : > { %2202 = vmin.xlane.f32.xlu1 %v6117_v11  ;;  %2200 = vmin.xlane.f32.xlu0 %v6120_v12 }
0x1e1c   : > { %v2175_v13 = vpop.xlane.xlu1 %2174  ;;  %v2173_v14 = vpop.xlane.xlu0 %2172 }
0x1e1d   : > { %vm2184_vm6 = vcmp.eq.f32.partialorder %v4667_v38, %v2175_v13  ;;  %vm2183_vm7 = vcmp.eq.f32.partialorder %v4667_v38, %v2173_v14 }
0x1e1e   : > { %v6127_v15 = vsel %vm2184_vm6, 1e+30, %v6071_v28  ;;  %v6130_v16 = vsel %vm2183_vm7, 1e+30, %v6074_v29 }
0x1e1f   : > { %2206 = vmin.xlane.f32.xlu1 %v6127_v15  ;;  %2204 = vmin.xlane.f32.xlu0 %v6130_v16 }
0x1e20   : > { %v2177_v17 = vpop.xlane.xlu0 %2176 }
0x1e21   : > { %vm2185_vm8 = vcmp.eq.f32.partialorder %v4667_v38, %v2177_v17 }
0x1e22   : > { %v6136_v18 = vsel %vm2185_vm8, 1e+30, %v6080_v33 }
0x1e23   : > { %2208 = vmin.xlane.f32.xlu0 %v6136_v18 }
0x1e9f   : > { %v2197_v19 = vpop.xlane.xlu0 %2196 }
0x1ea0   : > { %v2195_v20 = vpop.xlane.xlu1 %2194  ;;  %vm2211_vm1 = vcmp.eq.f32.partialorder %v6102_v5, %v2197_v19 }
0x1ea1   : > { %vm2210_vm2 = vcmp.eq.f32.partialorder %v6105_v6, %v2195_v20  ;;  %v2219_v21 = vsel %vm2211_vm1, %v4667_v38, 128.0 }
0x1ea2   : > { %v2218_v22 = vsel %vm2210_vm2, %v4667_v38, 128.0  ;;  %2228 = vmin.xlane.f32.xlu0 %v2219_v21 }
0x1ea3   : > { %2226 = vmin.xlane.f32.xlu1 %v2218_v22 }
0x1ea4   : > { %v2199_v23 = vpop.xlane.xlu1 %2198 }
0x1ea5   : > { %vm2212_vm3 = vcmp.eq.f32.partialorder %v6111_v8, %v2199_v23 }
0x1ea6   : > { %v2220_v24 = vsel %vm2212_vm3, %v4667_v38, 128.0 }
0x1ea7   : > { %2230 = vmin.xlane.f32.xlu1 %v2220_v24 }
0x1ea8   : > { %v2203_v25 = vpop.xlane.xlu1 %2202  ;;  %v2201_v26 = vpop.xlane.xlu0 %2200 }
0x1ea9   : > { %vm2214_vm4 = vcmp.eq.f32.partialorder %v6117_v11, %v2203_v25  ;;  %vm2213_vm5 = vcmp.eq.f32.partialorder %v6120_v12, %v2201_v26 }
0x1eaa   : > { %v2222_v27 = vsel %vm2214_vm4, %v4667_v38, 128.0  ;;  %v2221_v28 = vsel %vm2213_vm5, %v4667_v38, 128.0 }
0x1eab   : > { %2234 = vmin.xlane.f32.xlu1 %v2222_v27  ;;  %2232 = vmin.xlane.f32.xlu0 %v2221_v28 }
0x1eac   : > { %v2207_v29 = vpop.xlane.xlu1 %2206  ;;  %v2205_v32 = vpop.xlane.xlu0 %2204 }
0x1ead   : > { %vm2216_vm6 = vcmp.eq.f32.partialorder %v6127_v15, %v2207_v29  ;;  %vm2215_vm7 = vcmp.eq.f32.partialorder %v6130_v16, %v2205_v32 }
0x1eae   : > { %v2224_v33 = vsel %vm2216_vm6, %v4667_v38, 128.0  ;;  %v2223_v35 = vsel %vm2215_vm7, %v4667_v38, 128.0 }
0x1eaf   : > { %2238 = vmin.xlane.f32.xlu1 %v2224_v33  ;;  %2236 = vmin.xlane.f32.xlu0 %v2223_v35 }
0x1eb0   : > { %v2209_v39 = vpop.xlane.xlu0 %2208 }
0x1eb1   : > { %vm2217_vm8 = vcmp.eq.f32.partialorder %v6136_v18, %v2209_v39 }
0x1eb2   : > { %v2225_v40 = vsel %vm2217_vm8, %v4667_v38, 128.0 }
0x1eb3   : > { %2240 = vmin.xlane.f32.xlu0 %v2225_v40 }
0x1f2f   : > { %v2229_v45 = vpop.xlane.xlu0 %2228 }
0x1f30   : > { %v2227_v46 = vpop.xlane.xlu1 %2226  ;;  %vm2243_vm1 = vcmp.eq.f32.partialorder %v4667_v38, %v2229_v45 }
0x1f31   : > { %vm2242_vm2 = vcmp.eq.f32.partialorder %v4667_v38, %v2227_v46  ;;  %v6158_v47 = vsel %vm2243_vm1, 1e+30, %v6102_v5 }
0x1f32   : > { %v6161_v50 = vsel %vm2242_vm2, 1e+30, %v6105_v6  ;;  %2260 = vmin.xlane.f32.xlu0 %v6158_v47 }
0x1f33   : > { %2258 = vmin.xlane.f32.xlu1 %v6161_v50 }
0x1f34   : > { %v2231_v51 = vpop.xlane.xlu1 %2230 }
0x1f35   : > { %vm2244_vm3 = vcmp.eq.f32.partialorder %v4667_v38, %v2231_v51 }
0x1f36   : > { %v6167_v54 = vsel %vm2244_vm3, 1e+30, %v6111_v8 }
0x1f37   : > { %2262 = vmin.xlane.f32.xlu1 %v6167_v54 }
0x1f38   : > { %v2235_v57 = vpop.xlane.xlu1 %2234  ;;  %v2233_v58 = vpop.xlane.xlu0 %2232 }
0x1f39   : > { %vm2246_vm4 = vcmp.eq.f32.partialorder %v4667_v38, %v2235_v57  ;;  %vm2245_vm5 = vcmp.eq.f32.partialorder %v4667_v38, %v2233_v58 }
0x1f3a   : > { %v6173_v61 = vsel %vm2246_vm4, 1e+30, %v6117_v11  ;;  %v6176_v62 = vsel %vm2245_vm5, 1e+30, %v6120_v12 }
0x1f3b   : > { %2266 = vmin.xlane.f32.xlu1 %v6173_v61  ;;  %2264 = vmin.xlane.f32.xlu0 %v6176_v62 }
0x1f3c   : > { %v2239_v0 = vpop.xlane.xlu1 %2238  ;;  %v2237_v1 = vpop.xlane.xlu0 %2236 }
0x1f3d   : > { %vm2248_vm6 = vcmp.eq.f32.partialorder %v4667_v38, %v2239_v0  ;;  %vm2247_vm7 = vcmp.eq.f32.partialorder %v4667_v38, %v2237_v1 }
0x1f3e   : > { %v6183_v2 = vsel %vm2248_vm6, 1e+30, %v6127_v15  ;;  %v6186_v3 = vsel %vm2247_vm7, 1e+30, %v6130_v16 }
0x1f3f   : > { %2270 = vmin.xlane.f32.xlu1 %v6183_v2  ;;  %2268 = vmin.xlane.f32.xlu0 %v6186_v3 }
0x1f40   : > { %v2241_v4 = vpop.xlane.xlu0 %2240 }
0x1f41   : > { %vm2249_vm8 = vcmp.eq.f32.partialorder %v4667_v38, %v2241_v4 }
0x1f42   : > { %v6192_v5 = vsel %vm2249_vm8, 1e+30, %v6136_v18 }
0x1f43   : > { %2272 = vmin.xlane.f32.xlu0 %v6192_v5 }
0x1fbf   : > { %v2261_v6 = vpop.xlane.xlu0 %2260 }
0x1fc0   : > { %v2259_v7 = vpop.xlane.xlu1 %2258  ;;  %vm2275_vm1 = vcmp.eq.f32.partialorder %v6158_v47, %v2261_v6 }
0x1fc1   : > { %vm2274_vm2 = vcmp.eq.f32.partialorder %v6161_v50, %v2259_v7  ;;  %v2283_v8 = vsel %vm2275_vm1, %v4667_v38, 128.0 }
0x1fc2   : > { %v2282_v9 = vsel %vm2274_vm2, %v4667_v38, 128.0  ;;  %2292 = vmin.xlane.f32.xlu0 %v2283_v8 }
0x1fc3   : > { %2290 = vmin.xlane.f32.xlu1 %v2282_v9 }
0x1fc4   : > { %v2263_v10 = vpop.xlane.xlu1 %2262 }
0x1fc5   : > { %vm2276_vm3 = vcmp.eq.f32.partialorder %v6167_v54, %v2263_v10 }
0x1fc6   : > { %v2284_v11 = vsel %vm2276_vm3, %v4667_v38, 128.0 }
0x1fc7   : > { %2294 = vmin.xlane.f32.xlu1 %v2284_v11 }
0x1fc8   : > { %v2267_v12 = vpop.xlane.xlu1 %2266  ;;  %v2265_v13 = vpop.xlane.xlu0 %2264 }
0x1fc9   : > { %vm2278_vm4 = vcmp.eq.f32.partialorder %v6173_v61, %v2267_v12  ;;  %vm2277_vm5 = vcmp.eq.f32.partialorder %v6176_v62, %v2265_v13 }
0x1fca   : > { %v2286_v14 = vsel %vm2278_vm4, %v4667_v38, 128.0  ;;  %v2285_v15 = vsel %vm2277_vm5, %v4667_v38, 128.0 }
0x1fcb   : > { %2298 = vmin.xlane.f32.xlu1 %v2286_v14  ;;  %2296 = vmin.xlane.f32.xlu0 %v2285_v15 }
0x1fcc   : > { %v2271_v16 = vpop.xlane.xlu1 %2270  ;;  %v2269_v17 = vpop.xlane.xlu0 %2268 }
0x1fcd   : > { %vm2280_vm6 = vcmp.eq.f32.partialorder %v6183_v2, %v2271_v16  ;;  %vm2279_vm7 = vcmp.eq.f32.partialorder %v6186_v3, %v2269_v17 }
0x1fce   : > { %v2288_v18 = vsel %vm2280_vm6, %v4667_v38, 128.0  ;;  %v2287_v19 = vsel %vm2279_vm7, %v4667_v38, 128.0 }
0x1fcf   : > { %2302 = vmin.xlane.f32.xlu1 %v2288_v18  ;;  %2300 = vmin.xlane.f32.xlu0 %v2287_v19 }
0x1fd0   : > { %v2273_v20 = vpop.xlane.xlu0 %2272 }
0x1fd1   : > { %vm2281_vm8 = vcmp.eq.f32.partialorder %v6192_v5, %v2273_v20 }
0x1fd2   : > { %v2289_v21 = vsel %vm2281_vm8, %v4667_v38, 128.0 }
0x1fd3   : > { %2304 = vmin.xlane.f32.xlu0 %v2289_v21 }
0x204f   : > { %v2293_v22 = vpop.xlane.xlu0 %2292 }
0x2050   : > { %v2291_v23 = vpop.xlane.xlu1 %2290  ;;  %vm2307_vm1 = vcmp.eq.f32.partialorder %v4667_v38, %v2293_v22 }
0x2051   : > { %vm2306_vm2 = vcmp.eq.f32.partialorder %v4667_v38, %v2291_v23  ;;  %v6214_v24 = vsel %vm2307_vm1, 1e+30, %v6158_v47 }
0x2052   : > { %v6217_v25 = vsel %vm2306_vm2, 1e+30, %v6161_v50  ;;  %2324 = vmin.xlane.f32.xlu0 %v6214_v24 }
0x2053   : > { %2322 = vmin.xlane.f32.xlu1 %v6217_v25 }
0x2054   : > { %v2295_v26 = vpop.xlane.xlu1 %2294 }
0x2055   : > { %vm2308_vm3 = vcmp.eq.f32.partialorder %v4667_v38, %v2295_v26  ;;  %v2830_v26 = vld [vmem:[#allocation10 + $0x8] sm:$0xff] }
0x2056   : > { %v6223_v27 = vsel %vm2308_vm3, 1e+30, %v6167_v54 }
0x2057   : > { %2326 = vmin.xlane.f32.xlu1 %v6223_v27 }
0x2058   : > { %v2299_v28 = vpop.xlane.xlu1 %2298  ;;  %v2297_v29 = vpop.xlane.xlu0 %2296 }
0x2059   : > { %vm2310_vm4 = vcmp.eq.f32.partialorder %v4667_v38, %v2299_v28  ;;  %vm2309_vm5 = vcmp.eq.f32.partialorder %v4667_v38, %v2297_v29  ;;  %v2832_v29 = vld [vmem:[#allocation10 + $0x18] sm:$0xff] }
0x205a   : > { %v6229_v32 = vsel %vm2310_vm4, 1e+30, %v6173_v61  ;;  %v6232_v33 = vsel %vm2309_vm5, 1e+30, %v6176_v62 }
0x205b   : > { %2330 = vmin.xlane.f32.xlu1 %v6229_v32  ;;  %2328 = vmin.xlane.f32.xlu0 %v6232_v33 }
0x205c   : > { %v2303_v35 = vpop.xlane.xlu1 %2302  ;;  %v2301_v39 = vpop.xlane.xlu0 %2300 }
0x205d   : > { %vm2312_vm6 = vcmp.eq.f32.partialorder %v4667_v38, %v2303_v35  ;;  %vm2311_vm7 = vcmp.eq.f32.partialorder %v4667_v38, %v2301_v39  ;;  %v2833_v35 = vld [vmem:[#allocation10 + $0x20] sm:$0xff]  ;;  %v2834_v39 = vld [vmem:[#allocation10 + $0x28] sm:$0xff] }
0x205e   : > { %v6239_v40 = vsel %vm2312_vm6, 1e+30, %v6183_v2  ;;  %v6242_v45 = vsel %vm2311_vm7, 1e+30, %v6186_v3 }
0x205f   : > { %2334 = vmin.xlane.f32.xlu1 %v6239_v40  ;;  %2332 = vmin.xlane.f32.xlu0 %v6242_v45 }
0x2060   : > { %v2305_v46 = vpop.xlane.xlu0 %2304 }
0x2061   : > { %vm2313_vm8 = vcmp.eq.f32.partialorder %v4667_v38, %v2305_v46  ;;  %v2836_v46 = vld [vmem:[#allocation10 + $0x38] sm:$0xff] }
0x2062   : > { %v6248_v47 = vsel %vm2313_vm8, 1e+30, %v6192_v5 }
0x2063   : > { %2336 = vmin.xlane.f32.xlu0 %v6248_v47 }
0x20df   : > { %v2325_v50 = vpop.xlane.xlu0 %2324 }
0x20e0   : > { %v2323_v51 = vpop.xlane.xlu1 %2322  ;;  %vm2339_vm1 = vcmp.eq.f32.partialorder %v6214_v24, %v2325_v50  ;;  %v2837_v50 = vld [vmem:[#allocation10 + $0x40] sm:$0xff] }
0x20e1   : > { %vm2338_vm2 = vcmp.eq.f32.partialorder %v6217_v25, %v2323_v51  ;;  %v2347_v54 = vsel %vm2339_vm1, %v4667_v38, 128.0  ;;  %v2838_v51 = vld [vmem:[#allocation10 + $0x48] sm:$0xff] }
0x20e2   : > { %v2346_v57 = vsel %vm2338_vm2, %v4667_v38, 128.0  ;;  %2356 = vmin.xlane.f32.xlu0 %v2347_v54  ;;  %v3714_v54 = vpack.c.bf16 %v2838_v51, %v2837_v50 }
0x20e3   : > { %2354 = vmin.xlane.f32.xlu1 %v2346_v57  ;;  %v2839_v57 = vld [vmem:[#allocation10 + $0x50] sm:$0xff] }
0x20e4   : > { %v2327_v58 = vpop.xlane.xlu1 %2326 }
0x20e5   : > { %vm2340_vm3 = vcmp.eq.f32.partialorder %v6223_v27, %v2327_v58  ;;  %v2840_v58 = vld [vmem:[#allocation10 + $0x58] sm:$0xff] }
0x20e6   : > { %v2348_v61 = vsel %vm2340_vm3, %v4667_v38, 128.0 }
0x20e7   : > { %2358 = vmin.xlane.f32.xlu1 %v2348_v61  ;;  %v3718_v61 = vpack.c.bf16 %v2840_v58, %v2839_v57 }
0x20e8   : > { %v2331_v62 = vpop.xlane.xlu1 %2330  ;;  %v2329_v0 = vpop.xlane.xlu0 %2328 }
0x20e9   : > { %vm2342_vm4 = vcmp.eq.f32.partialorder %v6229_v32, %v2331_v62  ;;  %vm2341_vm5 = vcmp.eq.f32.partialorder %v6232_v33, %v2329_v0  ;;  %v2841_v62 = vld [vmem:[#allocation10 + $0x60] sm:$0xff]  ;;  %v2842_v0 = vld [vmem:[#allocation10 + $0x68] sm:$0xff] }
0x20ea   : > { %v2350_v1 = vsel %vm2342_vm4, %v4667_v38, 128.0  ;;  %v2349_v2 = vsel %vm2341_vm5, %v4667_v38, 128.0 }
0x20eb   : > { %2362 = vmin.xlane.f32.xlu1 %v2350_v1  ;;  %2360 = vmin.xlane.f32.xlu0 %v2349_v2  ;;  %v3722_v1 = vpack.c.bf16 %v2842_v0, %v2841_v62  ;;  %v2843_v2 = vld [vmem:[#allocation10 + $0x70] sm:$0xff]  ;;  %v2826_v0 = vld [vmem:[%s6308_s26 + $0x28] sm:$0xff] }
0x20ec   : > { %v2335_v3 = vpop.xlane.xlu1 %2334  ;;  %v2333_v4 = vpop.xlane.xlu0 %2332 }
0x20ed   : > { %vm2344_vm6 = vcmp.eq.f32.partialorder %v6239_v40, %v2335_v3  ;;  %vm2343_vm7 = vcmp.eq.f32.partialorder %v6242_v45, %v2333_v4  ;;  %v2844_v3 = vld [vmem:[#allocation10 + $0x78] sm:$0xff] }
0x20ee   : > { %v2352_v5 = vsel %vm2344_vm6, %v4667_v38, 128.0  ;;  %v2351_v6 = vsel %vm2343_vm7, %v4667_v38, 128.0  ;;  %v3726_v4 = vpack.c.bf16 %v2844_v3, %v2843_v2 }
0x20ef   : > { %2366 = vmin.xlane.f32.xlu1 %v2352_v5  ;;  %2364 = vmin.xlane.f32.xlu0 %v2351_v6  ;;  %v2822_v5 = vld [vmem:[%s6308_s26 + $0x8] sm:$0xff] }
0x20f0   : > { %v2337_v7 = vpop.xlane.xlu0 %2336 }
0x20f1   : > { %vm2345_vm8 = vcmp.eq.f32.partialorder %v6248_v47, %v2337_v7 }
0x20f2   : > { %v2353_v8 = vsel %vm2345_vm8, %v4667_v38, 128.0 }
0x20f3   : > { %2368 = vmin.xlane.f32.xlu0 %v2353_v8 }
0x216f   : > { %v2357_v9 = vpop.xlane.xlu0 %2356 }
0x2170   : > { %v2355_v10 = vpop.xlane.xlu1 %2354  ;;  %vm2371_vm1 = vcmp.eq.f32.partialorder %v4667_v38, %v2357_v9 }
0x2171   : > { %vm2370_vm2 = vcmp.eq.f32.partialorder %v4667_v38, %v2355_v10  ;;  %v6270_v11 = vsel %vm2371_vm1, 1e+30, %v6214_v24 }
0x2172   : > { %v6273_v12 = vsel %vm2370_vm2, 1e+30, %v6217_v25  ;;  %2388 = vmin.xlane.f32.xlu0 %v6270_v11  ;;  %v2829_v25 = vld [vmem:[#allocation10] sm:$0xff] }
0x2173   : > { %2386 = vmin.xlane.f32.xlu1 %v6273_v12  ;;  %v3698_v28 = vpack.c.bf16 %v2830_v26, %v2829_v25 }
0x2174   : > { %v2359_v13 = vpop.xlane.xlu1 %2358 }
0x2175   : > { %vm2372_vm3 = vcmp.eq.f32.partialorder %v4667_v38, %v2359_v13  ;;  %3699 = vmatprep.subr.bf16.mxu1 %v3698_v28 }
0x2176   : > { %v6279_v14 = vsel %vm2372_vm3, 1e+30, %v6223_v27  ;;  %v2831_v27 = vld [vmem:[#allocation10 + $0x10] sm:$0xff]  ;;  %3701 = vmatpush3.bf16.xpose.msra.mxu1 %v3698_v28 }
0x2177   : > { %2390 = vmin.xlane.f32.xlu1 %v6279_v14 }
0x2178   : > { %v2363_v15 = vpop.xlane.xlu1 %2362  ;;  %v2361_v16 = vpop.xlane.xlu0 %2360 }
0x2179   : > { %vm2374_vm4 = vcmp.eq.f32.partialorder %v4667_v38, %v2363_v15  ;;  %vm2373_vm5 = vcmp.eq.f32.partialorder %v4667_v38, %v2361_v16 }
0x217a   : > { %v6285_v17 = vsel %vm2374_vm4, 1e+30, %v6229_v32  ;;  %v6288_v18 = vsel %vm2373_vm5, 1e+30, %v6232_v33  ;;  %v3702_v32 = vpack.c.bf16 %v2832_v29, %v2831_v27  ;;  %v2821_v33 = vld [vmem:[%s6308_s26] sm:$0xff] }
0x217b   : > { %2394 = vmin.xlane.f32.xlu1 %v6285_v17  ;;  %2392 = vmin.xlane.f32.xlu0 %v6288_v18 }
0x217c   : > { %v2367_v19 = vpop.xlane.xlu1 %2366  ;;  %v2365_v20 = vpop.xlane.xlu0 %2364  ;;  %3703 = vmatprep.subr.bf16.mxu1 %v3702_v32  ;;  %3654 = vmatprep.mubr.f32.mxu1 %v2821_v33  ;;  %v2824_v33 = vld [vmem:[%s6308_s26 + $0x18] sm:$0xff] }
0x217d   : > { %vm2376_vm6 = vcmp.eq.f32.partialorder %v4667_v38, %v2367_v19  ;;  %vm2375_vm7 = vcmp.eq.f32.partialorder %v4667_v38, %v2365_v20 }
0x217e   : > { %v6295_v21 = vsel %vm2376_vm6, 1e+30, %v6239_v40  ;;  %v6298_v22 = vsel %vm2375_vm7, 1e+30, %v6242_v45  ;;  %v3706_v40 = vpack.c.bf16 %v2834_v39, %v2833_v35  ;;  %3705 = vmatpush3.bf16.xpose.msra.mxu1 %v3702_v32  ;;  %v2835_v45 = vld [vmem:[#allocation10 + $0x30] sm:$0xff] }
0x217f   : > { %2398 = vmin.xlane.f32.xlu1 %v6295_v21  ;;  %2396 = vmin.xlane.f32.xlu0 %v6298_v22  ;;  %v2823_v32 = vld [vmem:[%s6308_s26 + $0x10] sm:$0xff] }
0x2180   : > { %v2369_v23 = vpop.xlane.xlu0 %2368  ;;  %3707 = vmatprep.subr.bf16.mxu1 %v3706_v40 }
0x2181   : > { %vm2377_vm8 = vcmp.eq.f32.partialorder %v4667_v38, %v2369_v23 }
0x2182   : > { %v6304_v24 = vsel %vm2377_vm8, 1e+30, %v6248_v47  ;;  %v3710_v47 = vpack.c.bf16 %v2836_v46, %v2835_v45 }
0x2183   : > { %2400 = vmin.xlane.f32.xlu0 %v6304_v24 }
0x2186   : > { %3709 = vmatpush3.bf16.xpose.msra.mxu1 %v3706_v40 }
0x2187   : > { %3711 = vmatprep.subr.bf16.mxu1 %v3710_v47 }
0x218e   : > { %3713 = vmatpush3.bf16.xpose.msra.mxu1 %v3710_v47 }
0x218f   : > { %3715 = vmatprep.subr.bf16.mxu1 %v3714_v54 }
0x2196   : > { %3717 = vmatpush3.bf16.xpose.msra.mxu1 %v3714_v54 }
0x2197   : > { %3719 = vmatprep.subr.bf16.mxu1 %v3718_v61 }
0x219e   : > { %3721 = vmatpush3.bf16.xpose.msra.mxu1 %v3718_v61 }
0x219f   : > { %3723 = vmatprep.subr.bf16.mxu1 %v3722_v1 }
0x21a6   : > { %3725 = vmatpush3.bf16.xpose.msra.mxu1 %v3722_v1 }
0x21a7   : > { %3727 = vmatprep.subr.bf16.mxu1 %v3726_v4 }
0x21ae   : > { %3729 = vmatpush3.bf16.xpose.msra.mxu1 %v3726_v4 }
0x21b5   : > { %3655 = vmatmul.mubr.f32.vlgmr.msra.gmra.mrb[0].mxu1 %v2822_v5 }
0x21b6   : > { %3657 = vmatprep.mubr.f32.mxu1 %v2823_v32 }
0x21b9   : > { %3658 = vmatmul.mubr.f32.gmra.mrb[2].mxu1 %v2824_v33 }
0x21ff   : > { %v2389_v6 = vpop.xlane.xlu0 %2388 }
0x2200   : > { %v2387_v7 = vpop.xlane.xlu1 %2386  ;;  %vm2403_vm1 = vcmp.eq.f32.partialorder %v6270_v11, %v2389_v6 }
0x2201   : > { %vm2402_vm2 = vcmp.eq.f32.partialorder %v6273_v12, %v2387_v7  ;;  %v2411_v8 = vsel %vm2403_vm1, %v4667_v38, 128.0 }
0x2202   : > { %v2410_v9 = vsel %vm2402_vm2, %v4667_v38, 128.0  ;;  %2420 = vmin.xlane.f32.xlu0 %v2411_v8 }
0x2203   : > { %2418 = vmin.xlane.f32.xlu1 %v2410_v9 }
0x2204   : > { %v2391_v10 = vpop.xlane.xlu1 %2390 }
0x2205   : > { %vm2404_vm3 = vcmp.eq.f32.partialorder %v6279_v14, %v2391_v10 }
0x2206   : > { %v2412_v13 = vsel %vm2404_vm3, %v4667_v38, 128.0 }
0x2207   : > { %2422 = vmin.xlane.f32.xlu1 %v2412_v13 }
0x2208   : > { %v2395_v15 = vpop.xlane.xlu1 %2394  ;;  %v2393_v16 = vpop.xlane.xlu0 %2392 }
0x2209   : > { %vm2406_vm4 = vcmp.eq.f32.partialorder %v6285_v17, %v2395_v15  ;;  %vm2405_vm5 = vcmp.eq.f32.partialorder %v6288_v18, %v2393_v16 }
0x220a   : > { %v2414_v19 = vsel %vm2406_vm4, %v4667_v38, 128.0  ;;  %v2413_v20 = vsel %vm2405_vm5, %v4667_v38, 128.0 }
0x220b   : > { %2426 = vmin.xlane.f32.xlu1 %v2414_v19  ;;  %2424 = vmin.xlane.f32.xlu0 %v2413_v20 }
0x220c   : > { %v2399_v23 = vpop.xlane.xlu1 %2398  ;;  %v2397_v25 = vpop.xlane.xlu0 %2396 }
0x220d   : > { %vm2408_vm6 = vcmp.eq.f32.partialorder %v6295_v21, %v2399_v23  ;;  %vm2407_vm7 = vcmp.eq.f32.partialorder %v6298_v22, %v2397_v25  ;;  %v2951_v23 = vld [vmem:[%s4594_s22 + $0x8] sm:$0xff] }
0x220e   : > { %v2416_v26 = vsel %vm2408_vm6, %v4667_v38, 128.0  ;;  %v2415_v27 = vsel %vm2407_vm7, %v4667_v38, 128.0 }
0x220f   : > { %2430 = vmin.xlane.f32.xlu1 %v2416_v26  ;;  %2428 = vmin.xlane.f32.xlu0 %v2415_v27  ;;  %v2952_v26 = vld [vmem:[%s4594_s22 + $0x10] sm:$0xff] }
0x2210   : > { %v2401_v28 = vpop.xlane.xlu0 %2400 }
0x2211   : > { %vm2409_vm8 = vcmp.eq.f32.partialorder %v6304_v24, %v2401_v28  ;;  %v2827_v28 = vld [vmem:[%s6308_s26 + $0x30] sm:$0xff] }
0x2212   : > { %v2417_v29 = vsel %vm2409_vm8, %v4667_v38, 128.0 }
0x2213   : > { %2432 = vmin.xlane.f32.xlu0 %v2417_v29  ;;  %v2828_v29 = vld [vmem:[%s6308_s26 + $0x38] sm:$0xff] }
0x2288   : > { %v6370_v61 = vpop.f32.mrb[0].mxu1 }
0x2289   : > { %v6372_v62 = vpop.f32.mrb[1].mxu1 }
0x228c   : > { %v6394_v25 = vpop.f32.mrb[2].mxu1 }
0x228d   : > { %v6397_v27 = vpop.f32.mrb[3].mxu1 }
0x228f   : > { %v2421_v35 = vpop.xlane.xlu0 %2420 }
0x2290   : > { %v2419_v39 = vpop.xlane.xlu1 %2418  ;;  %vm2435_vm1 = vcmp.eq.f32.partialorder %v4667_v38, %v2421_v35 }
0x2291   : > { %vm2434_vm2 = vcmp.eq.f32.partialorder %v4667_v38, %v2419_v39  ;;  %v6333_v40 = vsel %vm2435_vm1, 1e+30, %v6270_v11 }
0x2292   : > { %v6336_v45 = vsel %vm2434_vm2, 1e+30, %v6273_v12  ;;  %2452 = vmin.xlane.f32.xlu0 %v6333_v40 }
0x2293   : > { %2450 = vmin.xlane.f32.xlu1 %v6336_v45 }
0x2294   : > { %v2423_v46 = vpop.xlane.xlu1 %2422 }
0x2295   : > { %vm2436_vm3 = vcmp.eq.f32.partialorder %v4667_v38, %v2423_v46 }
0x2296   : > { %v6342_v47 = vsel %vm2436_vm3, 1e+30, %v6279_v14 }
0x2297   : > { %2454 = vmin.xlane.f32.xlu1 %v6342_v47 }
0x2298   : > { %v2427_v50 = vpop.xlane.xlu1 %2426  ;;  %v2425_v51 = vpop.xlane.xlu0 %2424 }
0x2299   : > { %vm2438_vm4 = vcmp.eq.f32.partialorder %v4667_v38, %v2427_v50  ;;  %vm2437_vm5 = vcmp.eq.f32.partialorder %v4667_v38, %v2425_v51 }
0x229a   : > { %v6348_v11 = vsel %vm2438_vm4, 1e+30, %v6285_v17  ;;  %v6351_v12 = vsel %vm2437_vm5, 1e+30, %v6288_v18 }
0x229b   : > { %2458 = vmin.xlane.f32.xlu1 %v6348_v11  ;;  %2456 = vmin.xlane.f32.xlu0 %v6351_v12 }
0x229c   : > { %v2431_v14 = vpop.xlane.xlu1 %2430  ;;  %v2429_v54 = vpop.xlane.xlu0 %2428 }
0x229d   : > { %vm2440_vm6 = vcmp.eq.f32.partialorder %v4667_v38, %v2431_v14  ;;  %vm2439_vm7 = vcmp.eq.f32.partialorder %v4667_v38, %v2429_v54 }
0x229e   : > { %v6358_v57 = vsel %vm2440_vm6, 1e+30, %v6295_v21  ;;  %v6361_v17 = vsel %vm2439_vm7, 1e+30, %v6298_v22  ;;  %v2950_v21 = vld [vmem:[%s4594_s22] sm:$0xff] }
0x229f   : > { %2462 = vmin.xlane.f32.xlu1 %v6358_v57  ;;  %2460 = vmin.xlane.f32.xlu0 %v6361_v17  ;;  %v2825_v22 = vld [vmem:[%s6308_s26 + $0x20] sm:$0xff] }
0x22a0   : > { %v2433_v18 = vpop.xlane.xlu0 %2432  ;;  %3660 = vmatprep.mubr.f32.mxu1 %v2825_v22 }
0x22a1   : > { %vm2441_vm8 = vcmp.eq.f32.partialorder %v4667_v38, %v2433_v18  ;;  %3661 = vmatmul.mubr.f32.gmra.mrb[4].mxu1 %v2826_v0  ;;  %v2953_v0 = vld [vmem:[%s4594_s22 + $0x18] sm:$0xff] }
0x22a2   : > { %v6367_v58 = vsel %vm2441_vm8, 1e+30, %v6304_v24  ;;  %3663 = vmatprep.mubr.f32.mxu1 %v2827_v28 }
0x22a3   : > { %2464 = vmin.xlane.f32.xlu0 %v6367_v58 }
0x22a5   : > { %3664 = vmatmul.mubr.f32.gmra.mrb[6].mxu1 %v2828_v29  ;;  %v2956_v29 = vld [vmem:[%s4594_s22 + $0x30] sm:$0xff] }
0x22b9   : > { %2961 = vperm.xlu0 %3828, %v2950_v21  }
0x231f   : > { %v2453_v1 = vpop.xlane.xlu0 %2452 }
0x2320   : > { %v2451_v2 = vpop.xlane.xlu1 %2450  ;;  %vm2467_vm1 = vcmp.eq.f32.partialorder %v6333_v40, %v2453_v1  ;;  %v2954_v1 = vld [vmem:[%s4594_s22 + $0x20] sm:$0xff] }
0x2321   : > { %vm2466_vm2 = vcmp.eq.f32.partialorder %v6336_v45, %v2451_v2  ;;  %v2475_v24 = vsel %vm2467_vm1, %v4667_v38, 128.0  ;;  %v2955_v2 = vld [vmem:[%s4594_s22 + $0x28] sm:$0xff] }
0x2322   : > { %v2474_v3 = vsel %vm2466_vm2, %v4667_v38, 128.0  ;;  %2484 = vmin.xlane.f32.xlu0 %v2475_v24 }
0x2323   : > { %2482 = vmin.xlane.f32.xlu1 %v2474_v3 }
0x2324   : > { %v2455_v4 = vpop.xlane.xlu1 %2454 }
0x2325   : > { %vm2468_vm3 = vcmp.eq.f32.partialorder %v6342_v47, %v2455_v4 }
0x2326   : > { %v2476_v5 = vsel %vm2468_vm3, %v4667_v38, 128.0 }
0x2327   : > { %2486 = vmin.xlane.f32.xlu1 %v2476_v5 }
0x2328   : > { %v2459_v6 = vpop.xlane.xlu1 %2458  ;;  %v2457_v7 = vpop.xlane.xlu0 %2456 }
0x2329   : > { %vm2470_vm4 = vcmp.eq.f32.partialorder %v6348_v11, %v2459_v6  ;;  %vm2469_vm5 = vcmp.eq.f32.partialorder %v6351_v12, %v2457_v7 }
0x232a   : > { %v2478_v8 = vsel %vm2470_vm4, %v4667_v38, 128.0  ;;  %v2477_v9 = vsel %vm2469_vm5, %v4667_v38, 128.0 }
0x232b   : > { %2490 = vmin.xlane.f32.xlu1 %v2478_v8  ;;  %2488 = vmin.xlane.f32.xlu0 %v2477_v9 }
0x232c   : > { %v2463_v10 = vpop.xlane.xlu1 %2462  ;;  %v2461_v13 = vpop.xlane.xlu0 %2460 }
0x232d   : > { %vm2472_vm6 = vcmp.eq.f32.partialorder %v6358_v57, %v2463_v10  ;;  %vm2471_vm7 = vcmp.eq.f32.partialorder %v6361_v17, %v2461_v13 }
0x232e   : > { %v2480_v15 = vsel %vm2472_vm6, %v4667_v38, 128.0  ;;  %v2479_v16 = vsel %vm2471_vm7, %v4667_v38, 128.0 }
0x232f   : > { %2494 = vmin.xlane.f32.xlu1 %v2480_v15  ;;  %2492 = vmin.xlane.f32.xlu0 %v2479_v16 }
0x2330   : > { %v2465_v19 = vpop.xlane.xlu0 %2464 }
0x2331   : > { %vm2473_vm8 = vcmp.eq.f32.partialorder %v6367_v58, %v2465_v19 }
0x2332   : > { %v2481_v20 = vsel %vm2473_vm8, %v4667_v38, 128.0 }
0x2333   : > { %2496 = vmin.xlane.f32.xlu0 %v2481_v20 }
0x2338   : > { %v6401_v32 = vpop.permute.xlu0 %2961 }
0x2340   : > { %2966 = vperm.xlu1 %3829, %v2951_v23  }
0x2349   : > { %2971 = vperm.xlu0 %3828, %v2952_v26  }
0x2374   : > { %v6422_v24 = vpop.f32.mrb[4].mxu1 }
0x2375   : > { %v2931_v3 = vpop.f32.mrb[5].mxu1 }
0x23af   : > { %v2485_v33 = vpop.xlane.xlu0 %2484 }
0x23b0   : > { %v2483_v35 = vpop.xlane.xlu1 %2482  ;;  %vm2499_vm1 = vcmp.eq.f32.partialorder %v4667_v38, %v2485_v33  ;;  %v6457_v33 = vpop.f32.mrb[6].mxu1 }
0x23b1   : > { %vm2498_vm2 = vcmp.eq.f32.partialorder %v4667_v38, %v2483_v35  ;;  %v2507_v39 = vsel %vm2499_vm1, 1e+30, %v6333_v40  ;;  %v6459_v35 = vpop.f32.mrb[7].mxu1 }
0x23b2   : > { %v2506_v46 = vsel %vm2498_vm2, 1e+30, %v6336_v45  ;;  %2516 = vmin.xlane.f32.xlu0 %v2507_v39 }
0x23b3   : > { %2514 = vmin.xlane.f32.xlu1 %v2506_v46 }
0x23b4   : > { %v2487_v50 = vpop.xlane.xlu1 %2486 }
0x23b5   : > { %vm2500_vm3 = vcmp.eq.f32.partialorder %v4667_v38, %v2487_v50  ;;  %v3013_v50 = vmul.f32 2.0, %v6372_v62 }
0x23b6   : > { %v2508_v51 = vsel %vm2500_vm3, 1e+30, %v6342_v47 }
0x23b7   : > { %2518 = vmin.xlane.f32.xlu1 %v2508_v51 }
0x23b8   : > { %v2491_v14 = vpop.xlane.xlu1 %2490  ;;  %v2489_v54 = vpop.xlane.xlu0 %2488 }
0x23b9   : > { %vm2502_vm4 = vcmp.eq.f32.partialorder %v4667_v38, %v2491_v14  ;;  %vm2501_vm5 = vcmp.eq.f32.partialorder %v4667_v38, %v2489_v54  ;;  %v3014_v14 = vmul.f32 2.0, %v6370_v61 }
0x23ba   : > { %v2510_v18 = vsel %vm2502_vm4, 1e+30, %v6348_v11  ;;  %v2509_v40 = vsel %vm2501_vm5, 1e+30, %v6351_v12 }
0x23bb   : > { %2522 = vmin.xlane.f32.xlu1 %v2510_v18  ;;  %2520 = vmin.xlane.f32.xlu0 %v2509_v40 }
0x23bc   : > { %v2495_v45 = vpop.xlane.xlu1 %2494  ;;  %v2493_v21 = vpop.xlane.xlu0 %2492 }
0x23bd   : > { %vm2504_vm6 = vcmp.eq.f32.partialorder %v4667_v38, %v2495_v45  ;;  %vm2503_vm7 = vcmp.eq.f32.partialorder %v4667_v38, %v2493_v21 }
0x23be   : > { %v2512_v47 = vsel %vm2504_vm6, 1e+30, %v6358_v57  ;;  %v2511_v22 = vsel %vm2503_vm7, 1e+30, %v6361_v17 }
0x23bf   : > { %2526 = vmin.xlane.f32.xlu1 %v2512_v47  ;;  %2524 = vmin.xlane.f32.xlu0 %v2511_v22 }
0x23c0   : > { %v2497_v11 = vpop.xlane.xlu0 %2496  ;;  %v2967_v57 = vpop.permute.xlu1 %2966 }
0x23c1   : > { %vm2505_vm8 = vcmp.eq.f32.partialorder %v4667_v38, %v2497_v11  ;;  %v3016_v11 = vmul.f32 2.0, %v6394_v25 }
0x23c2   : > { %v2513_v12 = vsel %vm2505_vm8, 1e+30, %v6367_v58 }
0x23c3   : > { %2528 = vmin.xlane.f32.xlu0 %v2513_v12 }
0x23c8   : > { %v2972_v4 = vpop.permute.xlu0 %2971 }
0x23d0   : > { %2976 = vperm.xlu1 %3829, %v2953_v0  }
0x23d9   : > { %2981 = vperm.xlu0 %3828, %v2954_v1  }
0x23dd   : > { %2986 = vperm.xlu0 %3828, %v2955_v2  }
0x243f   : > { %v6424_v17 = vpop.xlane.xlu0 %2516 }
0x2440   : > { %v6426_v5 = vpop.xlane.xlu1 %2514  ;;  %vm2531_vm1 = vcmp.eq.f32.partialorder %v2507_v39, %v6424_v17  ;;  %v2957_v39 = vld [vmem:[%s4594_s22 + $0x38] sm:$0xff]  ;;  %3836 = vrsqrt.f32 %v6424_v17 }
0x2441   : > { %vm2530_vm2 = vcmp.eq.f32.partialorder %v2506_v46, %v6426_v5  ;;  %v2539_v58 = vsel %vm2531_vm1, %v4667_v38, 128.0  ;;  %v6462_v46 = vld [vmem:[#allocation11] ss:$0 sm:$0xff]  ;;  %3838 = vrsqrt.f32 %v6426_v5 }
0x2442   : > { %v2538_v6 = vsel %vm2530_vm2, %v4667_v38, 128.0  ;;  %2548 = vmin.xlane.f32.xlu0 %v2539_v58  ;;  %v3006_v54 = vadd.f32 %v6462_v46, %v2967_v57  ;;  %v3007_v45 = vadd.f32 %v6462_v46, %v2972_v4  ;;  %v3017_v57 = vmul.f32 2.0, %v2931_v3 }
0x2443   : > { %2546 = vmin.xlane.f32.xlu1 %v2538_v6 }
0x2444   : > { %v6434_v8 = vpop.xlane.xlu1 %2518  ;;  %v3022_v21 = vsub.f32 %v3006_v54, %v3014_v14 }
0x2445   : > { %vm2532_vm4 = vcmp.eq.f32.partialorder %v2508_v51, %v6434_v8  ;;  %v3005_v51 = vadd.f32 %v6462_v46, %v6401_v32  ;;  %3840 = vrsqrt.f32 %v6434_v8 }
0x2446   : > { %v2540_v13 = vsel %vm2532_vm4, %v4667_v38, 128.0  ;;  %v3030_v0 = vmax.f32 %v3022_v21, 1e-12  ;;  %3842 = vrsqrt.f32 %v5522_v36  ;;  %vm2566_vm4 = vcmp.eq.f32.partialorder %v5509_v31, 0.0 }
0x2448   : > { %v6432_v7 = vpop.xlane.xlu0 %2520  ;;  %v6442_v15 = vpop.xlane.xlu1 %2522  ;;  %v3038_v4 = vsel %vm1603_vm9, %v3030_v0, 0.0 }
0x2449   : > { %vm2533_vm3 = vcmp.eq.f32.partialorder %v2509_v40, %v6432_v7  ;;  %vm2534_vm6 = vcmp.eq.f32.partialorder %v2510_v18, %v6442_v15  ;;  %v3021_v18 = vsub.f32 %v3005_v51, %v3013_v50  ;;  %v3015_v40 = vmul.f32 2.0, %v6397_v27 }
0x244a   : > { %v2541_v9 = vsel %vm2533_vm3, %v4667_v38, 128.0  ;;  %v2542_v19 = vsel %vm2534_vm6, %v4667_v38, 128.0  ;;  %3844 = vrsqrt.f32 %v6442_v15  ;;  %vm2564_vm3 = vcmp.eq.f32.partialorder %v5509_v31, inf }
0x244b   : > { %2552 = vmin.xlane.f32.xlu1 %v2541_v9  ;;  %3846 = vrsqrt.f32 %v5524_v37  ;;  %vm2580_vm6 = vcmp.eq.f32.partialorder %v5517_v34, 0.0 }
0x244c   : > { %v6439_v10 = vpop.xlane.xlu0 %2524  ;;  %v6448_v20 = vpop.xlane.xlu1 %2526  ;;  %3848 = vrsqrt.f32 %v6432_v7 }
0x244d   : > { %vm2535_vm5 = vcmp.eq.f32.partialorder %v2511_v22, %v6439_v10  ;;  %vm2536_vm7 = vcmp.eq.f32.partialorder %v2512_v47, %v6448_v20  ;;  %v3029_v22 = vmax.f32 %v3021_v18, 1e-12  ;;  %3850 = vrsqrt.f32 %v6439_v10 }
0x244e   : > { %v2543_v16 = vsel %vm2535_vm5, %v4667_v38, 128.0  ;;  %v2544_v26 = vsel %vm2536_vm7, %v4667_v38, 128.0  ;;  %3852 = vrsqrt.f32 %v5532_v41  ;;  %vm2578_vm5 = vcmp.eq.f32.partialorder %v5517_v34, inf }
0x244f   : > { %2550 = vmin.xlane.f32.xlu1 %v2540_v13  ;;  %2556 = vmin.xlane.f32.xlu0 %v2543_v16  ;;  %v3037_v61 = vsel %vm1602_vm10, %v3029_v22, 0.0  ;;  %v3018_v13 = vmul.f32 2.0, %v6422_v24  ;;  %vm2592_vm7 = vcmp.eq.f32.partialorder %v5522_v36, inf  ;;  %3854 = vrsqrt.f32 %v5534_v42 }
0x2450   : > { %v6450_v23 = vpop.xlane.xlu0 %2528  ;;  %v2977_v47 = vpop.permute.xlu1 %2976  ;;  %3856 = vrsqrt.f32 %v6448_v20 }
0x2451   : > { %vm2537_vm8 = vcmp.eq.f32.partialorder %v2513_v12, %v6450_v23  ;;  %v3023_v12 = vsub.f32 %v3007_v45, %v3015_v40  ;;  %v3008_v62 = vadd.f32 %v6462_v46, %v2977_v47  ;;  %v3019_v45 = vmul.f32 2.0, %v6459_v35 }
0x2452   : > { %v2545_v28 = vsel %vm2537_vm8, %v4667_v38, 128.0  ;;  %vm2594_vm8 = vcmp.eq.f32.partialorder %v5522_v36, 0.0  ;;  %3858 = vrsqrt.f32 %v6450_v23 }
0x2453   : > { %2554 = vmin.xlane.f32.xlu0 %v2542_v19  ;;  %2558 = vmin.xlane.f32.xlu1 %v2544_v26  ;;  %v3031_v32 = vmax.f32 %v3023_v12, 1e-12  ;;  %v3024_v2 = vsub.f32 %v3008_v62, %v3016_v11  ;;  %3860 = vrsqrt.f32 %v5540_v43 }
0x2455   : > { %v3032_v25 = vmax.f32 %v3024_v2, 1e-12  ;;  %v3039_v6 = vsel %vm1604_vm11, %v3031_v32, 0.0 }
0x2457   : > { %2560 = vmin.xlane.f32.xlu0 %v2545_v28  ;;  %v3040_v3 = vsel %vm1605_vm13, %v3032_v25, 0.0 }
0x2458   : > { %v2982_v1 = vpop.permute.xlu0 %2981 }
0x2459   : > { %v3009_v27 = vadd.f32 %v6462_v46, %v2982_v1 }
0x245b   : > { %v3025_v58 = vsub.f32 %v3009_v27, %v3017_v57 }
0x245c   : > { %v2987_v48 = vpop.permute.xlu0 %2986 }
0x245d   : > { %v3033_v49 = vmax.f32 %v3025_v58, 1e-12  ;;  %v3010_v16 = vadd.f32 %v6462_v46, %v2987_v48  ;;  %v2574_v58 = vand.u32 2147483648, %v5507_v30  ;;  %v2567_v48 = vand.u32 2147483648, %v5509_v31 }
0x245f   : > { %v3041_v9 = vsel %vm1606_vm12, %v3033_v49, 0.0  ;;  %v3026_v26 = vsub.f32 %v3010_v16, %v3018_v13 }
0x2461   : > { %v3034_v56 = vmax.f32 %v3026_v26, 1e-12 }
0x2463   : > { %v3042_v24 = vsel %vm1607_vm15, %v3034_v56, 0.0 }
0x2464   : > { %2991 = vperm.xlu1 %3829, %v2956_v29  }
0x246d   : > { %2996 = vperm.xlu0 %3828, %v2957_v39  }
0x2488   : > { %3045 = vadd.xlane.f32.xlu1 %v3037_v61 }
0x248c   : > { %3047 = vadd.xlane.f32.xlu0 %v3038_v4  ;;  %3049 = vadd.xlane.f32.xlu1 %v3039_v6 }
0x2490   : > { %3051 = vadd.xlane.f32.xlu1 %v3040_v3 }
0x2494   : > { %3053 = vadd.xlane.f32.xlu1 %v3041_v9 }
0x24cf   : > { %v2549_v19 = vpop.xlane.xlu0 %2548 }
0x24d0   : > { %v2547_v52 = vpop.xlane.xlu1 %2546  ;;  %vm3062_vm9 = vcmp.eq.f32.partialorder %v4667_v38, %v2549_v19  ;;  %v2581_v19 = vand.u32 2147483648, %v5517_v34 }
0x24d1   : > { %v3070_v28 = vsel %vm3062_vm9, %v3030_v0, 0.0  ;;  %vm3061_vm10 = vcmp.eq.f32.partialorder %v4667_v38, %v2547_v52  ;;  %v3020_v0 = vmul.f32 2.0, %v6457_v33  ;;  %vm2627_vm9 = vcmp.eq.f32.partialorder %v6424_v17, inf }
0x24d2   : > { %3079 = vadd.xlane.f32.xlu1 %v3070_v28  ;;  %v3069_v29 = vsel %vm3061_vm10, %v3029_v22, 0.0  ;;  %v2595_v28 = vand.u32 2147483648, %v5522_v36  ;;  %vm2585_vm10 = vcmp.eq.f32.partialorder %v5524_v37, inf }
0x24d6   : > { %3077 = vadd.xlane.f32.xlu1 %v3069_v29 }
0x24d8   : > { %v2553_v55 = vpop.xlane.xlu1 %2552 }
0x24d9   : > { %vm3064_vm11 = vcmp.eq.f32.partialorder %v4667_v38, %v2553_v55 }
0x24da   : > { %v3072_v39 = vsel %vm3064_vm11, %v3032_v25, 0.0  ;;  %3055 = vadd.xlane.f32.xlu1 %v3042_v24  ;;  %vm2620_vm11 = vcmp.eq.f32.partialorder %v6426_v5, inf }
0x24db   : > { %3083 = vadd.xlane.f32.xlu0 %v3072_v39 }
0x24dc   : > { %v2551_v50 = vpop.xlane.xlu1 %2550  ;;  %v2557_v14 = vpop.xlane.xlu0 %2556 }
0x24dd   : > { %vm3063_vm12 = vcmp.eq.f32.partialorder %v4667_v38, %v2551_v50  ;;  %vm3066_vm13 = vcmp.eq.f32.partialorder %v4667_v38, %v2557_v14 }
0x24de   : > { %v3071_v51 = vsel %vm3063_vm12, %v3031_v32, 0.0  ;;  %v3074_v54 = vsel %vm3066_vm13, %v3034_v56, 0.0  ;;  %v2588_v56 = vand.u32 2147483648, %v5524_v37  ;;  %vm2599_vm12 = vcmp.eq.f32.partialorder %v5532_v41, inf }
0x24df   : > { %3081 = vadd.xlane.f32.xlu0 %v3071_v51  ;;  %vm2629_vm13 = vcmp.eq.f32.partialorder %v6424_v17, 0.0 }
0x24e0   : > { %v2555_v18 = vpop.xlane.xlu0 %2554  ;;  %v2559_v60 = vpop.xlane.xlu1 %2558 }
0x24e1   : > { %vm3065_vm1 = vcmp.eq.f32.partialorder %v4667_v38, %v2555_v18  ;;  %vm3067_vm15 = vcmp.eq.f32.partialorder %v4667_v38, %v2559_v60  ;;  %v2630_v18 = vand.u32 2147483648, %v6424_v17 }
0x24e2   : > { %v3073_v40 = vsel %vm3065_vm1, %v3033_v49, 0.0  ;;  %vm2634_vm1 = vcmp.eq.f32.partialorder %v6434_v8, inf }
0x24e3   : > { %3087 = vadd.xlane.f32.xlu0 %v3074_v54 }
0x24e4   : > { %v2992_v21 = vpop.permute.xlu1 %2991  ;;  %v2561_v22 = vpop.xlane.xlu0 %2560 }
0x24e5   : > { %v3011_v47 = vadd.f32 %v6462_v46, %v2992_v21  ;;  %vm3068_vm2 = vcmp.eq.f32.partialorder %v4667_v38, %v2561_v22  ;;  %v3831_v38 = vpop.eup %3830  ;;  %v2623_v21 = vand.u32 2147483648, %v6426_v5 }
0x24e6   : > { %v3833_v59 = vpop.eup %3832 }
0x24e7   : > { %3085 = vadd.xlane.f32.xlu0 %v3073_v40  ;;  %v3027_v11 = vsub.f32 %v3011_v47, %v3019_v45  ;;  %v3835_v63 = vpop.eup %3834  ;;  %v2563_v4 = vmul.f32 %v3833_v59, %v5509_v31 }
0x24e8   : > { %v3837_v33 = vpop.eup %3836  ;;  %v2577_v6 = vmul.f32 %v3835_v63, %v5517_v34  ;;  %v2644_v63 = vand.u32 2147483648, %v6432_v7 }
0x24e9   : > { %v3035_v12 = vmax.f32 %v3027_v11, 1e-12  ;;  %v3839_v25 = vpop.eup %3838  ;;  %v2626_v49 = vmul.f32 %v3837_v33, %v6424_v17  ;;  %v2565_v16 = vsel %vm2564_vm3, %v5509_v31, %v2563_v4  ;;  %vm2636_vm3 = vcmp.eq.f32.partialorder %v6434_v8, 0.0 }
0x24ea   : > { %v3841_v3 = vpop.eup %3840  ;;  %v2619_v52 = vmul.f32 %v3839_v25, %v6426_v5  ;;  %v2579_v24 = vsel %vm2578_vm5, %v5517_v34, %v2577_v6  ;;  %v6556_v14 = vsel %vm2566_vm4, %v2567_v48, %v2565_v16  ;;  %vm2641_vm4 = vcmp.eq.f32.partialorder %v6432_v7, inf }
0x24eb   : > { %v3043_v61 = vsel %vm1608_vm14, %v3035_v12, 0.0  ;;  %v3075_v32 = vsel %vm3067_vm15, %v3035_v12, 0.0  ;;  %vm2571_vm14 = vcmp.eq.f32.partialorder %v5507_v30, inf  ;;  %v3843_v13 = vpop.eup %3842  ;;  %v2628_v39 = vsel %vm2627_vm9, %v6424_v17, %v2626_v49 }
0x24ec   : > { %v2997_v62 = vpop.permute.xlu0 %2996  ;;  %3057 = vadd.xlane.f32.xlu1 %v3043_v61  ;;  %3089 = vadd.xlane.f32.xlu0 %v3075_v32  ;;  %v3845_v26 = vpop.eup %3844  ;;  %v2633_v50 = vmul.f32 %v3841_v3, %v6434_v8  ;;  %v2591_v54 = vmul.f32 %v3843_v13, %v5522_v36  ;;  %v6567_v31 = vsel %vm2580_vm6, %v2581_v19, %v2579_v24  ;;  %vm2587_vm15 = vcmp.eq.f32.partialorder %v5524_v37, 0.0 }
0x24ed   : > { %v3012_v1 = vadd.f32 %v6462_v46, %v2997_v62  ;;  %v2570_v46 = vmul.f32 %v3831_v38, %v5507_v30  ;;  %v3847_v29 = vpop.eup %3846  ;;  %v2647_v40 = vmul.f32 %v3845_v26, %v6442_v15  ;;  %v6569_v45 = vsel %vm2629_vm13, %v2630_v18, %v2628_v39 }
0x24ee   : > { %v3849_v51 = vpop.eup %3848  ;;  %v2584_v22 = vmul.f32 %v3847_v29, %v5524_v37  ;;  %v2635_v17 = vsel %vm2634_vm1, %v6434_v8, %v2633_v50  ;;  %v2593_v34 = vsel %vm2592_vm7, %v5522_v36, %v2591_v54  ;;  %v2637_v62 = vand.u32 2147483648, %v6434_v8 }
0x24ef   : > { %v3028_v35 = vsub.f32 %v3012_v1, %v3020_v0  ;;  %v2572_v9 = vsel %vm2571_vm14, %v5507_v30, %v2570_v46  ;;  %v3851_v60 = vpop.eup %3850  ;;  %v2640_v11 = vmul.f32 %v3849_v51, %v6432_v7  ;;  %vm2648_vm14 = vcmp.eq.f32.partialorder %v6442_v15, inf }
0x24f0   : > { %v3853_v47 = vpop.eup %3852  ;;  %v2654_v1 = vmul.f32 %v3851_v60, %v6439_v10  ;;  %v6594_v32 = vsel %vm2636_vm3, %v2637_v62, %v2635_v17  ;;  %vm2650_vm5 = vcmp.eq.f32.partialorder %v6442_v15, 0.0  ;;  %v2586_v38 = vsel %vm2585_vm10, %v5524_v37, %v2584_v22 }
0x24f1   : > { %v3036_v2 = vmax.f32 %v3028_v35, 1e-12  ;;  %v2598_v61 = vmul.f32 %v3853_v47, %v5532_v41  ;;  %v2651_v35 = vand.u32 2147483648, %v6442_v15  ;;  %v2642_v8 = vsel %vm2641_vm4, %v6432_v7, %v2640_v11 }
0x24f2   : > { %vm2655_vm6 = vcmp.eq.f32.partialorder %v6439_v10, inf  ;;  %v6619_v33 = vmax.f32 %v6567_v31, %v6594_v32  ;;  %vm2643_vm7 = vcmp.eq.f32.partialorder %v6432_v7, 0.0  ;;  %v6643_v7 = vsel %vm2587_vm15, %v2588_v56, %v2586_v38 }
0x24f3   : > { %v3076_v57 = vsel %vm3068_vm2, %v3036_v2, 0.0  ;;  %v3044_v27 = vsel %vm1609_vm0, %v3036_v2, 0.0  ;;  %vm2573_vm0 = vcmp.eq.f32.partialorder %v5507_v30, 0.0  ;;  %v2621_v30 = vsel %vm2620_vm11, %v6426_v5, %v2619_v52 }
0x24f4   : > { %3091 = vadd.xlane.f32.xlu0 %v3076_v57  ;;  %3059 = vadd.xlane.f32.xlu1 %v3044_v27  ;;  %v6548_v55 = vsel %vm2573_vm0, %v2574_v58, %v2572_v9  ;;  %vm2622_vm2 = vcmp.eq.f32.partialorder %v6426_v5, 0.0  ;;  %vm2601_vm0 = vcmp.eq.f32.partialorder %v5532_v41, 0.0  ;;  %v2649_v5 = vsel %vm2648_vm14, %v6442_v15, %v2647_v40  ;;  %v3855_v27 = vpop.eup %3854 }
0x24f5   : > { %v6581_v12 = vsel %vm2622_vm2, %v2623_v21, %v2621_v30  ;;  %v6588_v0 = vmax.f32 %v6548_v55, %v6569_v45  ;;  %v6600_v2 = vsel %vm2594_vm8, %v2595_v28, %v2593_v34  ;;  %v6611_v59 = vsel %vm2650_vm5, %v2651_v35, %v2649_v5  ;;  %v3857_v60 = vpop.eup %3856 }
0x24f6   : > { %v6604_v57 = vmax.f32 %v6556_v14, %v6581_v12  ;;  %v2656_v15 = vsel %vm2655_vm6, %v6439_v10, %v2654_v1  ;;  %v2600_v46 = vsel %vm2599_vm12, %v5532_v41, %v2598_v61  ;;  %v6628_v25 = vsel %vm2643_vm7, %v2644_v63, %v2642_v8  ;;  %v3859_v22 = vpop.eup %3858 }
0x24f7   : > { %v2683_v36 = vsub.f32 %v6548_v55, %v6588_v0  ;;  %v2707_v4 = vsub.f32 %v6569_v45, %v6588_v0  ;;  %v2658_v58 = vand.u32 2147483648, %v6439_v10  ;;  %v6635_v49 = vmax.f32 %v6600_v2, %v6611_v59  ;;  %v3861_v62 = vpop.eup %3860 }
0x24f8   : > { %v2682_v6 = vsub.f32 %v6556_v14, %v6604_v57  ;;  %vm2657_vm8 = vcmp.eq.f32.partialorder %v6439_v10, 0.0  ;;  %v2602_v3 = vand.u32 2147483648, %v5532_v41  ;;  %v2706_v9 = vsub.f32 %v6581_v12, %v6604_v57 }
0x24f9   : > { %v6648_v48 = vsel %vm2657_vm8, %v2658_v58, %v2656_v15  ;;  %v2692_v13 = vmul.f32 1.442695, %v2683_v36  ;;  %v2684_v16 = vsub.f32 %v6567_v31, %v6619_v33  ;;  %v6654_v10 = vmax.f32 %v6643_v7, %v6628_v25 }
0x24fa   : > { %v6659_v37 = vsel %vm2601_vm0, %v2602_v3, %v2600_v46  ;;  %v2716_v19 = vmul.f32 1.442695, %v2707_v4  ;;  %v2708_v52 = vsub.f32 %v6594_v32, %v6619_v33  ;;  %v2690_v26 = vmul.f32 1.442695, %v2682_v6 }
0x24fb   : > { %v2686_v28 = vsub.f32 %v6600_v2, %v6635_v49  ;;  %v6668_v56 = vmax.f32 %v6659_v37, %v6648_v48  ;;  %v2714_v29 = vmul.f32 1.442695, %v2706_v9  ;;  %v2710_v41 = vsub.f32 %v6611_v59, %v6635_v49 }
0x24fc   : > { %3862 = vpow2.f32 %v2692_v13  ;;  %v2694_v24 = vmul.f32 1.442695, %v2684_v16  ;;  %v2685_v39 = vsub.f32 %v6643_v7, %v6654_v10  ;;  %v2718_v50 = vmul.f32 1.442695, %v2708_v52 }
0x24fd   : > { %3864 = vpow2.f32 %v2716_v19  ;;  %v2709_v51 = vsub.f32 %v6628_v25, %v6654_v10  ;;  %v2698_v54 = vmul.f32 1.442695, %v2686_v28  ;;  %v2687_v18 = vsub.f32 %v6659_v37, %v6668_v56 }
0x24fe   : > { %3866 = vpow2.f32 %v2690_v26  ;;  %v2722_v30 = vmul.f32 1.442695, %v2710_v41  ;;  %v2711_v40 = vsub.f32 %v6648_v48, %v6668_v56  ;;  %v2696_v21 = vmul.f32 1.442695, %v2685_v39 }
0x24ff   : > { %3868 = vpow2.f32 %v2714_v29  ;;  %v2720_v47 = vmul.f32 1.442695, %v2709_v51  ;;  %v2700_v17 = vmul.f32 1.442695, %v2687_v18  ;;  %v2661_v11 = vmul.f32 %v3857_v60, %v6448_v20 }
0x2500   : > { %3870 = vpow2.f32 %v2694_v24  ;;  %v2724_v34 = vmul.f32 1.442695, %v2711_v40  ;;  %v2605_v5 = vmul.f32 %v3855_v27, %v5534_v42  ;;  %v2668_v1 = vmul.f32 %v3859_v22, %v6450_v23 }
0x2501   : > { %3872 = vpow2.f32 %v2718_v50  ;;  %vm2662_vm9 = vcmp.eq.f32.partialorder %v6448_v20, inf  ;;  %v2612_v8 = vmul.f32 %v3861_v62, %v5540_v43  ;;  %vm2606_vm10 = vcmp.eq.f32.partialorder %v5534_v42, inf }
0x2502   : > { %3874 = vpow2.f32 %v2698_v54  ;;  %v2663_v38 = vsel %vm2662_vm9, %v6448_v20, %v2661_v11  ;;  %v2665_v36 = vand.u32 2147483648, %v6448_v20  ;;  %vm2669_vm11 = vcmp.eq.f32.partialorder %v6450_v23, inf }
0x2503   : > { %3876 = vpow2.f32 %v2722_v30  ;;  %v2607_v15 = vsel %vm2606_vm10, %v5534_v42, %v2605_v5  ;;  %vm2664_vm12 = vcmp.eq.f32.partialorder %v6448_v20, 0.0  ;;  %v2670_v46 = vsel %vm2669_vm11, %v6450_v23, %v2668_v1 }
0x2504   : > { %3878 = vpow2.f32 %v2696_v21  ;;  %v2609_v58 = vand.u32 2147483648, %v5534_v42  ;;  %vm2613_vm13 = vcmp.eq.f32.partialorder %v5540_v43, inf  ;;  %v6694_v6 = vsel %vm2664_vm12, %v2665_v36, %v2663_v38 }
0x2505   : > { %3880 = vpow2.f32 %v2720_v47  ;;  %v2672_v3 = vand.u32 2147483648, %v6450_v23  ;;  %vm2608_vm1 = vcmp.eq.f32.partialorder %v5534_v42, 0.0  ;;  %v2614_v13 = vsel %vm2613_vm13, %v5540_v43, %v2612_v8 }
0x2506   : > { %v3863_v61 = vpop.eup %3862  ;;  %3882 = vpow2.f32 %v2700_v17  ;;  %vm2671_vm15 = vcmp.eq.f32.partialorder %v6450_v23, 0.0  ;;  %v2616_v20 = vand.u32 2147483648, %v5540_v43  ;;  %v6701_v19 = vsel %vm2608_vm1, %v2609_v58, %v2607_v15 }
0x2507   : > { %v3865_v35 = vpop.eup %3864  ;;  %3884 = vpow2.f32 %v2724_v34  ;;  %v6703_v52 = vsel %vm2671_vm15, %v2672_v3, %v2670_v46  ;;  %vm2615_vm2 = vcmp.eq.f32.partialorder %v5540_v43, 0.0  ;;  %v6708_v28 = vmax.f32 %v6701_v19, %v6694_v6 }
0x2508   : > { %v3867_v63 = vpop.eup %3866  ;;  %v6710_v42 = vsel %vm2615_vm2, %v2616_v20, %v2614_v13  ;;  %v2731_v24 = vadd.f32 %v3865_v35, %v3863_v61 }
0x2509   : > { %v3869_v27 = vpop.eup %3868  ;;  %v6716_v39 = vmax.f32 %v6710_v42, %v6703_v52  ;;  %v2688_v43 = vsub.f32 %v6701_v19, %v6708_v28  ;;  %v2712_v40 = vsub.f32 %v6694_v6, %v6708_v28 }
0x250a   : > { %v3871_v4 = vpop.eup %3870  ;;  %v2730_v51 = vadd.f32 %v3869_v27, %v3867_v63  ;;  %3886 = vlog2.f32 %v2731_v24 }
0x250b   : > { %v3873_v9 = vpop.eup %3872  ;;  %v2689_v21 = vsub.f32 %v6710_v42, %v6716_v39  ;;  %v2713_v47 = vsub.f32 %v6703_v52, %v6716_v39  ;;  %v2702_v11 = vmul.f32 1.442695, %v2688_v43  ;;  %v2726_v34 = vmul.f32 1.442695, %v2712_v40 }
0x250c   : > { %v3875_v16 = vpop.eup %3874  ;;  %v2732_v18 = vadd.f32 %v3873_v9, %v3871_v4  ;;  %3888 = vlog2.f32 %v2730_v51 }
0x250d   : > { %v3877_v26 = vpop.eup %3876  ;;  %v2704_v62 = vmul.f32 1.442695, %v2689_v21  ;;  %v2728_v5 = vmul.f32 1.442695, %v2713_v47 }
0x250e   : > { %v3879_v29 = vpop.eup %3878  ;;  %v2734_v30 = vadd.f32 %v3877_v26, %v3875_v16  ;;  %3890 = vlog2.f32 %v2732_v18  ;;  %v6737_v26 = vshrl.u32 %v581_v44, 7 }
0x250f   : > { %v3881_v41 = vpop.eup %3880 }
0x2510   : > { %v3883_v50 = vpop.eup %3882  ;;  %v2733_v60 = vadd.f32 %v3881_v41, %v3879_v29  ;;  %3892 = vlog2.f32 %v2734_v30  ;;  %v6760_v30 = vstv %s4601_s14 }
0x2511   : > { %v3885_v54 = vpop.eup %3884 }
0x2512   : > { %v2735_v22 = vadd.f32 %v3885_v54, %v3883_v50  ;;  %3894 = vlog2.f32 %v2733_v60 }
0x2514   : > { %3896 = vlog2.f32 %v2735_v22  ;;  %v3887_v61 = vpop.eup %3886 }
0x2515   : > { %v6712_v23 = vpop.xlane.xlu1 %3045  ;;  %3898 = vpow2.f32 %v2702_v11  ;;  %v2741_v46 = vmul.f32 0.6931472, %v3887_v61 }
0x2516   : > { %3900 = vpow2.f32 %v2726_v34  ;;  %v3889_v8 = vpop.eup %3888  ;;  %vm3095_vm14 = vcmp.eq.f32.partialorder %v6712_v23, inf  ;;  %vm3097_vm0 = vcmp.eq.f32.partialorder %v6712_v23, 0.0 }
0x2517   : > { %3902 = vpow2.f32 %v2704_v62  ;;  %v2739_v4 = vmul.f32 0.6931472, %v3889_v8  ;;  %v6743_v50 = vadd.f32 %v2741_v46, %v6588_v0  ;;  %v6803_v46 = vadd.s32 %v6760_v30, %v6737_v26 }
0x2518   : > { %3904 = vpow2.f32 %v2728_v5  ;;  %v3891_v38 = vpop.eup %3890 }
0x2519   : > { %v6726_v17 = vpop.xlane.xlu1 %3049  ;;  %v6730_v35 = vpop.xlane.xlu0 %3047  ;;  %v2743_v3 = vmul.f32 0.6931472, %v3891_v38  ;;  %v6746_v51 = vadd.f32 %v2739_v4, %v6604_v57 }
0x251a   : > { %v3893_v63 = vpop.eup %3892  ;;  %3906 = vrsqrt.f32 %v6730_v35  ;;  %vm3102_vm3 = vcmp.eq.f32.partialorder %v6730_v35, inf  ;;  %vm3104_vm4 = vcmp.eq.f32.partialorder %v6730_v35, 0.0  ;;  %vm3109_vm5 = vcmp.eq.f32.partialorder %v6726_v17, inf }
0x251b   : > { %v2747_v13 = vmul.f32 0.6931472, %v3893_v63  ;;  %3908 = vrsqrt.f32 %v6712_v23  ;;  %v6750_v54 = vadd.f32 %v2743_v3, %v6619_v33  ;;  %v2780_v33 = vadd.s32 8, %v6737_v26 }
0x251c   : > { %v3895_v36 = vpop.eup %3894  ;;  %v2781_v3 = vadd.s32 16, %v6737_v26  ;;  %vm3111_vm9 = vcmp.eq.f32.partialorder %v6726_v17, 0.0 }
0x251d   : > { %v6728_v1 = vpop.xlane.xlu1 %3051  ;;  %v2745_v16 = vmul.f32 0.6931472, %v3895_v36  ;;  %v6753_v44 = vadd.f32 %v2747_v13, %v6635_v49  ;;  %v2763_v49 = vsub.f32 %v6548_v55, %v6743_v50  ;;  %v6795_v63 = vadd.s32 %v6760_v30, %v2780_v33 }
0x251e   : > { %v3897_v15 = vpop.eup %3896  ;;  %3910 = vrsqrt.f32 %v6728_v1  ;;  %v3105_v13 = vand.u32 2147483648, %v6730_v35  ;;  %vm3116_vm8 = vcmp.eq.f32.partialorder %v6728_v1, inf  ;;  %vm3118_vm12 = vcmp.eq.f32.partialorder %v6728_v1, 0.0 }
0x251f   : > { %v3899_v58 = vpop.eup %3898  ;;  %v2749_v41 = vmul.f32 0.6931472, %v3897_v15  ;;  %v6756_v43 = vadd.f32 %v2745_v16, %v6654_v10  ;;  %v2771_v10 = vsub.f32 %v6569_v45, %v6743_v50  ;;  %v2782_v16 = vadd.s32 24, %v6737_v26 }
0x2520   : > { %v3901_v9 = vpop.eup %3900 }
0x2521   : > { %v6733_v27 = vpop.xlane.xlu1 %3053  ;;  %v3903_v20 = vpop.eup %3902  ;;  %v2736_v18 = vadd.f32 %v3901_v9, %v3899_v58  ;;  %v6765_v40 = vadd.f32 %v2749_v41, %v6668_v56  ;;  %v3098_v58 = vand.u32 2147483648, %v6712_v23  ;;  %v6855_v62 = vadd.s32 %v6760_v30, %v2782_v16 }
0x2522   : > { %v3905_v24 = vpop.eup %3904  ;;  %vm3123_vm15 = vcmp.eq.f32.partialorder %v6733_v27, inf }
0x2523   : > { %v2737_v57 = vadd.f32 %v3905_v24, %v3903_v20  ;;  %v2775_v50 = vsub.f32 %v6648_v48, %v6765_v40 }
0x2524   : > { %v3907_v60 = vpop.eup %3906 }
0x2525   : > { %v3101_v61 = vmul.f32 %v3907_v60, %v6730_v35  ;;  %v3909_v36 = vpop.eup %3908 }
0x2526   : > { %v3094_v20 = vmul.f32 %v3909_v36, %v6712_v23 }
0x2527   : > { %v3103_v41 = vsel %vm3102_vm3, %v6730_v35, %v3101_v61  ;;  %v6827_v61 = vadd.s32 %v6760_v30, %v2781_v3 }
0x2528   : > { %v3911_v4 = vpop.eup %3910 }
0x2529   : > { %v3115_v33 = vmul.f32 %v3911_v4, %v6728_v1 }
0x252b   : > { %v3117_v35 = vsel %vm3116_vm8, %v6728_v1, %v3115_v33 }
0x255f   : > { %v6740_v29 = vpop.xlane.xlu1 %3079 }
0x2560   : > { %3912 = vrsqrt.f32 %v6740_v29  ;;  %vm3158_vm6 = vcmp.eq.f32.partialorder %v6740_v29, inf  ;;  %v3161_v60 = vand.u32 2147483648, %v6740_v29  ;;  %vm3160_vm7 = vcmp.eq.f32.partialorder %v6740_v29, 0.0 }
0x2561   : > { %3914 = vrsqrt.f32 %v6726_v17 }
0x2563   : > { %v6762_v0 = vpop.xlane.xlu1 %3077 }
0x2564   : > { %3916 = vrsqrt.f32 %v6762_v0  ;;  %vm3151_vm10 = vcmp.eq.f32.partialorder %v6762_v0, inf  ;;  %vm3153_vm11 = vcmp.eq.f32.partialorder %v6762_v0, 0.0 }
0x2565   : > { %3918 = vlog2.f32 %v2736_v18 }
0x2566   : > { %3920 = vlog2.f32 %v2737_v57  ;;  %v3112_v57 = vand.u32 2147483648, %v6726_v17 }
0x2567   : > { %v6790_v8 = vpop.xlane.xlu1 %3055 }
0x2568   : > { %3922 = vrsqrt.f32 %v6790_v8  ;;  %v6799_v15 = vpop.xlane.xlu0 %3083  ;;  %vm3130_vm2 = vcmp.eq.f32.partialorder %v6790_v8, inf  ;;  %vm3132_vm3 = vcmp.eq.f32.partialorder %v6790_v8, 0.0 }
0x2569   : > { %3924 = vrsqrt.f32 %v6799_v15  ;;  %vm3172_vm13 = vcmp.eq.f32.partialorder %v6799_v15, inf  ;;  %vm3174_vm1 = vcmp.eq.f32.partialorder %v6799_v15, 0.0 }
0x256a   : > { %v3913_v9 = vpop.eup %3912 }
0x256b   : > { %v3157_v24 = vmul.f32 %v3913_v9, %v6740_v29  ;;  %v3915_v18 = vpop.eup %3914  ;;  %v3106_v9 = vsel %vm3104_vm4, %v3105_v13, %v3103_v41  ;;  %vm2797_vm4 = vcmp.lt.s32.totalorder %v6795_v63, %v4623_v53 }
0x256c   : > { %v6821_v11 = vpop.xlane.xlu0 %3081 }
0x256d   : > { %v3159_v5 = vsel %vm3158_vm6, %v6740_v29, %v3157_v24  ;;  %3926 = vrsqrt.f32 %v6821_v11  ;;  %v3096_v29 = vsel %vm3095_vm14, %v6712_v23, %v3094_v20  ;;  %v3108_v24 = vmul.f32 %v3915_v18, %v6726_v17 }
0x256e   : > { %v3917_v36 = vpop.eup %3916  ;;  %3928 = vrsqrt.f32 %v6733_v27  ;;  %v3162_v4 = vsel %vm3160_vm7, %v3161_v60, %v3159_v5  ;;  %v3154_v5 = vand.u32 2147483648, %v6762_v0  ;;  %v3099_v33 = vsel %vm3097_vm0, %v3098_v58, %v3096_v29 }
0x256f   : > { %v6833_v38 = vpop.eup %3918  ;;  %v3206_v3 = vmax.f32 %v3106_v9, %v3162_v4  ;;  %v3150_v22 = vmul.f32 %v3917_v36, %v6762_v0  ;;  %v3119_v36 = vand.u32 2147483648, %v6728_v1  ;;  %vm3165_vm14 = vcmp.eq.f32.partialorder %v6821_v11, inf }
0x2570   : > { %v6845_v13 = vpop.xlane.xlu0 %3087  ;;  %v6847_v41 = vpop.eup %3920  ;;  %vm3167_vm0 = vcmp.eq.f32.partialorder %v6821_v11, 0.0  ;;  %vm3125_vm7 = vcmp.eq.f32.partialorder %v6733_v27, 0.0 }
0x2571   : > { %v3214_v20 = vsub.f32 %v3106_v9, %v3206_v3  ;;  %v3238_v60 = vsub.f32 %v3162_v4, %v3206_v3  ;;  %v3152_v18 = vsel %vm3151_vm10, %v6762_v0, %v3150_v22  ;;  %3930 = vrsqrt.f32 %v6845_v13 }
0x2572   : > { %v3923_v56 = vpop.eup %3922  ;;  %v3155_v34 = vsel %vm3153_vm11, %v3154_v5, %v3152_v18  ;;  %v3110_v0 = vsel %vm3109_vm5, %v6726_v17, %v3108_v24  ;;  %v3120_v22 = vsel %vm3118_vm12, %v3119_v36, %v3117_v35  ;;  %v3175_v3 = vand.u32 2147483648, %v6799_v15 }
0x2573   : > { %v3925_v47 = vpop.eup %3924  ;;  %v3223_v21 = vmul.f32 1.442695, %v3214_v20  ;;  %v3247_v9 = vmul.f32 1.442695, %v3238_v60  ;;  %v3205_v4 = vmax.f32 %v3099_v33, %v3155_v34  ;;  %v3129_v1 = vmul.f32 %v3923_v56, %v6790_v8 }
0x2574   : > { %v3171_v23 = vmul.f32 %v3925_v47, %v6799_v15  ;;  %v6863_v58 = vpop.xlane.xlu0 %3085  ;;  %vm3186_vm5 = vcmp.eq.f32.partialorder %v6845_v13, inf  ;;  %vm3188_vm6 = vcmp.eq.f32.partialorder %v6845_v13, 0.0  ;;  %vm2796_vm10 = vcmp.lt.s32.totalorder %v6803_v46, %v4623_v53 }
0x2575   : > { %3932 = vpow2.f32 %v3223_v21  ;;  %v3213_v16 = vsub.f32 %v3099_v33, %v3205_v4  ;;  %v3237_v29 = vsub.f32 %v3155_v34, %v3205_v4  ;;  %v3113_v21 = vsel %vm3111_vm9, %v3112_v57, %v3110_v0 }
0x2576   : > { %3934 = vpow2.f32 %v3247_v9  ;;  %v3173_v5 = vsel %vm3172_vm13, %v6799_v15, %v3171_v23  ;;  %v3168_v15 = vand.u32 2147483648, %v6821_v11  ;;  %v3131_v9 = vsel %vm3130_vm2, %v6790_v8, %v3129_v1 }
0x2577   : > { %v3927_v24 = vpop.eup %3926  ;;  %v3221_v35 = vmul.f32 1.442695, %v3213_v16  ;;  %v3245_v20 = vmul.f32 1.442695, %v3237_v29  ;;  %v3176_v47 = vsel %vm3174_vm1, %v3175_v3, %v3173_v5  ;;  %3936 = vrsqrt.f32 %v6863_v58 }
0x2578   : > { %v3929_v60 = vpop.eup %3928  ;;  %v3208_v34 = vmax.f32 %v3120_v22, %v3176_v47  ;;  %v3164_v56 = vmul.f32 %v3927_v24, %v6821_v11  ;;  %vm3179_vm8 = vcmp.eq.f32.partialorder %v6863_v58, inf  ;;  %vm3181_vm9 = vcmp.eq.f32.partialorder %v6863_v58, 0.0 }
0x2579   : > { %3938 = vpow2.f32 %v3221_v35  ;;  %v3122_v36 = vmul.f32 %v3929_v60, %v6733_v27  ;;  %v3126_v60 = vand.u32 2147483648, %v6733_v27  ;;  %vm2798_vm11 = vcmp.lt.s32.totalorder %v6827_v61, %v4623_v53 }
0x257a   : > { %3940 = vpow2.f32 %v3245_v20  ;;  %v3216_v18 = vsub.f32 %v3120_v22, %v3208_v34  ;;  %v3240_v33 = vsub.f32 %v3176_v47, %v3208_v34  ;;  %v3166_v17 = vsel %vm3165_vm14, %v6821_v11, %v3164_v56 }
0x257b   : > { %v3931_v57 = vpop.eup %3930  ;;  %v3169_v4 = vsel %vm3167_vm0, %v3168_v15, %v3166_v17  ;;  %v3133_v22 = vand.u32 2147483648, %v6790_v8  ;;  %v3189_v11 = vand.u32 2147483648, %v6845_v13  ;;  %vm2799_vm12 = vcmp.lt.s32.totalorder %v6855_v62, %v4623_v53 }
0x257c   : > { %v3227_v0 = vmul.f32 1.442695, %v3216_v18  ;;  %v3251_v23 = vmul.f32 1.442695, %v3240_v33  ;;  %v3207_v16 = vmax.f32 %v3113_v21, %v3169_v4  ;;  %v3185_v29 = vmul.f32 %v3931_v57, %v6845_v13 }
0x257d   : > { %v3134_v35 = vsel %vm3132_vm3, %v3133_v22, %v3131_v9  ;;  %v3182_v9 = vand.u32 2147483648, %v6863_v58  ;;  %v6908_v22 = vpop.xlane.xlu1 %3057  ;;  %vm3325_vm13 = vcmask 7168  }
0x257e   : > { %3942 = vpow2.f32 %v3227_v0  ;;  %v3215_v3 = vsub.f32 %v3113_v21, %v3207_v16  ;;  %v3239_v1 = vsub.f32 %v3169_v4, %v3207_v16  ;;  %v3187_v5 = vsel %vm3186_vm5, %v6845_v13, %v3185_v29 }
0x257f   : > { %v3933_v24 = vpop.eup %3932  ;;  %3944 = vpow2.f32 %v3251_v23  ;;  %v3190_v20 = vsel %vm3188_vm6, %v3189_v11, %v3187_v5  ;;  %v3124_v21 = vsel %vm3123_vm15, %v6733_v27, %v3122_v36  ;;  %vm3137_vm1 = vcmp.eq.f32.partialorder %v6908_v22, inf }
0x2580   : > { %v3935_v47 = vpop.eup %3934  ;;  %v3225_v34 = vmul.f32 1.442695, %v3215_v3  ;;  %v3249_v56 = vmul.f32 1.442695, %v3239_v1  ;;  %v3210_v15 = vmax.f32 %v3134_v35, %v3190_v20  ;;  %v3262_v4 = vmul.f32 %v3933_v24, %v2763_v49  ;;  %v6915_v49 = vpop.xlane.xlu0 %3089 }
0x2581   : > { %v3937_v18 = vpop.eup %3936  ;;  %v3294_v13 = vadd.f32 %v3935_v47, %v3933_v24  ;;  %v3270_v36 = vmul.f32 %v3935_v47, %v2771_v10  ;;  %v3127_v11 = vsel %vm3125_vm7, %v3126_v60, %v3124_v21  ;;  %v4259_v10 = vmov 0.0   ;;  %v6929_v47 = vpop.xlane.xlu1 %3059 }
0x2582   : > { %3946 = vpow2.f32 %v3225_v34  ;;  %v3218_v8 = vsub.f32 %v3134_v35, %v3210_v15  ;;  %v3242_v33 = vsub.f32 %v3190_v20, %v3210_v15  ;;  %v3178_v17 = vmul.f32 %v3937_v18, %v6863_v58 }
0x2583   : > { %v3939_v57 = vpop.eup %3938  ;;  %3948 = vrcp.f32 %v3294_v13  ;;  %v3517_v27 = vsel %vm2797_vm4, 1.0, %v4259_v10  ;;  %v2784_v1 = vadd.s32 40, %v6737_v26  ;;  %v3278_v35 = vadd.f32 %v3270_v36, %v3262_v4 }
0x2584   : > { %v3941_v0 = vpop.eup %3940  ;;  %3950 = vpow2.f32 %v3249_v56  ;;  %v3231_v23 = vmul.f32 1.442695, %v3218_v8  ;;  %v3255_v16 = vmul.f32 1.442695, %v3242_v33  ;;  %v3180_v29 = vsel %vm3179_vm8, %v6863_v58, %v3178_v17  ;;  %v6931_v63 = vpop.xlane.xlu0 %3091 }
0x2585   : > { %v3293_v3 = vadd.f32 %v3941_v0, %v3939_v57  ;;  %v3183_v55 = vsel %vm3181_vm9, %v3182_v9, %v3180_v29  ;;  %3952 = vrsqrt.f32 %v6908_v22  ;;  %v7175_v60 = vsub.f32 %v6556_v14, %v6746_v51 }
0x2586   : > { %3954 = vpow2.f32 %v3231_v23  ;;  %v3209_v45 = vmax.f32 %v3127_v11, %v3183_v55  ;;  %v7176_v56 = vsub.f32 %v6581_v12, %v6746_v51  ;;  %v6944_v8 = vadd.s32 32, %v6737_v26 }
0x2587   : > { %3956 = vrcp.f32 %v3293_v3  ;;  %v3261_v34 = vmul.f32 %v3939_v57, %v7175_v60  ;;  %v6947_v33 = vadd.s32 %v6760_v30, %v2784_v1  ;;  %v3516_v14 = vsel %vm2796_vm10, 1.0, %v4259_v10 }
0x2588   : > { %v3943_v58 = vpop.eup %3942  ;;  %3958 = vpow2.f32 %v3255_v16  ;;  %v3217_v5 = vsub.f32 %v3127_v11, %v3209_v45  ;;  %v3241_v24 = vsub.f32 %v3183_v55, %v3209_v45  ;;  %v3269_v15 = vmul.f32 %v3941_v0, %v7176_v56 }
0x2589   : > { %v3945_v20 = vpop.eup %3944  ;;  %3960 = vrsqrt.f32 %v6915_v49  ;;  %v6957_v51 = vsel %vm2798_vm11, 1.0, %v4259_v10  ;;  %v7177_v17 = vsub.f32 %v6643_v7, %v6756_v43  ;;  %v3286_v9 = vsub.f32 0.0, %v3278_v35 }
0x258a   : > { %v3296_v18 = vadd.f32 %v3945_v20, %v3943_v58  ;;  %v3229_v21 = vmul.f32 1.442695, %v3217_v5  ;;  %v3253_v13 = vmul.f32 1.442695, %v3241_v24  ;;  %3962 = vrsqrt.f32 %v6929_v47 }
0x258b   : > { %3964 = vrsqrt.f32 %v6931_v63  ;;  %v3264_v57 = vmul.f32 %v3943_v58, %v7177_v17  ;;  %v6966_v46 = vsel %vm2799_vm12, 1.0, %v4259_v10  ;;  %v7178_v36 = vsub.f32 %v6628_v25, %v6756_v43 }
0x258c   : > { %v3947_v12 = vpop.eup %3946  ;;  %3966 = vrcp.f32 %v3296_v18  ;;  %v3277_v61 = vadd.f32 %v3269_v15, %v3261_v34  ;;  %vm3139_vm15 = vcmp.eq.f32.partialorder %v6908_v22, 0.0  ;;  %v3140_v11 = vand.u32 2147483648, %v6908_v22 }
0x258d   : > { %v3949_v4 = vpop.eup %3948  ;;  %3968 = vpow2.f32 %v3229_v21  ;;  %v3272_v0 = vmul.f32 %v3945_v20, %v7178_v36  ;;  %vm3193_vm2 = vcmp.eq.f32.partialorder %v6915_v49, inf  ;;  %vm3195_vm14 = vcmp.eq.f32.partialorder %v6915_v49, 0.0 }
0x258e   : > { %v3951_v23 = vpop.eup %3950  ;;  %3970 = vpow2.f32 %v3253_v13  ;;  %v3304_v7 = vmul.f32 %v3949_v4, %v3286_v9  ;;  %v3285_v3 = vsub.f32 0.0, %v3277_v61  ;;  %v3196_v1 = vand.u32 2147483648, %v6915_v49 }
0x258f   : > { %v3953_v16 = vpop.eup %3952  ;;  %v3295_v29 = vadd.f32 %v3951_v23, %v3947_v12  ;;  %v3280_v43 = vadd.f32 %v3272_v0, %v3264_v57  ;;  %vm3144_vm0 = vcmp.eq.f32.partialorder %v6929_v47, inf  ;;  %vm3146_vm3 = vcmp.eq.f32.partialorder %v6929_v47, 0.0 }
0x2590   : > { %v3955_v62 = vpop.eup %3954  ;;  %v3136_v25 = vmul.f32 %v3953_v16, %v6908_v22  ;;  %v3318_v55 = vmul.f32 %v3517_v27, %v3304_v7  ;;  %v7179_v24 = vsub.f32 %v6567_v31, %v6750_v54  ;;  %v7180_v27 = vsub.f32 %v6594_v32, %v6750_v54 }
0x2591   : > { %v3957_v45 = vpop.eup %3956  ;;  %3972 = vrcp.f32 %v3295_v29  ;;  %v3147_v56 = vand.u32 2147483648, %v6929_v47  ;;  %vm3200_vm4 = vcmp.eq.f32.partialorder %v6931_v63, inf  ;;  %vm3202_vm5 = vcmp.eq.f32.partialorder %v6931_v63, 0.0 }
0x2592   : > { %v3959_v58 = vpop.eup %3958  ;;  %v3138_v5 = vsel %vm3137_vm1, %v6908_v22, %v3136_v25  ;;  %v3263_v35 = vmul.f32 %v3947_v12, %v7179_v24  ;;  %v3271_v20 = vmul.f32 %v3951_v23, %v7180_v27  ;;  %v3302_v60 = vmul.f32 %v3957_v45, %v3285_v3 }
0x2593   : > { %v3961_v34 = vpop.eup %3960  ;;  %v3298_v15 = vadd.f32 %v3959_v58, %v3955_v62  ;;  %vm2801_vm6 = vcmp.lt.s32.totalorder %v6947_v33, %v4623_v53  ;;  %v7181_v31 = vsub.f32 %v6659_v37, %v6765_v40  ;;  %v3288_v54 = vsub.f32 0.0, %v3280_v43 }
0x2594   : > { %v3963_v18 = vpop.eup %3962  ;;  %v3192_v21 = vmul.f32 %v3961_v34, %v6915_v49  ;;  %v3317_v13 = vmul.f32 %v3516_v14, %v3302_v60  ;;  %v3141_v17 = vsel %vm3139_vm15, %v3140_v11, %v3138_v5  ;;  %v3274_v9 = vmul.f32 %v3959_v58, %v2775_v50 }
0x2595   : > { %v3266_v32 = vmul.f32 %v3955_v62, %v7181_v31  ;;  %v3965_v12 = vpop.eup %3964  ;;  %v3143_v57 = vmul.f32 %v3963_v18, %v6929_v47  ;;  %3974 = vrcp.f32 %v3298_v15  ;;  %v3203_v14 = vand.u32 2147483648, %v6931_v63 }
0x2596   : > { %v3967_v4 = vpop.eup %3966  ;;  %v3194_v36 = vsel %vm3193_vm2, %v6915_v49, %v3192_v21  ;;  %v3199_v37 = vmul.f32 %v3965_v12, %v6931_v63  ;;  %v3279_v0 = vadd.f32 %v3271_v20, %v3263_v35  ;;  %v3326_v50 = vsel %vm3325_vm13, %v3317_v13, 0.0 }
0x2597   : > { %v3969_v61 = vpop.eup %3968  ;;  %v3197_v22 = vsel %vm3195_vm14, %v3196_v1, %v3194_v36  ;;  %v3145_v48 = vsel %vm3144_vm0, %v6929_v47, %v3143_v57  ;;  %v3308_v40 = vmul.f32 %v3967_v4, %v3288_v54  ;;  %v3327_v11 = vsel %vm3325_vm13, %v3318_v55, 0.0 }
0x2598   : > { %v3971_v23 = vpop.eup %3970  ;;  %v3211_v7 = vmax.f32 %v3141_v17, %v3197_v22  ;;  %v3148_v16 = vsel %vm3146_vm3, %v3147_v56, %v3145_v48  ;;  %v3201_v29 = vsel %vm3200_vm4, %v6931_v63, %v3199_v37  ;;  %v3282_v62 = vadd.f32 %v3274_v9, %v3266_v32 }
0x2599   : > { %v3204_v49 = vsel %vm3202_vm5, %v3203_v14, %v3201_v29  ;;  %v3297_v25 = vadd.f32 %v3971_v23, %v3969_v61  ;;  %v3320_v43 = vmul.f32 %v6966_v46, %v3308_v40  ;;  %v3328_v58 = vadd.f32 %v3327_v11, %v3326_v50 }
0x259a   : > { %v3219_v3 = vsub.f32 %v3141_v17, %v3211_v7  ;;  %v3243_v45 = vsub.f32 %v3197_v22, %v3211_v7  ;;  %v3212_v1 = vmax.f32 %v3148_v16, %v3204_v49  ;;  %v7182_v47 = vsub.f32 %v6600_v2, %v6753_v44 }
0x259b   : > { %v3973_v5 = vpop.eup %3972  ;;  %v7183_v35 = vsub.f32 %v6611_v59, %v6753_v44  ;;  %v3287_v27 = vsub.f32 0.0, %v3279_v0  ;;  %3976 = vrcp.f32 %v3297_v25  ;;  %v2792_v46 = vadd.s32 %v6760_v30, %v6944_v8 }
0x259c   : > { %v3265_v24 = vmul.f32 %v3969_v61, %v7182_v47  ;;  %v3233_v63 = vmul.f32 1.442695, %v3219_v3  ;;  %v3257_v20 = vmul.f32 1.442695, %v3243_v45  ;;  %v3220_v60 = vsub.f32 %v3148_v16, %v3212_v1 }
0x259d   : > { %v3273_v55 = vmul.f32 %v3971_v23, %v7183_v35  ;;  %v3244_v34 = vsub.f32 %v3204_v49, %v3212_v1  ;;  %v3306_v56 = vmul.f32 %v3973_v5, %v3287_v27  ;;  %v3290_v21 = vsub.f32 0.0, %v3282_v62 }
0x259e   : > { %3978 = vpow2.f32 %v3233_v63  ;;  %v3235_v15 = vmul.f32 1.442695, %v3220_v60  ;;  %v3521_v59 = vsel %vm2801_vm6, 1.0, %v4259_v10  ;;  %v2751_v54 = vmul.f32 0.6931472, %v6833_v38 }
0x259f   : > { %v3259_v18 = vmul.f32 1.442695, %v3244_v34  ;;  %v3975_v2 = vpop.eup %3974  ;;  %3980 = vpow2.f32 %v3257_v20  ;;  %v3319_v44 = vmul.f32 %v6957_v51, %v3306_v56  ;;  %v3281_v31 = vadd.f32 %v3273_v55, %v3265_v24 }
0x25a0   : > { %3982 = vpow2.f32 %v3235_v15  ;;  %v3312_v32 = vmul.f32 %v3975_v2, %v3290_v21  ;;  %vm2800_vm7 = vcmp.lt.s32.totalorder %v2792_v46, %v4623_v53  ;;  %v2753_v17 = vmul.f32 0.6931472, %v6847_v41 }
0x25a1   : > { %3984 = vpow2.f32 %v3259_v18  ;;  %v3329_v8 = vsel %vm3325_vm13, %v3319_v44, 0.0  ;;  %v3331_v57 = vsel %vm3325_vm13, %v3320_v43, 0.0  ;;  %v3289_v33 = vsub.f32 0.0, %v3281_v31 }
0x25a2   : > { %v3322_v13 = vmul.f32 %v3521_v59, %v3312_v32  ;;  %v3330_v12 = vadd.f32 %v3329_v8, %v3328_v58  ;;  %v3520_v51 = vsel %vm2800_vm7, 1.0, %v4259_v10  ;;  %v2760_v36 = vadd.f32 %v2751_v54, %v6708_v28 }
0x25a3   : > { %v2761_v14 = vadd.f32 %v2753_v17, %v6716_v39  ;;  %v2785_v16 = vadd.s32 48, %v6737_v26  ;;  %v2786_v49 = vadd.s32 56, %v6737_v26 }
0x25a4   : > { %v3332_v9 = vadd.f32 %v3331_v57, %v3330_v12  ;;  %v2768_v48 = vsub.f32 %v6701_v19, %v2760_v36  ;;  %v2776_v7 = vsub.f32 %v6694_v6, %v2760_v36  ;;  %v3335_v11 = vsel %vm3325_vm13, %v3322_v13, 0.0 }
0x25a5   : > { %v3977_v4 = vpop.eup %3976  ;;  %v2769_v23 = vsub.f32 %v6710_v42, %v2761_v14  ;;  %v2777_v29 = vsub.f32 %v6703_v52, %v2761_v14  ;;  %v2794_v43 = vadd.s32 %v6760_v30, %v2785_v16  ;;  %v2795_v6 = vadd.s32 %v6760_v30, %v2786_v49 }
0x25a6   : > { %v3310_v37 = vmul.f32 %v3977_v4, %v3289_v33 }
0x25a7   : > { %vm2802_vm8 = vcmp.lt.s32.totalorder %v2794_v43, %v4623_v53  ;;  %vm2803_vm9 = vcmp.lt.s32.totalorder %v2795_v6, %v4623_v53 }
0x25a8   : > { %v3979_v0 = vpop.eup %3978  ;;  %v3321_v38 = vmul.f32 %v3520_v51, %v3310_v37  ;;  %v3522_v26 = vsel %vm2802_vm8, 1.0, %v4259_v10  ;;  %v3523_v35 = vsel %vm2803_vm9, 1.0, %v4259_v10 }
0x25a9   : > { %v3981_v61 = vpop.eup %3980  ;;  %v3267_v19 = vmul.f32 %v3979_v0, %v2768_v48 }
0x25aa   : > { %v3983_v22 = vpop.eup %3982  ;;  %v3299_v40 = vadd.f32 %v3981_v61, %v3979_v0  ;;  %v3333_v41 = vsel %vm3325_vm13, %v3321_v38, 0.0  ;;  %v3275_v62 = vmul.f32 %v3981_v61, %v2776_v7 }
0x25ab   : > { %v3985_v50 = vpop.eup %3984  ;;  %v3334_v28 = vadd.f32 %v3333_v41, %v3332_v9  ;;  %v3268_v42 = vmul.f32 %v3983_v22, %v2769_v23 }
0x25ac   : > { %v3300_v39 = vadd.f32 %v3985_v50, %v3983_v22  ;;  %3986 = vrcp.f32 %v3299_v40  ;;  %v3276_v3 = vmul.f32 %v3985_v50, %v2777_v29  ;;  %v3283_v45 = vadd.f32 %v3275_v62, %v3267_v19 }
0x25ad   : > { %v3336_v25 = vadd.f32 %v3335_v11, %v3334_v28 }
0x25ae   : > { %3988 = vrcp.f32 %v3300_v39  ;;  %v3284_v52 = vadd.f32 %v3276_v3, %v3268_v42  ;;  %v3291_v1 = vsub.f32 0.0, %v3283_v45 }
0x25b0   : > { %v3292_v5 = vsub.f32 0.0, %v3284_v52 }
0x25b6   : > { %v3987_v58 = vpop.eup %3986 }
0x25b7   : > { %v3314_v47 = vmul.f32 %v3987_v58, %v3291_v1 }
0x25b8   : > { %v3989_v24 = vpop.eup %3988 }
0x25b9   : > { %v3316_v55 = vmul.f32 %v3989_v24, %v3292_v5  ;;  %v3323_v27 = vmul.f32 %v3522_v26, %v3314_v47 }
0x25bb   : > { %v3324_v63 = vmul.f32 %v3523_v35, %v3316_v55  ;;  %v3337_v30 = vsel %vm3325_vm13, %v3323_v27, 0.0 }
0x25bc   : > { %v3338_v20 = vadd.f32 %v3337_v30, %v3336_v25 }
0x25bd   : > { %v3339_v60 = vsel %vm3325_vm13, %v3324_v63, 0.0 }
0x25be   : > { %v3340_v53 = vadd.f32 %v3339_v60, %v3338_v20 }
0x25c0   : > { %3341 = vadd.xlane.f32.xlu1 %v3340_v53 }
0x264d   : > { %v3342_v34 = vpop.xlane.xlu1 %3341 }
0x264e   : > { %v3343_v46 = vrot.slane %v3342_v34, 4 }
0x2650   : > { %v3344_v56 = vadd.f32 %v3343_v46, %v3342_v34 }
0x2652   : > { %v3345_v15 = vrot.slane %v3344_v56, 2 }
0x2654   : > { %v3346_v18 = vadd.f32 %v3345_v15, %v3344_v56 }
0x2656   : > { %v3347_v10 = vrot.slane %v3346_v18, 1 }
0x2658   : > { %v3348_v21 = vadd.f32 %v3347_v10, %v3346_v18 }
0x265a   : > { %3730 = vpush %v3348_v21 }
0x268b   : > { %s3731_s18 = spop %3730 }
0x268c   : > { %v3350_v2 = vstv %s3731_s18 }
0x268d   : > { %3352 = vst [vmem:[%s359_s9] sm:$0x1] %v3350_v2 }
0x268e   : > { %4175 = shalt.err (!%p4172_p1)
}
0x268f   : > { %s4176_s30 = scalar_lea.hbm %s7068_s28, 16  ;;  %s4180_s24 = scalar_lea.hbm %s7117_s7, 32 }
0x2690   : > { %p4177_p6 = scmp.ne.s32.totalorder %s7068_s28, %s4176_s30  ;;  %p4181_p5 = scmp.lt.u32.totalorder %s7068_s28, %s7117_s7 }
0x2691   : > { %p4182_p9 = scmp.lt.u32.totalorder %s4180_s24, %s4176_s30  ;;  %p4184_p0 = scmp.lt.u32.totalorder %s4176_s30, %s7068_s28 }
0x2692   : > { %p4178_p2 = pnand %p4177_p6, %p7184_p8 }
0x2693   : > { %p4183_p13 = por %p4182_p9, %p4181_p5 }
0x2694   : > { %p4179_p3 = pneg %p4178_p2 }
0x2695   : > { %p4185_p7 = por %p4184_p0, %p4183_p13 }
0x2697   : > { %p4186_p10 = pnand %p4185_p7, %p4179_p3 }
0x2699   : > { %4189 = shalt.err (!%p4186_p10)
}
0x269a   : > { %3752 = dma.vmem_to_hbm [thread:$0]  (%p7184_p8), %s7063_s21, 16, %s7068_s28, %s3354_s23  }
0x269b PF: > { %s7185_s20 = sld [smem:[#allocation22_spill]]  ;;  %s7186_s22 = sld [smem:[#allocation24_spill]] }
0x269c   : > { %p7188_p4 = scmp.ge.s32.totalorder %s4248_s29, 2 }
0x26a1   : > { %s3378_s14 = sand.u32 1, %s7185_s20   ;;  %p7187_p11 = scmp.ne.s32.totalorder %s7186_s22, 0 }
0x26a2   : > { %s3379_s8 = scalar_lea.sflag [#allocation6], %s3378_s14 }
0x26a3   : > { %p3775_p12 = pnand %p7188_p4, %p7187_p11 }
0x26a5   : > { %4231 = dma.done.wait (!%p3775_p12), %s3379_s8, 16  }
0x26a6   : > { %4233 = vsyncadd (!%p3775_p12), %s3379_s8, 4294967280  ;;  %s7189_s29 = sld [smem:[#allocation25_spill]]  ;;  %s7190_s17 = sld [smem:[#allocation23_spill]] }
0x26a7   : > { %s7191_s28 = sld [smem:[#allocation26_spill]]  ;;  %s7192_s26 = smov %s4240_s27 }
0x26ac   : > { %p21_p1 = scmp.ge.s32.totalorder %s7189_s29, 4   ;;  %s7193_s27 = smov %s7190_s17 }
0x26ae   :  { %23 = sbr.rel (!%p21_p1) target bundleno = 11 (0xb), region = 117 }
0x26b5   :  { %3383 = vsyncpa [#allocation5], 1 }
0x26b6   :  { %3385 = vsyncpa [#allocation5 + $0x1], 1 }
0x26b7   :  { %3386 = vsyncpa [#allocation8], 1 }
0x26b8   :  { %3387 = vsyncpa [#allocation12], 1 }
0x26b9   :  { %3388 = vsyncpa [#allocation6], 1 }
0x26ba   :  { %3390 = vsyncpa [#allocation6 + $0x1], 1 }

</bundles_post_ra>
